<compile_context>
chip_gen: v7x
topology: tpu7x:2x2x1
jax: 0.10.0
libtpu: 0.0.40
codegen_flags: <defaults>
</compile_context>

<pallas_src>
import functools

import jax
import jax.numpy as jnp
import numpy as np
from jax.experimental import pallas as pl
from jax.experimental.pallas import tpu as pltpu


def _basic_block_kernel(x_ref, w1_ref, w2_ref, b1_ref, b2_ref,
                        out_ref, xf_s, h1p_s,
                        *, H, W, P, R, Cin, Cout):
    """One image per grid step.

    x_ref  : (1, H*P, Cin) f32   -- W-padded, row-flattened image (P = W+2)
    w1_ref : (3, 3, Cin, Cout) bf16  (bn1 scale folded in)
    w2_ref : (3, 3, Cout, Cout) bf16 (bn2 scale folded in)
    b1/b2  : (1, Cout) f32           (folded bn biases)
    out_ref: (1, H*P, Cout) f32  -- valid at columns [0, W) of each P-row
    xf_s   : (R, Cin) f32 scratch, R = (H+2)*P + 2  (fully padded flat image)
    h1p_s  : (R, Cout) f32 scratch                  (fully padded flat h1)
    """
    f32 = jnp.float32
    bf16 = jnp.bfloat16
    HP = H * P

    # ---- refresh zero borders of the padded scratches (tiny: ~2*(P+2) rows).
    # Done every step so correctness never depends on grid scheduling order
    # (e.g. megacore partitioning of the "parallel" batch axis).
    xf_s[0:P, :] = jnp.zeros((P, Cin), f32)
    xf_s[P + HP:R, :] = jnp.zeros((R - P - HP, Cin), f32)
    h1p_s[0:P + 1, :] = jnp.zeros((P + 1, Cout), f32)
    h1p_s[P + 1 + HP:R, :] = jnp.zeros((R - P - 1 - HP, Cout), f32)

    # ---- place the W-padded input rows into the padded scratch: ONE
    # contiguous store; W-pad columns arrive already zero from the wrapper,
    # H-pad rows are the zero border above.
    xf_s[P:P + HP, :] = x_ref[0]

    # ---- conv1 (+ folded bn1 scale): 9 row-shifted contiguous slices, bf16 MXU
    # Output local index l = y*P + x corresponds to output pixel (y, x);
    # columns x in {W, W+1} of each P-row are garbage and handled below.
    acc1 = None
    for kh in range(3):
        for kw in range(3):
            s = kh * P + kw
            lhs = xf_s[s:s + HP, :].astype(bf16)
            part = jnp.dot(lhs, w1_ref[kh, kw], preferred_element_type=f32)
            acc1 = part if acc1 is None else acc1 + part

    # ---- bn1 bias + relu; zero the 2 garbage columns per row (they land
    # exactly on the W-pad positions of the flat padded layout), then one
    # contiguous interior store of padded h1.
    h1 = jnp.maximum(acc1 + b1_ref[...], 0.0)
    col = jax.lax.broadcasted_iota(jnp.int32, (HP, 1), 0) % P
    h1 = jnp.where(col < W, h1, 0.0)
    h1p_s[P + 1:P + 1 + HP, :] = h1

    # ---- conv2 (+ folded bn2 scale)
    acc2 = None
    for kh in range(3):
        for kw in range(3):
            s = kh * P + kw
            lhs = h1p_s[s:s + HP, :].astype(bf16)
            part = jnp.dot(lhs, w2_ref[kh, kw], preferred_element_type=f32)
            acc2 = part if acc2 is None else acc2 + part

    # ---- bn2 bias + residual (re-read from the padded-input scratch) + relu
    residual = xf_s[P + 1:P + 1 + HP, :]
    out = jnp.maximum(acc2 + b2_ref[...] + residual, 0.0)
    out_ref[0] = out.astype(out_ref.dtype)


def basic_block_pallas(x_nchw, w1_oihw, w2_oihw,
                       g1, beta1, mean1, var1,
                       g2, beta2, mean2, var2,
                       eps=1e-5):
    """x_nchw: [N, C, H, W] float32 (PyTorch layout). Returns [N, C, H, W]."""
    N, Cin, H, W = x_nchw.shape
    Cout = w1_oihw.shape[0]
    assert w1_oihw.shape == (Cout, Cin, 3, 3)
    assert w2_oihw.shape == (Cout, Cout, 3, 3)
    assert Cin == Cout, "stride=1 / no-downsample BasicBlock requires inplanes == planes"

    P = W + 2                    # padded row width
    R = (H + 2) * P + 2          # flat padded rows (+2 guard rows for last tap)
    HP = H * P

    # NCHW -> NHWC, pad W only, flatten rows -> (N, H*P, C). The H padding
    # is produced inside the kernel; no duplicate padded copy lives in HBM.
    x_nhwc = jnp.transpose(x_nchw, (0, 2, 3, 1)).astype(jnp.float32)     # [N,H,W,C]
    x_wpad = jnp.pad(x_nhwc, ((0, 0), (0, 0), (1, 1), (0, 0)))           # [N,H,P,C]
    x_flat = x_wpad.reshape(N, HP, Cin)

    # Fold BN (inference form): scale into the conv weights (per out channel),
    # bias kept separate. Weights go to the MXU as bf16.
    s1 = g1 / jnp.sqrt(var1 + eps)
    b1 = (beta1 - mean1 * s1).astype(jnp.float32).reshape(1, Cout)
    s2 = g2 / jnp.sqrt(var2 + eps)
    b2 = (beta2 - mean2 * s2).astype(jnp.float32).reshape(1, Cout)
    w1 = (jnp.transpose(w1_oihw, (2, 3, 1, 0)) * s1[None, None, None, :]
          ).astype(jnp.bfloat16)                                          # [3,3,Cin,Cout]
    w2 = (jnp.transpose(w2_oihw, (2, 3, 1, 0)) * s2[None, None, None, :]
          ).astype(jnp.bfloat16)                                          # [3,3,Cout,Cout]

    kernel = functools.partial(_basic_block_kernel,
                               H=H, W=W, P=P, R=R, Cin=Cin, Cout=Cout)

    out_flat = pl.pallas_call(
        kernel,
        out_shape=jax.ShapeDtypeStruct((N, HP, Cout), jnp.float32),
        grid_spec=pltpu.PrefetchScalarGridSpec(
            num_scalar_prefetch=0,
            grid=(N,),
            in_specs=[
                pl.BlockSpec((1, HP, Cin), lambda n: (n, 0, 0)),
                pl.BlockSpec((3, 3, Cin, Cout), lambda n: (0, 0, 0, 0)),
                pl.BlockSpec((3, 3, Cout, Cout), lambda n: (0, 0, 0, 0)),
                pl.BlockSpec((1, Cout), lambda n: (0, 0)),
                pl.BlockSpec((1, Cout), lambda n: (0, 0)),
            ],
            out_specs=pl.BlockSpec((1, HP, Cout), lambda n: (n, 0, 0)),
            scratch_shapes=[
                pltpu.VMEM((R, Cin), jnp.float32),    # padded flat input
                pltpu.VMEM((R, Cout), jnp.float32),   # padded flat h1
            ],
        ),
        compiler_params=pltpu.CompilerParams(
            dimension_semantics=("parallel",)),
    )(x_flat, w1, w2, b1, b2)

    # Drop the 2 garbage columns per row, back to NCHW.
    out = out_flat.reshape(N, H, P, Cout)[:, :, :W, :]
    return jnp.transpose(out, (0, 3, 1, 2))


def _reference_jax(x_nchw, w1, w2, g1, beta1, mean1, var1,
                   g2, beta2, mean2, var2, eps=1e-5):
    """Plain-JAX reference (NCHW, same as PyTorch eval-mode forward)."""
    def conv(x, w):
        return jax.lax.conv_general_dilated(
            x, w, window_strides=(1, 1), padding=((1, 1), (1, 1)),
            dimension_numbers=("NCHW", "OIHW", "NCHW"))

    def bn(x, g, b, m, v):
        g = g.reshape(1, -1, 1, 1); b = b.reshape(1, -1, 1, 1)
        m = m.reshape(1, -1, 1, 1); v = v.reshape(1, -1, 1, 1)
        return (x - m) / jnp.sqrt(v + eps) * g + b

    out = jnp.maximum(bn(conv(x_nchw, w1), g1, beta1, mean1, var1), 0.0)
    out = bn(conv(out, w2), g2, beta2, mean2, var2)
    return jnp.maximum(out + x_nchw, 0.0)


if __name__ == "__main__":
    # Small shapes consistent with the module: inplanes = planes = 4, 16x16 spatial.
    N, C, H, W = 2, 4, 16, 16

    key = jax.random.PRNGKey(0)
    k = jax.random.split(key, 8)
    x = jax.random.normal(k[0], (N, C, H, W), jnp.float32)
    w1 = jax.random.normal(k[1], (C, C, 3, 3), jnp.float32) * 0.1   # conv1.weight
    w2 = jax.random.normal(k[2], (C, C, 3, 3), jnp.float32) * 0.1   # conv2.weight
    g1 = 1.0 + 0.1 * jax.random.normal(k[3], (C,), jnp.float32)     # bn1.weight
    beta1 = 0.1 * jax.random.normal(k[4], (C,), jnp.float32)        # bn1.bias
    mean1 = 0.05 * jax.random.normal(k[5], (C,), jnp.float32)       # bn1.running_mean
    var1 = 1.0 + 0.1 * jnp.abs(jax.random.normal(k[6], (C,), jnp.float32))  # bn1.running_var
    g2 = jnp.ones((C,), jnp.float32)
    beta2 = jnp.zeros((C,), jnp.float32)
    mean2 = jnp.zeros((C,), jnp.float32)
    var2 = jnp.ones((C,), jnp.float32)

    out = basic_block_pallas(x, w1, w2, g1, beta1, mean1, var1, g2, beta2, mean2, var2)
    out = jax.block_until_ready(out)

    ref = jax.block_until_ready(
        _reference_jax(x, w1, w2, g1, beta1, mean1, var1, g2, beta2, mean2, var2))

    assert out.shape == (N, C, H, W)
    # bf16 MXU operands with f32 accumulation -> loosened tolerance vs pure f32.
    np.testing.assert_allclose(np.asarray(out), np.asarray(ref), rtol=2e-2, atol=2e-2)
    print("KERNEL_OK")
</pallas_src>

<mosaic_0001>
module attributes {stable_mosaic.version = 11 : i64} {
  func.func @_basic_block_kernel(%arg0: i32, %arg1: memref<1x288x4xf32, #tpu.memory_space<vmem>>, %arg2: memref<3x3x4x4xbf16, #tpu.memory_space<vmem>>, %arg3: memref<3x3x4x4xbf16, #tpu.memory_space<vmem>>, %arg4: memref<1x4xf32, #tpu.memory_space<vmem>>, %arg5: memref<1x4xf32, #tpu.memory_space<vmem>>, %arg6: memref<1x288x4xf32, #tpu.memory_space<vmem>>, %arg7: memref<326x4xf32, #tpu.memory_space<vmem>>, %arg8: memref<326x4xf32, #tpu.memory_space<vmem>>) attributes {dimension_semantics = [#tpu.dimension_semantics<parallel>], iteration_bounds = array<i64: 2>, scalar_prefetch = 0 : i64, scratch_operands = 2 : i64, tpu.core_type = #tpu.core_type<tc>, window_params = [{transform_indices = @transform_0, window_bounds = array<i64: 1, 288, 4>}, {pipeline_mode = #tpu.pipeline_mode<synchronous>, transform_indices = @transform_1, window_bounds = array<i64: 3, 3, 4, 4>}, {pipeline_mode = #tpu.pipeline_mode<synchronous>, transform_indices = @transform_2, window_bounds = array<i64: 3, 3, 4, 4>}, {pipeline_mode = #tpu.pipeline_mode<synchronous>, transform_indices = @transform_3, window_bounds = array<i64: 1, 4>}, {pipeline_mode = #tpu.pipeline_mode<synchronous>, transform_indices = @transform_4, window_bounds = array<i64: 1, 4>}, {transform_indices = @transform_5, window_bounds = array<i64: 1, 288, 4>}]} {
    %cst = arith.constant 0.000000e+00 : f32
    %0 = vector.broadcast %cst : f32 to vector<18x4xf32>
    %c0 = arith.constant 0 : index
    %c0_0 = arith.constant 0 : index
    %1 = vector.load %arg7[%c0, %c0_0] : memref<326x4xf32, #tpu.memory_space<vmem>>, vector<18x4xf32>
    tpu.vector_store %arg7[%c0, %c0_0], %0 {strides = array<i32>} : memref<326x4xf32, #tpu.memory_space<vmem>>, vector<18x4xf32>,
    %cst_1 = arith.constant 0.000000e+00 : f32
    %2 = vector.broadcast %cst_1 : f32 to vector<20x4xf32>
    %c306 = arith.constant 306 : index
    %c0_2 = arith.constant 0 : index
    %3 = vector.load %arg7[%c306, %c0_2] : memref<326x4xf32, #tpu.memory_space<vmem>>, vector<20x4xf32>
    tpu.vector_store %arg7[%c306, %c0_2], %2 {strides = array<i32>} : memref<326x4xf32, #tpu.memory_space<vmem>>, vector<20x4xf32>,
    %cst_3 = arith.constant 0.000000e+00 : f32
    %4 = vector.broadcast %cst_3 : f32 to vector<19x4xf32>
    %c0_4 = arith.constant 0 : index
    %c0_5 = arith.constant 0 : index
    %5 = vector.load %arg8[%c0_4, %c0_5] : memref<326x4xf32, #tpu.memory_space<vmem>>, vector<19x4xf32>
    tpu.vector_store %arg8[%c0_4, %c0_5], %4 {strides = array<i32>} : memref<326x4xf32, #tpu.memory_space<vmem>>, vector<19x4xf32>,
    %cst_6 = arith.constant 0.000000e+00 : f32
    %6 = vector.broadcast %cst_6 : f32 to vector<19x4xf32>
    %c307 = arith.constant 307 : index
    %c0_7 = arith.constant 0 : index
    %7 = vector.load %arg8[%c307, %c0_7] : memref<326x4xf32, #tpu.memory_space<vmem>>, vector<19x4xf32>
    tpu.vector_store %arg8[%c307, %c0_7], %6 {strides = array<i32>} : memref<326x4xf32, #tpu.memory_space<vmem>>, vector<19x4xf32>,
    %c0_8 = arith.constant 0 : index
    %c0_9 = arith.constant 0 : index
    %c0_10 = arith.constant 0 : index
    %8 = vector.load %arg1[%c0_8, %c0_9, %c0_10] : memref<1x288x4xf32, #tpu.memory_space<vmem>>, vector<1x288x4xf32>
    %9 = vector.shape_cast %8 : vector<1x288x4xf32> to vector<288x4xf32>
    %c18 = arith.constant 18 : index
    %c0_11 = arith.constant 0 : index
    %10 = vector.load %arg7[%c18, %c0_11] : memref<326x4xf32, #tpu.memory_space<vmem>>, vector<288x4xf32>
    tpu.vector_store %arg7[%c18, %c0_11], %9 {strides = array<i32>} : memref<326x4xf32, #tpu.memory_space<vmem>>, vector<288x4xf32>,
    %c0_12 = arith.constant 0 : index
    %c0_13 = arith.constant 0 : index
    %11 = vector.load %arg7[%c0_12, %c0_13] : memref<326x4xf32, #tpu.memory_space<vmem>>, vector<288x4xf32>
    %12 = arith.truncf %11 : vector<288x4xf32> to vector<288x4xbf16>
    %c0_14 = arith.constant 0 : index
    %c0_15 = arith.constant 0 : index
    %c0_16 = arith.constant 0 : index
    %c0_17 = arith.constant 0 : index
    %13 = vector.load %arg2[%c0_14, %c0_15, %c0_16, %c0_17] : memref<3x3x4x4xbf16, #tpu.memory_space<vmem>>, vector<1x1x4x4xbf16>
    %14 = vector.shape_cast %13 : vector<1x1x4x4xbf16> to vector<4x4xbf16>
    %cst_18 = arith.constant dense<0.000000e+00> : vector<288x4xf32>
    %15 = tpu.matmul %12, %14, %cst_18 {dimension_numbers = #tpu.dot_dimension_numbers<[1], [0], [0], [1], [0, 0, 1, 1], [], []>} : vector<288x4xbf16>, vector<4x4xbf16>, vector<288x4xf32> -> vector<288x4xf32>
    %c1 = arith.constant 1 : index
    %c0_19 = arith.constant 0 : index
    %16 = vector.load %arg7[%c1, %c0_19] : memref<326x4xf32, #tpu.memory_space<vmem>>, vector<288x4xf32>
    %17 = arith.truncf %16 : vector<288x4xf32> to vector<288x4xbf16>
    %c0_20 = arith.constant 0 : index
    %c1_21 = arith.constant 1 : index
    %c0_22 = arith.constant 0 : index
    %c0_23 = arith.constant 0 : index
    %18 = vector.load %arg2[%c0_20, %c1_21, %c0_22, %c0_23] : memref<3x3x4x4xbf16, #tpu.memory_space<vmem>>, vector<1x1x4x4xbf16>
    %19 = vector.shape_cast %18 : vector<1x1x4x4xbf16> to vector<4x4xbf16>
    %cst_24 = arith.constant dense<0.000000e+00> : vector<288x4xf32>
    %20 = tpu.matmul %17, %19, %cst_24 {dimension_numbers = #tpu.dot_dimension_numbers<[1], [0], [0], [1], [0, 0, 1, 1], [], []>} : vector<288x4xbf16>, vector<4x4xbf16>, vector<288x4xf32> -> vector<288x4xf32>
    %21 = arith.addf %15, %20 : vector<288x4xf32>
    %c2 = arith.constant 2 : index
    %c0_25 = arith.constant 0 : index
    %22 = vector.load %arg7[%c2, %c0_25] : memref<326x4xf32, #tpu.memory_space<vmem>>, vector<288x4xf32>
    %23 = arith.truncf %22 : vector<288x4xf32> to vector<288x4xbf16>
    %c0_26 = arith.constant 0 : index
    %c2_27 = arith.constant 2 : index
    %c0_28 = arith.constant 0 : index
    %c0_29 = arith.constant 0 : index
    %24 = vector.load %arg2[%c0_26, %c2_27, %c0_28, %c0_29] : memref<3x3x4x4xbf16, #tpu.memory_space<vmem>>, vector<1x1x4x4xbf16>
    %25 = vector.shape_cast %24 : vector<1x1x4x4xbf16> to vector<4x4xbf16>
    %cst_30 = arith.constant dense<0.000000e+00> : vector<288x4xf32>
    %26 = tpu.matmul %23, %25, %cst_30 {dimension_numbers = #tpu.dot_dimension_numbers<[1], [0], [0], [1], [0, 0, 1, 1], [], []>} : vector<288x4xbf16>, vector<4x4xbf16>, vector<288x4xf32> -> vector<288x4xf32>
    %27 = arith.addf %21, %26 : vector<288x4xf32>
    %c18_31 = arith.constant 18 : index
    %c0_32 = arith.constant 0 : index
    %28 = vector.load %arg7[%c18_31, %c0_32] : memref<326x4xf32, #tpu.memory_space<vmem>>, vector<288x4xf32>
    %29 = arith.truncf %28 : vector<288x4xf32> to vector<288x4xbf16>
    %c1_33 = arith.constant 1 : index
    %c0_34 = arith.constant 0 : index
    %c0_35 = arith.constant 0 : index
    %c0_36 = arith.constant 0 : index
    %30 = vector.load %arg2[%c1_33, %c0_34, %c0_35, %c0_36] : memref<3x3x4x4xbf16, #tpu.memory_space<vmem>>, vector<1x1x4x4xbf16>
    %31 = vector.shape_cast %30 : vector<1x1x4x4xbf16> to vector<4x4xbf16>
    %cst_37 = arith.constant dense<0.000000e+00> : vector<288x4xf32>
    %32 = tpu.matmul %29, %31, %cst_37 {dimension_numbers = #tpu.dot_dimension_numbers<[1], [0], [0], [1], [0, 0, 1, 1], [], []>} : vector<288x4xbf16>, vector<4x4xbf16>, vector<288x4xf32> -> vector<288x4xf32>
    %33 = arith.addf %27, %32 : vector<288x4xf32>
    %c19 = arith.constant 19 : index
    %c0_38 = arith.constant 0 : index
    %34 = vector.load %arg7[%c19, %c0_38] : memref<326x4xf32, #tpu.memory_space<vmem>>, vector<288x4xf32>
    %35 = arith.truncf %34 : vector<288x4xf32> to vector<288x4xbf16>
    %c1_39 = arith.constant 1 : index
    %c1_40 = arith.constant 1 : index
    %c0_41 = arith.constant 0 : index
    %c0_42 = arith.constant 0 : index
    %36 = vector.load %arg2[%c1_39, %c1_40, %c0_41, %c0_42] : memref<3x3x4x4xbf16, #tpu.memory_space<vmem>>, vector<1x1x4x4xbf16>
    %37 = vector.shape_cast %36 : vector<1x1x4x4xbf16> to vector<4x4xbf16>
    %cst_43 = arith.constant dense<0.000000e+00> : vector<288x4xf32>
    %38 = tpu.matmul %35, %37, %cst_43 {dimension_numbers = #tpu.dot_dimension_numbers<[1], [0], [0], [1], [0, 0, 1, 1], [], []>} : vector<288x4xbf16>, vector<4x4xbf16>, vector<288x4xf32> -> vector<288x4xf32>
    %39 = arith.addf %33, %38 : vector<288x4xf32>
    %c20 = arith.constant 20 : index
    %c0_44 = arith.constant 0 : index
    %40 = vector.load %arg7[%c20, %c0_44] : memref<326x4xf32, #tpu.memory_space<vmem>>, vector<288x4xf32>
    %41 = arith.truncf %40 : vector<288x4xf32> to vector<288x4xbf16>
    %c1_45 = arith.constant 1 : index
    %c2_46 = arith.constant 2 : index
    %c0_47 = arith.constant 0 : index
    %c0_48 = arith.constant 0 : index
    %42 = vector.load %arg2[%c1_45, %c2_46, %c0_47, %c0_48] : memref<3x3x4x4xbf16, #tpu.memory_space<vmem>>, vector<1x1x4x4xbf16>
    %43 = vector.shape_cast %42 : vector<1x1x4x4xbf16> to vector<4x4xbf16>
    %cst_49 = arith.constant dense<0.000000e+00> : vector<288x4xf32>
    %44 = tpu.matmul %41, %43, %cst_49 {dimension_numbers = #tpu.dot_dimension_numbers<[1], [0], [0], [1], [0, 0, 1, 1], [], []>} : vector<288x4xbf16>, vector<4x4xbf16>, vector<288x4xf32> -> vector<288x4xf32>
    %45 = arith.addf %39, %44 : vector<288x4xf32>
    %c36 = arith.constant 36 : index
    %c0_50 = arith.constant 0 : index
    %46 = vector.load %arg7[%c36, %c0_50] : memref<326x4xf32, #tpu.memory_space<vmem>>, vector<288x4xf32>
    %47 = arith.truncf %46 : vector<288x4xf32> to vector<288x4xbf16>
    %c2_51 = arith.constant 2 : index
    %c0_52 = arith.constant 0 : index
    %c0_53 = arith.constant 0 : index
    %c0_54 = arith.constant 0 : index
    %48 = vector.load %arg2[%c2_51, %c0_52, %c0_53, %c0_54] : memref<3x3x4x4xbf16, #tpu.memory_space<vmem>>, vector<1x1x4x4xbf16>
    %49 = vector.shape_cast %48 : vector<1x1x4x4xbf16> to vector<4x4xbf16>
    %cst_55 = arith.constant dense<0.000000e+00> : vector<288x4xf32>
    %50 = tpu.matmul %47, %49, %cst_55 {dimension_numbers = #tpu.dot_dimension_numbers<[1], [0], [0], [1], [0, 0, 1, 1], [], []>} : vector<288x4xbf16>, vector<4x4xbf16>, vector<288x4xf32> -> vector<288x4xf32>
    %51 = arith.addf %45, %50 : vector<288x4xf32>
    %c37 = arith.constant 37 : index
    %c0_56 = arith.constant 0 : index
    %52 = vector.load %arg7[%c37, %c0_56] : memref<326x4xf32, #tpu.memory_space<vmem>>, vector<288x4xf32>
    %53 = arith.truncf %52 : vector<288x4xf32> to vector<288x4xbf16>
    %c2_57 = arith.constant 2 : index
    %c1_58 = arith.constant 1 : index
    %c0_59 = arith.constant 0 : index
    %c0_60 = arith.constant 0 : index
    %54 = vector.load %arg2[%c2_57, %c1_58, %c0_59, %c0_60] : memref<3x3x4x4xbf16, #tpu.memory_space<vmem>>, vector<1x1x4x4xbf16>
    %55 = vector.shape_cast %54 : vector<1x1x4x4xbf16> to vector<4x4xbf16>
    %cst_61 = arith.constant dense<0.000000e+00> : vector<288x4xf32>
    %56 = tpu.matmul %53, %55, %cst_61 {dimension_numbers = #tpu.dot_dimension_numbers<[1], [0], [0], [1], [0, 0, 1, 1], [], []>} : vector<288x4xbf16>, vector<4x4xbf16>, vector<288x4xf32> -> vector<288x4xf32>
    %57 = arith.addf %51, %56 : vector<288x4xf32>
    %c38 = arith.constant 38 : index
    %c0_62 = arith.constant 0 : index
    %58 = vector.load %arg7[%c38, %c0_62] : memref<326x4xf32, #tpu.memory_space<vmem>>, vector<288x4xf32>
    %59 = arith.truncf %58 : vector<288x4xf32> to vector<288x4xbf16>
    %c2_63 = arith.constant 2 : index
    %c2_64 = arith.constant 2 : index
    %c0_65 = arith.constant 0 : index
    %c0_66 = arith.constant 0 : index
    %60 = vector.load %arg2[%c2_63, %c2_64, %c0_65, %c0_66] : memref<3x3x4x4xbf16, #tpu.memory_space<vmem>>, vector<1x1x4x4xbf16>
    %61 = vector.shape_cast %60 : vector<1x1x4x4xbf16> to vector<4x4xbf16>
    %cst_67 = arith.constant dense<0.000000e+00> : vector<288x4xf32>
    %62 = tpu.matmul %59, %61, %cst_67 {dimension_numbers = #tpu.dot_dimension_numbers<[1], [0], [0], [1], [0, 0, 1, 1], [], []>} : vector<288x4xbf16>, vector<4x4xbf16>, vector<288x4xf32> -> vector<288x4xf32>
    %63 = arith.addf %57, %62 : vector<288x4xf32>
    %c0_68 = arith.constant 0 : index
    %c0_69 = arith.constant 0 : index
    %64 = vector.load %arg4[%c0_68, %c0_69] : memref<1x4xf32, #tpu.memory_space<vmem>>, vector<1x4xf32>
    %65 = vector.broadcast %64 : vector<1x4xf32> to vector<288x4xf32>
    %66 = arith.addf %63, %65 : vector<288x4xf32>
    %cst_70 = arith.constant 0.000000e+00 : f32
    %67 = vector.broadcast %cst_70 : f32 to vector<288x4xf32>
    %68 = arith.maximumf %66, %67 : vector<288x4xf32>
    %69 = tpu.iota {dimensions = array<i32: 0>} : vector<288x1xi32>
    %c18_i32 = arith.constant 18 : i32
    %c0_i32 = arith.constant 0 : i32
    %70 = arith.cmpi eq, %c18_i32, %c0_i32 : i32
    %c1_i32 = arith.constant 1 : i32
    %71 = arith.select %70, %c1_i32, %c18_i32 : i32
    %72 = vector.broadcast %71 : i32 to vector<288x1xi32>
    %73 = arith.remsi %69, %72 : vector<288x1xi32>
    %c0_i32_71 = arith.constant 0 : i32
    %74 = vector.broadcast %c0_i32_71 : i32 to vector<288x1xi32>
    %75 = arith.cmpi ne, %73, %74 : vector<288x1xi32>
    %c0_i32_72 = arith.constant 0 : i32
    %76 = vector.broadcast %c0_i32_72 : i32 to vector<288x1xi32>
    %77 = arith.cmpi slt, %73, %76 : vector<288x1xi32>
    %c0_i32_73 = arith.constant 0 : i32
    %78 = arith.cmpi slt, %71, %c0_i32_73 : i32
    %79 = vector.broadcast %78 : i1 to vector<288x1xi1>
    %80 = vector.broadcast %79 : vector<288x1xi1> to vector<288x1xi1>
    %81 = arith.xori %77, %80 : vector<288x1xi1>
    %82 = arith.andi %81, %75 : vector<288x1xi1>
    %83 = vector.broadcast %71 : i32 to vector<288x1xi32>
    %84 = arith.addi %73, %83 : vector<288x1xi32>
    %85 = arith.select %82, %84, %73 : vector<288x1xi1>, vector<288x1xi32>
    %c16_i32 = arith.constant 16 : i32
    %86 = vector.broadcast %c16_i32 : i32 to vector<288x1xi32>
    %87 = arith.cmpi slt, %85, %86 : vector<288x1xi32>
    %cst_74 = arith.constant 0.000000e+00 : f32
    %88 = vector.shape_cast %87 : vector<288x1xi1> to vector<288x1xi1>
    %89 = vector.broadcast %88 : vector<288x1xi1> to vector<288x4xi1>
    %90 = vector.broadcast %cst_74 : f32 to vector<288x4xf32>
    %91 = arith.select %89, %68, %90 : vector<288x4xi1>, vector<288x4xf32>
    %c19_75 = arith.constant 19 : index
    %c0_76 = arith.constant 0 : index
    %92 = vector.load %arg8[%c19_75, %c0_76] : memref<326x4xf32, #tpu.memory_space<vmem>>, vector<288x4xf32>
    tpu.vector_store %arg8[%c19_75, %c0_76], %91 {strides = array<i32>} : memref<326x4xf32, #tpu.memory_space<vmem>>, vector<288x4xf32>,
    %c0_77 = arith.constant 0 : index
    %c0_78 = arith.constant 0 : index
    %93 = vector.load %arg8[%c0_77, %c0_78] : memref<326x4xf32, #tpu.memory_space<vmem>>, vector<288x4xf32>
    %94 = arith.truncf %93 : vector<288x4xf32> to vector<288x4xbf16>
    %c0_79 = arith.constant 0 : index
    %c0_80 = arith.constant 0 : index
    %c0_81 = arith.constant 0 : index
    %c0_82 = arith.constant 0 : index
    %95 = vector.load %arg3[%c0_79, %c0_80, %c0_81, %c0_82] : memref<3x3x4x4xbf16, #tpu.memory_space<vmem>>, vector<1x1x4x4xbf16>
    %96 = vector.shape_cast %95 : vector<1x1x4x4xbf16> to vector<4x4xbf16>
    %cst_83 = arith.constant dense<0.000000e+00> : vector<288x4xf32>
    %97 = tpu.matmul %94, %96, %cst_83 {dimension_numbers = #tpu.dot_dimension_numbers<[1], [0], [0], [1], [0, 0, 1, 1], [], []>} : vector<288x4xbf16>, vector<4x4xbf16>, vector<288x4xf32> -> vector<288x4xf32>
    %c1_84 = arith.constant 1 : index
    %c0_85 = arith.constant 0 : index
    %98 = vector.load %arg8[%c1_84, %c0_85] : memref<326x4xf32, #tpu.memory_space<vmem>>, vector<288x4xf32>
    %99 = arith.truncf %98 : vector<288x4xf32> to vector<288x4xbf16>
    %c0_86 = arith.constant 0 : index
    %c1_87 = arith.constant 1 : index
    %c0_88 = arith.constant 0 : index
    %c0_89 = arith.constant 0 : index
    %100 = vector.load %arg3[%c0_86, %c1_87, %c0_88, %c0_89] : memref<3x3x4x4xbf16, #tpu.memory_space<vmem>>, vector<1x1x4x4xbf16>
    %101 = vector.shape_cast %100 : vector<1x1x4x4xbf16> to vector<4x4xbf16>
    %cst_90 = arith.constant dense<0.000000e+00> : vector<288x4xf32>
    %102 = tpu.matmul %99, %101, %cst_90 {dimension_numbers = #tpu.dot_dimension_numbers<[1], [0], [0], [1], [0, 0, 1, 1], [], []>} : vector<288x4xbf16>, vector<4x4xbf16>, vector<288x4xf32> -> vector<288x4xf32>
    %103 = arith.addf %97, %102 : vector<288x4xf32>
    %c2_91 = arith.constant 2 : index
    %c0_92 = arith.constant 0 : index
    %104 = vector.load %arg8[%c2_91, %c0_92] : memref<326x4xf32, #tpu.memory_space<vmem>>, vector<288x4xf32>
    %105 = arith.truncf %104 : vector<288x4xf32> to vector<288x4xbf16>
    %c0_93 = arith.constant 0 : index
    %c2_94 = arith.constant 2 : index
    %c0_95 = arith.constant 0 : index
    %c0_96 = arith.constant 0 : index
    %106 = vector.load %arg3[%c0_93, %c2_94, %c0_95, %c0_96] : memref<3x3x4x4xbf16, #tpu.memory_space<vmem>>, vector<1x1x4x4xbf16>
    %107 = vector.shape_cast %106 : vector<1x1x4x4xbf16> to vector<4x4xbf16>
    %cst_97 = arith.constant dense<0.000000e+00> : vector<288x4xf32>
    %108 = tpu.matmul %105, %107, %cst_97 {dimension_numbers = #tpu.dot_dimension_numbers<[1], [0], [0], [1], [0, 0, 1, 1], [], []>} : vector<288x4xbf16>, vector<4x4xbf16>, vector<288x4xf32> -> vector<288x4xf32>
    %109 = arith.addf %103, %108 : vector<288x4xf32>
    %c18_98 = arith.constant 18 : index
    %c0_99 = arith.constant 0 : index
    %110 = vector.load %arg8[%c18_98, %c0_99] : memref<326x4xf32, #tpu.memory_space<vmem>>, vector<288x4xf32>
    %111 = arith.truncf %110 : vector<288x4xf32> to vector<288x4xbf16>
    %c1_100 = arith.constant 1 : index
    %c0_101 = arith.constant 0 : index
    %c0_102 = arith.constant 0 : index
    %c0_103 = arith.constant 0 : index
    %112 = vector.load %arg3[%c1_100, %c0_101, %c0_102, %c0_103] : memref<3x3x4x4xbf16, #tpu.memory_space<vmem>>, vector<1x1x4x4xbf16>
    %113 = vector.shape_cast %112 : vector<1x1x4x4xbf16> to vector<4x4xbf16>
    %cst_104 = arith.constant dense<0.000000e+00> : vector<288x4xf32>
    %114 = tpu.matmul %111, %113, %cst_104 {dimension_numbers = #tpu.dot_dimension_numbers<[1], [0], [0], [1], [0, 0, 1, 1], [], []>} : vector<288x4xbf16>, vector<4x4xbf16>, vector<288x4xf32> -> vector<288x4xf32>
    %115 = arith.addf %109, %114 : vector<288x4xf32>
    %c19_105 = arith.constant 19 : index
    %c0_106 = arith.constant 0 : index
    %116 = vector.load %arg8[%c19_105, %c0_106] : memref<326x4xf32, #tpu.memory_space<vmem>>, vector<288x4xf32>
    %117 = arith.truncf %116 : vector<288x4xf32> to vector<288x4xbf16>
    %c1_107 = arith.constant 1 : index
    %c1_108 = arith.constant 1 : index
    %c0_109 = arith.constant 0 : index
    %c0_110 = arith.constant 0 : index
    %118 = vector.load %arg3[%c1_107, %c1_108, %c0_109, %c0_110] : memref<3x3x4x4xbf16, #tpu.memory_space<vmem>>, vector<1x1x4x4xbf16>
    %119 = vector.shape_cast %118 : vector<1x1x4x4xbf16> to vector<4x4xbf16>
    %cst_111 = arith.constant dense<0.000000e+00> : vector<288x4xf32>
    %120 = tpu.matmul %117, %119, %cst_111 {dimension_numbers = #tpu.dot_dimension_numbers<[1], [0], [0], [1], [0, 0, 1, 1], [], []>} : vector<288x4xbf16>, vector<4x4xbf16>, vector<288x4xf32> -> vector<288x4xf32>
    %121 = arith.addf %115, %120 : vector<288x4xf32>
    %c20_112 = arith.constant 20 : index
    %c0_113 = arith.constant 0 : index
    %122 = vector.load %arg8[%c20_112, %c0_113] : memref<326x4xf32, #tpu.memory_space<vmem>>, vector<288x4xf32>
    %123 = arith.truncf %122 : vector<288x4xf32> to vector<288x4xbf16>
    %c1_114 = arith.constant 1 : index
    %c2_115 = arith.constant 2 : index
    %c0_116 = arith.constant 0 : index
    %c0_117 = arith.constant 0 : index
    %124 = vector.load %arg3[%c1_114, %c2_115, %c0_116, %c0_117] : memref<3x3x4x4xbf16, #tpu.memory_space<vmem>>, vector<1x1x4x4xbf16>
    %125 = vector.shape_cast %124 : vector<1x1x4x4xbf16> to vector<4x4xbf16>
    %cst_118 = arith.constant dense<0.000000e+00> : vector<288x4xf32>
    %126 = tpu.matmul %123, %125, %cst_118 {dimension_numbers = #tpu.dot_dimension_numbers<[1], [0], [0], [1], [0, 0, 1, 1], [], []>} : vector<288x4xbf16>, vector<4x4xbf16>, vector<288x4xf32> -> vector<288x4xf32>
    %127 = arith.addf %121, %126 : vector<288x4xf32>
    %c36_119 = arith.constant 36 : index
    %c0_120 = arith.constant 0 : index
    %128 = vector.load %arg8[%c36_119, %c0_120] : memref<326x4xf32, #tpu.memory_space<vmem>>, vector<288x4xf32>
    %129 = arith.truncf %128 : vector<288x4xf32> to vector<288x4xbf16>
    %c2_121 = arith.constant 2 : index
    %c0_122 = arith.constant 0 : index
    %c0_123 = arith.constant 0 : index
    %c0_124 = arith.constant 0 : index
    %130 = vector.load %arg3[%c2_121, %c0_122, %c0_123, %c0_124] : memref<3x3x4x4xbf16, #tpu.memory_space<vmem>>, vector<1x1x4x4xbf16>
    %131 = vector.shape_cast %130 : vector<1x1x4x4xbf16> to vector<4x4xbf16>
    %cst_125 = arith.constant dense<0.000000e+00> : vector<288x4xf32>
    %132 = tpu.matmul %129, %131, %cst_125 {dimension_numbers = #tpu.dot_dimension_numbers<[1], [0], [0], [1], [0, 0, 1, 1], [], []>} : vector<288x4xbf16>, vector<4x4xbf16>, vector<288x4xf32> -> vector<288x4xf32>
    %133 = arith.addf %127, %132 : vector<288x4xf32>
    %c37_126 = arith.constant 37 : index
    %c0_127 = arith.constant 0 : index
    %134 = vector.load %arg8[%c37_126, %c0_127] : memref<326x4xf32, #tpu.memory_space<vmem>>, vector<288x4xf32>
    %135 = arith.truncf %134 : vector<288x4xf32> to vector<288x4xbf16>
    %c2_128 = arith.constant 2 : index
    %c1_129 = arith.constant 1 : index
    %c0_130 = arith.constant 0 : index
    %c0_131 = arith.constant 0 : index
    %136 = vector.load %arg3[%c2_128, %c1_129, %c0_130, %c0_131] : memref<3x3x4x4xbf16, #tpu.memory_space<vmem>>, vector<1x1x4x4xbf16>
    %137 = vector.shape_cast %136 : vector<1x1x4x4xbf16> to vector<4x4xbf16>
    %cst_132 = arith.constant dense<0.000000e+00> : vector<288x4xf32>
    %138 = tpu.matmul %135, %137, %cst_132 {dimension_numbers = #tpu.dot_dimension_numbers<[1], [0], [0], [1], [0, 0, 1, 1], [], []>} : vector<288x4xbf16>, vector<4x4xbf16>, vector<288x4xf32> -> vector<288x4xf32>
    %139 = arith.addf %133, %138 : vector<288x4xf32>
    %c38_133 = arith.constant 38 : index
    %c0_134 = arith.constant 0 : index
    %140 = vector.load %arg8[%c38_133, %c0_134] : memref<326x4xf32, #tpu.memory_space<vmem>>, vector<288x4xf32>
    %141 = arith.truncf %140 : vector<288x4xf32> to vector<288x4xbf16>
    %c2_135 = arith.constant 2 : index
    %c2_136 = arith.constant 2 : index
    %c0_137 = arith.constant 0 : index
    %c0_138 = arith.constant 0 : index
    %142 = vector.load %arg3[%c2_135, %c2_136, %c0_137, %c0_138] : memref<3x3x4x4xbf16, #tpu.memory_space<vmem>>, vector<1x1x4x4xbf16>
    %143 = vector.shape_cast %142 : vector<1x1x4x4xbf16> to vector<4x4xbf16>
    %cst_139 = arith.constant dense<0.000000e+00> : vector<288x4xf32>
    %144 = tpu.matmul %141, %143, %cst_139 {dimension_numbers = #tpu.dot_dimension_numbers<[1], [0], [0], [1], [0, 0, 1, 1], [], []>} : vector<288x4xbf16>, vector<4x4xbf16>, vector<288x4xf32> -> vector<288x4xf32>
    %145 = arith.addf %139, %144 : vector<288x4xf32>
    %c19_140 = arith.constant 19 : index
    %c0_141 = arith.constant 0 : index
    %146 = vector.load %arg7[%c19_140, %c0_141] : memref<326x4xf32, #tpu.memory_space<vmem>>, vector<288x4xf32>
    %c0_142 = arith.constant 0 : index
    %c0_143 = arith.constant 0 : index
    %147 = vector.load %arg5[%c0_142, %c0_143] : memref<1x4xf32, #tpu.memory_space<vmem>>, vector<1x4xf32>
    %148 = vector.broadcast %147 : vector<1x4xf32> to vector<288x4xf32>
    %149 = arith.addf %145, %148 : vector<288x4xf32>
    %150 = arith.addf %149, %146 : vector<288x4xf32>
    %cst_144 = arith.constant 0.000000e+00 : f32
    %151 = vector.broadcast %cst_144 : f32 to vector<288x4xf32>
    %152 = arith.maximumf %150, %151 : vector<288x4xf32>
    %c0_145 = arith.constant 0 : index
    %c0_146 = arith.constant 0 : index
    %c0_147 = arith.constant 0 : index
    %153 = vector.load %arg6[%c0_145, %c0_146, %c0_147] : memref<1x288x4xf32, #tpu.memory_space<vmem>>, vector<1x288x4xf32>
    %154 = vector.shape_cast %153 : vector<1x288x4xf32> to vector<288x4xf32>
    %155 = vector.shape_cast %152 : vector<288x4xf32> to vector<1x288x4xf32>
    tpu.vector_store %arg6[%c0_145, %c0_146, %c0_147], %155 {strides = array<i32>} : memref<1x288x4xf32, #tpu.memory_space<vmem>>, vector<1x288x4xf32>,
    return
  }
  func.func @transform_0(%arg0: i32) -> (i32, i32, i32) {
    %c0_i32 = arith.constant 0 : i32
    %c0_i32_0 = arith.constant 0 : i32
    %c0_i32_1 = arith.constant 0 : i32
    return %arg0, %c0_i32, %c0_i32_0 : i32, i32, i32
  }
  func.func @transform_1(%arg0: i32) -> (i32, i32, i32, i32) {
    %c0_i32 = arith.constant 0 : i32
    %c0_i32_0 = arith.constant 0 : i32
    %c0_i32_1 = arith.constant 0 : i32
    %c0_i32_2 = arith.constant 0 : i32
    %c0_i32_3 = arith.constant 0 : i32
    return %c0_i32, %c0_i32_0, %c0_i32_1, %c0_i32_2 : i32, i32, i32, i32
  }
  func.func @transform_2(%arg0: i32) -> (i32, i32, i32, i32) {
    %c0_i32 = arith.constant 0 : i32
    %c0_i32_0 = arith.constant 0 : i32
    %c0_i32_1 = arith.constant 0 : i32
    %c0_i32_2 = arith.constant 0 : i32
    %c0_i32_3 = arith.constant 0 : i32
    return %c0_i32, %c0_i32_0, %c0_i32_1, %c0_i32_2 : i32, i32, i32, i32
  }
  func.func @transform_3(%arg0: i32) -> (i32, i32) {
    %c0_i32 = arith.constant 0 : i32
    %c0_i32_0 = arith.constant 0 : i32
    %c0_i32_1 = arith.constant 0 : i32
    return %c0_i32, %c0_i32_0 : i32, i32
  }
  func.func @transform_4(%arg0: i32) -> (i32, i32) {
    %c0_i32 = arith.constant 0 : i32
    %c0_i32_0 = arith.constant 0 : i32
    %c0_i32_1 = arith.constant 0 : i32
    return %c0_i32, %c0_i32_0 : i32, i32
  }
  func.func @transform_5(%arg0: i32) -> (i32, i32, i32) {
    %c0_i32 = arith.constant 0 : i32
    %c0_i32_0 = arith.constant 0 : i32
    %c0_i32_1 = arith.constant 0 : i32
    return %arg0, %c0_i32, %c0_i32_0 : i32, i32, i32
  }
}

</mosaic_0001>

<bundles_post_ra>
// kernel: tpu_custom_call.1
= control target key start
LH: loop header
LB: loop body
LE: loop exit
PB: predicated region body
PF: predicated region fallthrough
CT: control target
= control target key end

     0   :  { %s9243_s18 = smov 0   ;;  %s11273_s0 = inlined_call_operand.vmem [shape: f32[2,288,4], index: 0, kind: input, shape index: {}]   ;;  %s11274_s1 = inlined_call_operand.vmem [shape: bf16[3,3,4,4], index: 1, kind: input, shape index: {}]   ;;  %s11275_s2 = inlined_call_operand.vmem [shape: bf16[3,3,4,4], index: 2, kind: input, shape index: {}]   ;;  %s11276_s3 = inlined_call_operand.vmem [shape: f32[1,4], index: 3, kind: input, shape index: {}]   ;;  %s11277_s4 = inlined_call_operand.vmem [shape: f32[1,4], index: 4, kind: input, shape index: {}]   ;;  %s11278_s5 = inlined_call_operand.vmem [shape: f32[2,288,4], index: 5, kind: output, shape index: {}]  }
   0x1 LB: > { %s7151_s19 = sadd.s32 4294967295, %s9210_s18   ;;  %p7155_p0 = scmp.ge.s32.totalorder %s9210_s18, 1  ;;  %s9210_s18 = sphi %s9243_s18, %s15_s18  }
   0x2   : > { %p187_p1 = scmp.lt.s32.totalorder %s9210_s18, 3 }
   0x4   : > { %p188_p2 = pnand %p7155_p0, %p187_p1 }
   0x6   : > { %191 = sbr.rel (%p188_p2) target bundleno = 1713 (0x6b1), region = 40 }
   0xd   : > { %v7158_v0 = vld [vmem:[%s11274_s1 + $0x2] sm:$0x3]  ;;  %vm11280_vm0 = vcmask 1041408   ;;  %vm11279_vm1 = vcmask 31744   ;;  %vm229_vm2 = vcmask 25600   ;;  %v9212_v2 = vmov 0.0  }
   0xe   : > { %9104 = vmatprep.subr.msk.bf16.mxu0 %vm11280_vm0, %v7158_v0  ;;  %v481_v1 = vsel %vm11280_vm0, %v7158_v0, 0  ;;  %227 = vst.msk [vmem:[#allocation2] sm:$0xff] %vm11279_vm1, %v9212_v2  ;;  %228 = vst.msk [vmem:[#allocation2 + $0x8] sm:$0xff] %vm11279_vm1, %v9212_v2  ;;  %v9276_v3 = vld [vmem:[%s11274_s1] sm:$0x3]  ;;  %p215_p3 = scmp.lt.s32.totalorder %s7151_s19, 1 }
   0xf   : > { %230 = vst.msk [vmem:[#allocation2 + $0x10] sm:$0x3] %vm229_vm2, %v9212_v2  ;;  %7845 = vmatpush3.bf16.msra.mxu0 %v481_v1  ;;  %v715_v36 = vsel %vm11280_vm0, %v9276_v3, 0  ;;  %v9344_v38 = vld [vmem:[%s11274_s1 + $0x4] sm:$0x3]  ;;  %vm233_vm3 = vcmask 27648  }
  0x10   : > { %231 = vst.msk [vmem:[#allocation2 + $0x132] sm:$0xff] %vm11279_vm1, %v9212_v2  ;;  %232 = vst.msk [vmem:[#allocation2 + $0x13a] sm:$0xff] %vm11279_vm1, %v9212_v2  ;;  %9105 = vmatprep.subr.msk.bf16.mxu0 %vm11280_vm0, %v9276_v3  ;;  %s11740_s19 = smov (!%p215_p3, %s7151_s19), 1  ;;  %vm237_vm4 = vcmask 26624  }
  0x11   : > { %235 = vst.msk [vmem:[#allocation3] sm:$0xff] %vm11279_vm1, %v9212_v2  ;;  %236 = vst.msk [vmem:[#allocation3 + $0x8] sm:$0xff] %vm11279_vm1, %v9212_v2  ;;  %s9122_s24 = smul.u32 288, %s11740_s19 }
  0x12   : > { %239 = vst.msk [vmem:[#allocation3 + $0x133] sm:$0xff] %vm11279_vm1, %v9212_v2  ;;  %240 = vst.msk [vmem:[#allocation3 + $0x13b] sm:$0xff] %vm11279_vm1, %v9212_v2 }
  0x13   : > { %s9288_s27 = scalar_lea.vmem %s11273_s0, %s9122_s24  ;;  %234 = vst.msk [vmem:[#allocation2 + $0x142] sm:$0xf] %vm233_vm3, %v9212_v2  ;;  %s11163_s21 = scalar_lea.vmem %s11278_s5, %s9122_s24 }
  0x14   : > { %v242_v6 = vld [vmem:[%s9288_s27] sm:$0xff]  ;;  %v243_v8 = vld [vmem:[%s9288_s27 + $0x8] sm:$0xff]  ;;  %v244_v9 = vld [vmem:[%s9288_s27 + $0x10] sm:$0xff]  ;;  %238 = vst.msk [vmem:[#allocation3 + $0x10] sm:$0x7] %vm237_vm4, %v9212_v2 }
  0x15   : > { %v369_v4 = vld [vmem:[#allocation2 + $0x1] sm:$0xff]  ;;  %278 = vst.msk [vmem:[#allocation2 + $0x12] sm:$0xff] %vm11279_vm1, %v242_v6  ;;  %v245_v10 = vld [vmem:[%s9288_s27 + $0x18] sm:$0xff]  ;;  %279 = vst.msk [vmem:[#allocation2 + $0x1a] sm:$0xff] %vm11279_vm1, %v243_v8 }
  0x16   : > { %v370_v5 = vld [vmem:[#allocation2 + $0x9] sm:$0xff]  ;;  %280 = vst.msk [vmem:[#allocation2 + $0x22] sm:$0xff] %vm11279_vm1, %v244_v9  ;;  %281 = vst.msk [vmem:[#allocation2 + $0x2a] sm:$0xff] %vm11279_vm1, %v245_v10  ;;  %v246_v11 = vld [vmem:[%s9288_s27 + $0x20] sm:$0xff] }
  0x17   : > { %v405_v7 = vpack.c.bf16 %v370_v5, %v369_v4  ;;  %v247_v12 = vld [vmem:[%s9288_s27 + $0x28] sm:$0xff]  ;;  %v248_v13 = vld [vmem:[%s9288_s27 + $0x30] sm:$0xff]  ;;  %282 = vst.msk [vmem:[#allocation2 + $0x32] sm:$0xff] %vm11279_vm1, %v246_v11  ;;  %v249_v14 = vld [vmem:[%s9288_s27 + $0x38] sm:$0xff] }
  0x18   : > { %283 = vst.msk [vmem:[#allocation2 + $0x3a] sm:$0xff] %vm11279_vm1, %v247_v12  ;;  %284 = vst.msk [vmem:[#allocation2 + $0x42] sm:$0xff] %vm11279_vm1, %v248_v13  ;;  %v250_v15 = vld [vmem:[%s9288_s27 + $0x40] sm:$0xff]  ;;  %v251_v16 = vld [vmem:[%s9288_s27 + $0x48] sm:$0xff] }
  0x19   : > { %7846 = vmatprep.mubr.msk.bf16.mxu0 %vm11279_vm1, %v405_v7  ;;  %285 = vst.msk [vmem:[#allocation2 + $0x4a] sm:$0xff] %vm11279_vm1, %v249_v14  ;;  %286 = vst.msk [vmem:[#allocation2 + $0x52] sm:$0xff] %vm11279_vm1, %v250_v15  ;;  %v252_v17 = vld [vmem:[%s9288_s27 + $0x50] sm:$0xff]  ;;  %v253_v18 = vld [vmem:[%s9288_s27 + $0x58] sm:$0xff] }
  0x1a   : > { %287 = vst.msk [vmem:[#allocation2 + $0x5a] sm:$0xff] %vm11279_vm1, %v251_v16  ;;  %v254_v19 = vld [vmem:[%s9288_s27 + $0x60] sm:$0xff]  ;;  %288 = vst.msk [vmem:[#allocation2 + $0x62] sm:$0xff] %vm11279_vm1, %v252_v17  ;;  %v255_v20 = vld [vmem:[%s9288_s27 + $0x68] sm:$0xff] }
  0x1b   : > { %289 = vst.msk [vmem:[#allocation2 + $0x6a] sm:$0xff] %vm11279_vm1, %v253_v18  ;;  %290 = vst.msk [vmem:[#allocation2 + $0x72] sm:$0xff] %vm11279_vm1, %v254_v19  ;;  %v256_v21 = vld [vmem:[%s9288_s27 + $0x70] sm:$0xff]  ;;  %v257_v22 = vld [vmem:[%s9288_s27 + $0x78] sm:$0xff] }
  0x1c   : > { %291 = vst.msk [vmem:[#allocation2 + $0x7a] sm:$0xff] %vm11279_vm1, %v255_v20  ;;  %292 = vst.msk [vmem:[#allocation2 + $0x82] sm:$0xff] %vm11279_vm1, %v256_v21  ;;  %v258_v23 = vld [vmem:[%s9288_s27 + $0x80] sm:$0xff]  ;;  %v259_v24 = vld [vmem:[%s9288_s27 + $0x88] sm:$0xff] }
  0x1d   : > { %293 = vst.msk [vmem:[#allocation2 + $0x8a] sm:$0xff] %vm11279_vm1, %v257_v22  ;;  %v260_v25 = vld [vmem:[%s9288_s27 + $0x90] sm:$0xff]  ;;  %294 = vst.msk [vmem:[#allocation2 + $0x92] sm:$0xff] %vm11279_vm1, %v258_v23  ;;  %v261_v26 = vld [vmem:[%s9288_s27 + $0x98] sm:$0xff] }
  0x1e   : > { %295 = vst.msk [vmem:[#allocation2 + $0x9a] sm:$0xff] %vm11279_vm1, %v259_v24  ;;  %296 = vst.msk [vmem:[#allocation2 + $0xa2] sm:$0xff] %vm11279_vm1, %v260_v25  ;;  %v262_v27 = vld [vmem:[%s9288_s27 + $0xa0] sm:$0xff]  ;;  %v263_v28 = vld [vmem:[%s9288_s27 + $0xa8] sm:$0xff] }
  0x1f   : > { %v371_v29 = vld [vmem:[#allocation2 + $0x11] sm:$0xff]  ;;  %297 = vst.msk [vmem:[#allocation2 + $0xaa] sm:$0xff] %vm11279_vm1, %v261_v26  ;;  %298 = vst.msk [vmem:[#allocation2 + $0xb2] sm:$0xff] %vm11279_vm1, %v262_v27  ;;  %v372_v32 = vld [vmem:[#allocation2 + $0x19] sm:$0xff] }
  0x20   : > { %299 = vst.msk [vmem:[#allocation2 + $0xba] sm:$0xff] %vm11279_vm1, %v263_v28  ;;  %v264_v30 = vld [vmem:[%s9288_s27 + $0xb0] sm:$0xff]  ;;  %v265_v31 = vld [vmem:[%s9288_s27 + $0xb8] sm:$0xff]  ;;  %v373_v33 = vld [vmem:[#allocation2 + $0x21] sm:$0xff]  ;;  %v406_v35 = vpack.c.bf16 %v372_v32, %v371_v29 }
  0x21   : > { %v374_v34 = vld [vmem:[#allocation2 + $0x29] sm:$0xff]  ;;  %300 = vst.msk [vmem:[#allocation2 + $0xc2] sm:$0xff] %vm11279_vm1, %v264_v30  ;;  %301 = vst.msk [vmem:[#allocation2 + $0xca] sm:$0xff] %vm11279_vm1, %v265_v31  ;;  %v375_v39 = vld [vmem:[#allocation2 + $0x31] sm:$0xff] }
  0x22   : > { %v407_v37 = vpack.c.bf16 %v374_v34, %v373_v33  ;;  %7847 = vmatmul.mubr.msk.bf16.vlgmr.msra.gmra.mrb[0].mxu0 %vm11279_vm1, %v406_v35  ;;  %v376_v40 = vld [vmem:[#allocation2 + $0x39] sm:$0xff]  ;;  %v377_v41 = vld [vmem:[#allocation2 + $0x41] sm:$0xff]  ;;  %v378_v42 = vld [vmem:[#allocation2 + $0x49] sm:$0xff]  ;;  %241 = vst.msk [vmem:[#allocation3 + $0x143] sm:$0x7] %vm237_vm4, %v9212_v2  ;;  %v3255_v2 = vlaneseq }
  0x23   : > { %7883 = vmatpush3.bf16.msra.mxu0 %v715_v36  ;;  %v408_v43 = vpack.c.bf16 %v376_v40, %v375_v39  ;;  %v266_v44 = vld [vmem:[%s9288_s27 + $0xc0] sm:$0xff]  ;;  %v409_v45 = vpack.c.bf16 %v378_v42, %v377_v41  ;;  %v267_v46 = vld [vmem:[%s9288_s27 + $0xc8] sm:$0xff]  ;;  %v268_v47 = vld [vmem:[%s9288_s27 + $0xd0] sm:$0xff]  ;;  %v1005_v41 = vsel %vm11280_vm0, %v9344_v38, 0 }
  0x24   : > { %7850 = vmatprep.mubr.msk.bf16.mxu0 %vm11279_vm1, %v407_v37  ;;  %9106 = vmatprep.subr.msk.bf16.mxu0 %vm11280_vm0, %v9344_v38  ;;  %302 = vst.msk [vmem:[#allocation2 + $0xd2] sm:$0xff] %vm11279_vm1, %v266_v44  ;;  %v269_v48 = vld [vmem:[%s9288_s27 + $0xd8] sm:$0xff]  ;;  %303 = vst.msk [vmem:[#allocation2 + $0xda] sm:$0xff] %vm11279_vm1, %v267_v46  ;;  %v270_v49 = vld [vmem:[%s9288_s27 + $0xe0] sm:$0xff] }
  0x25   : > { %304 = vst.msk [vmem:[#allocation2 + $0xe2] sm:$0xff] %vm11279_vm1, %v268_v47  ;;  %305 = vst.msk [vmem:[#allocation2 + $0xea] sm:$0xff] %vm11279_vm1, %v269_v48  ;;  %v271_v50 = vld [vmem:[%s9288_s27 + $0xe8] sm:$0xff]  ;;  %v272_v51 = vld [vmem:[%s9288_s27 + $0xf0] sm:$0xff] }
  0x26   : > { %306 = vst.msk [vmem:[#allocation2 + $0xf2] sm:$0xff] %vm11279_vm1, %v270_v49  ;;  %307 = vst.msk [vmem:[#allocation2 + $0xfa] sm:$0xff] %vm11279_vm1, %v271_v50  ;;  %v273_v52 = vld [vmem:[%s9288_s27 + $0xf8] sm:$0xff]  ;;  %v274_v53 = vld [vmem:[%s9288_s27 + $0x100] sm:$0xff] }
  0x27   : > { %308 = vst.msk [vmem:[#allocation2 + $0x102] sm:$0xff] %vm11279_vm1, %v272_v51  ;;  %v275_v54 = vld [vmem:[%s9288_s27 + $0x108] sm:$0xff]  ;;  %309 = vst.msk [vmem:[#allocation2 + $0x10a] sm:$0xff] %vm11279_vm1, %v273_v52  ;;  %v379_v55 = vld [vmem:[#allocation2 + $0x51] sm:$0xff] }
  0x28   : > { %310 = vst.msk [vmem:[#allocation2 + $0x112] sm:$0xff] %vm11279_vm1, %v274_v53  ;;  %311 = vst.msk [vmem:[#allocation2 + $0x11a] sm:$0xff] %vm11279_vm1, %v275_v54  ;;  %v380_v56 = vld [vmem:[#allocation2 + $0x59] sm:$0xff]  ;;  %v381_v57 = vld [vmem:[#allocation2 + $0x61] sm:$0xff] }
  0x29   : > { %v382_v58 = vld [vmem:[#allocation2 + $0x69] sm:$0xff]  ;;  %v410_v59 = vpack.c.bf16 %v380_v56, %v379_v55  ;;  %v383_v61 = vld [vmem:[#allocation2 + $0x71] sm:$0xff]  ;;  %v384_v62 = vld [vmem:[#allocation2 + $0x79] sm:$0xff] }
  0x2a   : > { %7851 = vmatmul.mubr.msk.bf16.gmra.mrb[4].mxu0 %vm11279_vm1, %v408_v43  ;;  %v411_v60 = vpack.c.bf16 %v382_v58, %v381_v57  ;;  %v385_v63 = vld [vmem:[#allocation2 + $0x81] sm:$0xff]  ;;  %v386_v0 = vld [vmem:[#allocation2 + $0x89] sm:$0xff]  ;;  %v412_v1 = vpack.c.bf16 %v384_v62, %v383_v61  ;;  %v387_v4 = vld [vmem:[#allocation2 + $0x91] sm:$0xff] }
  0x2b   : > { %7854 = vmatprep.mubr.msk.bf16.mxu0 %vm11279_vm1, %v409_v45  ;;  %v413_v3 = vpack.c.bf16 %v386_v0, %v385_v63  ;;  %v388_v5 = vld [vmem:[#allocation2 + $0x99] sm:$0xff]  ;;  %v389_v6 = vld [vmem:[#allocation2 + $0xa1] sm:$0xff]  ;;  %v390_v7 = vld [vmem:[#allocation2 + $0xa9] sm:$0xff] }
  0x2c   : > { %v414_v8 = vpack.c.bf16 %v388_v5, %v387_v4  ;;  %v415_v9 = vpack.c.bf16 %v390_v7, %v389_v6  ;;  %v391_v10 = vld [vmem:[#allocation2 + $0xb1] sm:$0xff]  ;;  %v392_v11 = vld [vmem:[#allocation2 + $0xb9] sm:$0xff]  ;;  %v393_v12 = vld [vmem:[#allocation2 + $0xc1] sm:$0xff] }
  0x2d   : > { %v394_v13 = vld [vmem:[#allocation2 + $0xc9] sm:$0xff]  ;;  %v416_v14 = vpack.c.bf16 %v392_v11, %v391_v10  ;;  %v395_v16 = vld [vmem:[#allocation2 + $0xd1] sm:$0xff]  ;;  %v396_v17 = vld [vmem:[#allocation2 + $0xd9] sm:$0xff] }
  0x2e   : > { %v417_v15 = vpack.c.bf16 %v394_v13, %v393_v12  ;;  %v397_v18 = vld [vmem:[#allocation2 + $0xe1] sm:$0xff]  ;;  %v398_v19 = vld [vmem:[#allocation2 + $0xe9] sm:$0xff]  ;;  %v418_v20 = vpack.c.bf16 %v396_v17, %v395_v16  ;;  %v399_v22 = vld [vmem:[#allocation2 + $0xf1] sm:$0xff] }
  0x2f   : > { %v419_v21 = vpack.c.bf16 %v398_v19, %v397_v18  ;;  %v400_v23 = vld [vmem:[#allocation2 + $0xf9] sm:$0xff]  ;;  %v401_v24 = vld [vmem:[#allocation2 + $0x101] sm:$0xff]  ;;  %v402_v25 = vld [vmem:[#allocation2 + $0x109] sm:$0xff] }
  0x30   : > { %v420_v26 = vpack.c.bf16 %v400_v23, %v399_v22  ;;  %v421_v27 = vpack.c.bf16 %v402_v25, %v401_v24  ;;  %v403_v28 = vld [vmem:[#allocation2 + $0x111] sm:$0xff]  ;;  %v404_v29 = vld [vmem:[#allocation2 + $0x119] sm:$0xff]  ;;  %v315_v31 = vld [vmem:[#allocation2 + $0x8] sm:$0xff] }
  0x31   : > { %v314_v30 = vld [vmem:[#allocation2] sm:$0xff]  ;;  %v422_v32 = vpack.c.bf16 %v404_v29, %v403_v28  ;;  %v316_v34 = vld [vmem:[#allocation2 + $0x10] sm:$0xff]  ;;  %v317_v35 = vld [vmem:[#allocation2 + $0x18] sm:$0xff] }
  0x32   : > { %7855 = vmatmul.mubr.msk.bf16.gmra.mrb[8].mxu0 %vm11279_vm1, %v410_v59  ;;  %v350_v33 = vpack.c.bf16 %v315_v31, %v314_v30  ;;  %v318_v36 = vld [vmem:[#allocation2 + $0x20] sm:$0xff]  ;;  %v319_v37 = vld [vmem:[#allocation2 + $0x28] sm:$0xff]  ;;  %v351_v39 = vpack.c.bf16 %v317_v35, %v316_v34  ;;  %v320_v43 = vld [vmem:[#allocation2 + $0x30] sm:$0xff] }
  0x33   : > { %7858 = vmatprep.mubr.msk.bf16.mxu0 %vm11279_vm1, %v411_v60  ;;  %v352_v40 = vpack.c.bf16 %v319_v37, %v318_v36  ;;  %v9391_v42 = vld [vmem:[%s11274_s1 + $0x6] sm:$0x3]  ;;  %v321_v44 = vld [vmem:[#allocation2 + $0x38] sm:$0xff]  ;;  %v323_v46 = vld [vmem:[#allocation2 + $0x48] sm:$0xff] }
  0x34   : > { %v322_v45 = vld [vmem:[#allocation2 + $0x40] sm:$0xff]  ;;  %v353_v47 = vpack.c.bf16 %v321_v44, %v320_v43  ;;  %v324_v38 = vld [vmem:[#allocation2 + $0x50] sm:$0xff]  ;;  %v325_v49 = vld [vmem:[#allocation2 + $0x58] sm:$0xff]  ;;  %v1331_v35 = vsel %vm11280_vm0, %v9391_v42, 0 }
  0x35   : > { %v354_v48 = vpack.c.bf16 %v323_v46, %v322_v45  ;;  %v326_v50 = vld [vmem:[#allocation2 + $0x60] sm:$0xff]  ;;  %v327_v51 = vld [vmem:[#allocation2 + $0x68] sm:$0xff]  ;;  %v355_v52 = vpack.c.bf16 %v325_v49, %v324_v38  ;;  %v328_v54 = vld [vmem:[#allocation2 + $0x70] sm:$0xff] }
  0x36   : > { %v356_v53 = vpack.c.bf16 %v327_v51, %v326_v50  ;;  %v329_v55 = vld [vmem:[#allocation2 + $0x78] sm:$0xff]  ;;  %v330_v56 = vld [vmem:[#allocation2 + $0x80] sm:$0xff]  ;;  %v331_v57 = vld [vmem:[#allocation2 + $0x88] sm:$0xff] }
  0x37   : > { %v357_v58 = vpack.c.bf16 %v329_v55, %v328_v54  ;;  %v358_v59 = vpack.c.bf16 %v331_v57, %v330_v56  ;;  %v332_v60 = vld [vmem:[#allocation2 + $0x90] sm:$0xff]  ;;  %v333_v61 = vld [vmem:[#allocation2 + $0x98] sm:$0xff]  ;;  %v334_v62 = vld [vmem:[#allocation2 + $0xa0] sm:$0xff] }
  0x38   : > { %v335_v63 = vld [vmem:[#allocation2 + $0xa8] sm:$0xff]  ;;  %v359_v0 = vpack.c.bf16 %v333_v61, %v332_v60  ;;  %v337_v4 = vld [vmem:[#allocation2 + $0xb8] sm:$0xff]  ;;  %v338_v5 = vld [vmem:[#allocation2 + $0xc0] sm:$0xff] }
  0x39   : > { %v339_v6 = vld [vmem:[#allocation2 + $0xc8] sm:$0xff]  ;;  %v341_v10 = vld [vmem:[#allocation2 + $0xd8] sm:$0xff]  ;;  %v342_v11 = vld [vmem:[#allocation2 + $0xe0] sm:$0xff] }
  0x3a   : > { %7859 = vmatmul.mubr.msk.bf16.gmra.mrb[12].mxu0 %vm11279_vm1, %v412_v1  ;;  %v360_v1 = vpack.c.bf16 %v335_v63, %v334_v62  ;;  %v343_v12 = vld [vmem:[#allocation2 + $0xe8] sm:$0xff]  ;;  %v345_v16 = vld [vmem:[#allocation2 + $0xf8] sm:$0xff]  ;;  %v346_v17 = vld [vmem:[#allocation2 + $0x100] sm:$0xff] }
  0x3b   : > { %7862 = vmatprep.mubr.msk.bf16.mxu0 %vm11279_vm1, %v413_v3  ;;  %v336_v3 = vld [vmem:[#allocation2 + $0xb0] sm:$0xff]  ;;  %v347_v18 = vld [vmem:[#allocation2 + $0x108] sm:$0xff]  ;;  %v349_v22 = vld [vmem:[#allocation2 + $0x118] sm:$0xff] }
  0x3c   : > { %v361_v7 = vpack.c.bf16 %v337_v4, %v336_v3  ;;  %v894_v23 = vld [vmem:[#allocation2 + $0x2] sm:$0xff]  ;;  %v895_v24 = vld [vmem:[#allocation2 + $0xa] sm:$0xff]  ;;  %v897_v28 = vld [vmem:[#allocation2 + $0x1a] sm:$0xff] }
  0x3d   : > { %v898_v29 = vld [vmem:[#allocation2 + $0x22] sm:$0xff]  ;;  %v899_v30 = vld [vmem:[#allocation2 + $0x2a] sm:$0xff]  ;;  %v277_v34 = vld [vmem:[%s9288_s27 + $0x118] sm:$0xff] }
  0x3e   : > { %313 = vst.msk [vmem:[#allocation2 + $0x12a] sm:$0xff] %vm11279_vm1, %v277_v34  ;;  %v9426_v36 = vld [vmem:[%s11274_s1 + $0x8] sm:$0x3]  ;;  %v900_v37 = vld [vmem:[#allocation2 + $0x32] sm:$0xff]  ;;  %v905_v45 = vld [vmem:[#allocation2 + $0x5a] sm:$0xff] }
  0x3f   : > { %v904_v44 = vld [vmem:[#allocation2 + $0x52] sm:$0xff]  ;;  %v906_v46 = vld [vmem:[#allocation2 + $0x62] sm:$0xff]  ;;  %v909_v50 = vld [vmem:[#allocation2 + $0x7a] sm:$0xff] }
  0x40   : > { %v908_v49 = vld [vmem:[#allocation2 + $0x72] sm:$0xff]  ;;  %v910_v51 = vld [vmem:[#allocation2 + $0x82] sm:$0xff]  ;;  %v913_v56 = vld [vmem:[#allocation2 + $0x9a] sm:$0xff] }
  0x41   : > { %v912_v55 = vld [vmem:[#allocation2 + $0x92] sm:$0xff]  ;;  %v914_v57 = vld [vmem:[#allocation2 + $0xa2] sm:$0xff]  ;;  %v917_v62 = vld [vmem:[#allocation2 + $0xba] sm:$0xff] }
  0x42   : > { %7863 = vmatmul.mubr.msk.bf16.gmra.mrb[16].mxu0 %vm11279_vm1, %v414_v8  ;;  %v362_v8 = vpack.c.bf16 %v339_v6, %v338_v5  ;;  %v916_v61 = vld [vmem:[#allocation2 + $0xb2] sm:$0xff]  ;;  %v918_v63 = vld [vmem:[#allocation2 + $0xc2] sm:$0xff]  ;;  %v921_v5 = vld [vmem:[#allocation2 + $0xda] sm:$0xff] }
  0x43   : > { %7866 = vmatprep.mubr.msk.bf16.mxu0 %vm11279_vm1, %v415_v9  ;;  %v340_v9 = vld [vmem:[#allocation2 + $0xd0] sm:$0xff]  ;;  %v922_v6 = vld [vmem:[#allocation2 + $0xe2] sm:$0xff]  ;;  %v9480_v34 = vld [vmem:[%s11274_s1 + $0xc] sm:$0x3] }
  0x44   : > { %v363_v13 = vpack.c.bf16 %v341_v10, %v340_v9  ;;  %v920_v4 = vld [vmem:[#allocation2 + $0xd2] sm:$0xff] }
  0x45   : > { %v924_v10 = vld [vmem:[#allocation2 + $0xf2] sm:$0xff] }
  0x4a   : > { %7867 = vmatmul.mubr.msk.bf16.gmra.mrb[20].mxu0 %vm11279_vm1, %v416_v14  ;;  %v364_v14 = vpack.c.bf16 %v343_v12, %v342_v11  ;;  %v925_v11 = vld [vmem:[#allocation2 + $0xfa] sm:$0xff]  ;;  %v926_v12 = vld [vmem:[#allocation2 + $0x102] sm:$0xff] }
  0x4b   : > { %7870 = vmatprep.mubr.msk.bf16.mxu0 %vm11279_vm1, %v417_v15  ;;  %v344_v15 = vld [vmem:[#allocation2 + $0xf0] sm:$0xff] }
  0x4c   : > { %v365_v19 = vpack.c.bf16 %v345_v16, %v344_v15  ;;  %v928_v16 = vld [vmem:[#allocation2 + $0x112] sm:$0xff] }
  0x52   : > { %7871 = vmatmul.mubr.msk.bf16.gmra.mrb[24].mxu0 %vm11279_vm1, %v418_v20  ;;  %v366_v20 = vpack.c.bf16 %v347_v18, %v346_v17  ;;  %v929_v17 = vld [vmem:[#allocation2 + $0x11a] sm:$0xff] }
  0x53   : > { %7874 = vmatprep.mubr.msk.bf16.mxu0 %vm11279_vm1, %v419_v21  ;;  %v348_v21 = vld [vmem:[#allocation2 + $0x110] sm:$0xff]  ;;  %v947_v18 = vpack.c.bf16 %v929_v17, %v928_v16  ;;  %v1873_v17 = vld [vmem:[#allocation2 + $0x1c] sm:$0xff] }
  0x54   : > { %v367_v25 = vpack.c.bf16 %v349_v22, %v348_v21  ;;  %v1255_v22 = vld [vmem:[#allocation2 + $0x12a] sm:$0xff]  ;;  %v1872_v16 = vld [vmem:[#allocation2 + $0x14] sm:$0xff] }
  0x5a   : > { %7875 = vmatmul.mubr.msk.bf16.gmra.mrb[28].mxu0 %vm11279_vm1, %v420_v26  ;;  %v930_v26 = vpack.c.bf16 %v895_v24, %v894_v23  ;;  %v1546_v23 = vld [vmem:[#allocation2 + $0x13] sm:$0xff]  ;;  %v1547_v24 = vld [vmem:[#allocation2 + $0x1b] sm:$0xff] }
  0x5b   : > { %7878 = vmatprep.mubr.msk.bf16.mxu0 %vm11279_vm1, %v421_v27  ;;  %v896_v27 = vld [vmem:[#allocation2 + $0x12] sm:$0xff] }
  0x5c   : > { %v9413_v31 = vpack.c.bf16 %v897_v28, %v896_v27  ;;  %v1548_v27 = vld [vmem:[#allocation2 + $0x23] sm:$0xff]  ;;  %v1549_v28 = vld [vmem:[#allocation2 + $0x2b] sm:$0xff] }
  0x62   : > { %7879 = vmatmul.mubr.msk.bf16.gmra.mrb[32].mxu0 %vm11279_vm1, %v422_v32  ;;  %v9415_v32 = vpack.c.bf16 %v899_v30, %v898_v29  ;;  %v1550_v29 = vld [vmem:[#allocation2 + $0x33] sm:$0xff]  ;;  %v1551_v30 = vld [vmem:[#allocation2 + $0x3b] sm:$0xff] }
  0x63   : > { %7884 = vmatprep.mubr.msk.bf16.mxu0 %vm11279_vm1, %v350_v33  ;;  %v276_v33 = vld [vmem:[%s9288_s27 + $0x110] sm:$0xff] }
  0x64   : > { %312 = vst.msk [vmem:[#allocation2 + $0x122] sm:$0xff] %vm11279_vm1, %v276_v33 }
  0x6a   : > { %7885 = vmatmul.mubr.msk.bf16.vlgmr.msra.gmra.mrb[0].mxu0 %vm11279_vm1, %v351_v39  ;;  %v901_v39 = vld [vmem:[#allocation2 + $0x3a] sm:$0xff] }
  0x6b   : > { %7921 = vmatpush3.bf16.msra.mxu0 %v1005_v41  ;;  %7888 = vmatprep.mubr.msk.bf16.mxu0 %vm11279_vm1, %v352_v40  ;;  %v902_v40 = vld [vmem:[#allocation2 + $0x42] sm:$0xff]  ;;  %v903_v41 = vld [vmem:[#allocation2 + $0x4a] sm:$0xff] }
  0x6c   : > { %9107 = vmatprep.subr.msk.bf16.mxu0 %vm11280_vm0, %v9391_v42  ;;  %v933_v42 = vpack.c.bf16 %v901_v39, %v900_v37  ;;  %v934_v43 = vpack.c.bf16 %v903_v41, %v902_v40  ;;  %v1254_v21 = vld [vmem:[#allocation2 + $0x122] sm:$0xff]  ;;  %v1554_v37 = vld [vmem:[#allocation2 + $0x53] sm:$0xff] }
  0x6d   : > { %v1555_v39 = vld [vmem:[#allocation2 + $0x5b] sm:$0xff] }
  0x6e   : > { %v1586_v41 = vpack.c.bf16 %v1555_v39, %v1554_v37  ;;  %v1885_v37 = vld [vmem:[#allocation2 + $0x7c] sm:$0xff] }
  0x72   : > { %7889 = vmatmul.mubr.msk.bf16.gmra.mrb[4].mxu0 %vm11279_vm1, %v353_v47  ;;  %v907_v47 = vld [vmem:[#allocation2 + $0x6a] sm:$0xff] }
  0x73   : > { %7892 = vmatprep.mubr.msk.bf16.mxu0 %vm11279_vm1, %v354_v48  ;;  %v935_v48 = vpack.c.bf16 %v905_v45, %v904_v44  ;;  %v936_v38 = vpack.c.bf16 %v907_v47, %v906_v46  ;;  %v1558_v44 = vld [vmem:[#allocation2 + $0x73] sm:$0xff]  ;;  %v1559_v45 = vld [vmem:[#allocation2 + $0x7b] sm:$0xff] }
  0x74   : > { %v1588_v47 = vpack.c.bf16 %v1559_v45, %v1558_v44  ;;  %v1889_v44 = vld [vmem:[#allocation2 + $0x9c] sm:$0xff] }
  0x7a   : > { %7893 = vmatmul.mubr.msk.bf16.gmra.mrb[8].mxu0 %vm11279_vm1, %v355_v52  ;;  %v911_v52 = vld [vmem:[#allocation2 + $0x8a] sm:$0xff] }
  0x7b   : > { %7896 = vmatprep.mubr.msk.bf16.mxu0 %vm11279_vm1, %v356_v53  ;;  %v937_v53 = vpack.c.bf16 %v909_v50, %v908_v49  ;;  %v938_v54 = vpack.c.bf16 %v911_v52, %v910_v51  ;;  %v1562_v49 = vld [vmem:[#allocation2 + $0x93] sm:$0xff]  ;;  %v1563_v50 = vld [vmem:[#allocation2 + $0x9b] sm:$0xff] }
  0x7c   : > { %v1590_v52 = vpack.c.bf16 %v1563_v50, %v1562_v49  ;;  %v1893_v49 = vld [vmem:[#allocation2 + $0xbc] sm:$0xff] }
  0x82   : > { %7897 = vmatmul.mubr.msk.bf16.gmra.mrb[12].mxu0 %vm11279_vm1, %v357_v58  ;;  %v915_v58 = vld [vmem:[#allocation2 + $0xaa] sm:$0xff] }
  0x83   : > { %7900 = vmatprep.mubr.msk.bf16.mxu0 %vm11279_vm1, %v358_v59  ;;  %v939_v59 = vpack.c.bf16 %v913_v56, %v912_v55  ;;  %v940_v60 = vpack.c.bf16 %v915_v58, %v914_v57  ;;  %v1566_v55 = vld [vmem:[#allocation2 + $0xb3] sm:$0xff]  ;;  %v1567_v56 = vld [vmem:[#allocation2 + $0xbb] sm:$0xff] }
  0x84   : > { %v1592_v58 = vpack.c.bf16 %v1567_v56, %v1566_v55  ;;  %v1897_v55 = vld [vmem:[#allocation2 + $0xdc] sm:$0xff] }
  0x8a   : > { %7901 = vmatmul.mubr.msk.bf16.gmra.mrb[16].mxu0 %vm11279_vm1, %v359_v0  ;;  %v919_v0 = vld [vmem:[#allocation2 + $0xca] sm:$0xff] }
  0x8b   : > { %7904 = vmatprep.mubr.msk.bf16.mxu0 %vm11279_vm1, %v360_v1  ;;  %v941_v1 = vpack.c.bf16 %v917_v62, %v916_v61  ;;  %v942_v3 = vpack.c.bf16 %v919_v0, %v918_v63  ;;  %v1570_v61 = vld [vmem:[#allocation2 + $0xd3] sm:$0xff]  ;;  %v1571_v62 = vld [vmem:[#allocation2 + $0xdb] sm:$0xff] }
  0x8c   : > { %v1594_v0 = vpack.c.bf16 %v1571_v62, %v1570_v61  ;;  %v1901_v61 = vld [vmem:[#allocation2 + $0xfc] sm:$0xff] }
  0x92   : > { %7905 = vmatmul.mubr.msk.bf16.gmra.mrb[20].mxu0 %vm11279_vm1, %v361_v7  ;;  %v923_v7 = vld [vmem:[#allocation2 + $0xea] sm:$0xff] }
  0x93   : > { %7908 = vmatprep.mubr.msk.bf16.mxu0 %vm11279_vm1, %v362_v8  ;;  %v943_v8 = vpack.c.bf16 %v921_v5, %v920_v4  ;;  %v944_v9 = vpack.c.bf16 %v923_v7, %v922_v6  ;;  %v1574_v4 = vld [vmem:[#allocation2 + $0xf3] sm:$0xff]  ;;  %v1575_v5 = vld [vmem:[#allocation2 + $0xfb] sm:$0xff] }
  0x94   : > { %v1596_v7 = vpack.c.bf16 %v1575_v5, %v1574_v4  ;;  %v1905_v4 = vld [vmem:[#allocation2 + $0x11c] sm:$0xff] }
  0x9a   : > { %7909 = vmatmul.mubr.msk.bf16.gmra.mrb[24].mxu0 %vm11279_vm1, %v363_v13  ;;  %v927_v13 = vld [vmem:[#allocation2 + $0x10a] sm:$0xff] }
  0x9b   : > { %7912 = vmatprep.mubr.msk.bf16.mxu0 %vm11279_vm1, %v364_v14  ;;  %v945_v14 = vpack.c.bf16 %v925_v11, %v924_v10  ;;  %v946_v15 = vpack.c.bf16 %v927_v13, %v926_v12  ;;  %v1578_v10 = vld [vmem:[#allocation2 + $0x113] sm:$0xff]  ;;  %v1579_v11 = vld [vmem:[#allocation2 + $0x11b] sm:$0xff] }
  0x9c   : > { %v1598_v13 = vpack.c.bf16 %v1579_v11, %v1578_v10  ;;  %v7309_v11 = vld [vmem:[%s11274_s1 + $0x10] sm:$0x3] }
  0xa2   : > { %7913 = vmatmul.mubr.msk.bf16.gmra.mrb[28].mxu0 %vm11279_vm1, %v365_v19  ;;  %v1657_v19 = vsel %vm11280_vm0, %v9426_v36, 0 }
  0xa3   : > { %7916 = vmatprep.mubr.msk.bf16.mxu0 %vm11279_vm1, %v366_v20  ;;  %v7252_v20 = vld [vmem:[%s11274_s1 + $0xa] sm:$0x3] }
  0xa4   : > { %v1983_v33 = vsel %vm11280_vm0, %v7252_v20, 0 }
  0xaa   : > { %7917 = vmatmul.mubr.msk.bf16.gmra.mrb[32].mxu0 %vm11279_vm1, %v367_v25  ;;  %v1273_v25 = vpack.c.bf16 %v1255_v22, %v1254_v21  ;;  %v1875_v21 = vld [vmem:[#allocation2 + $0x2c] sm:$0xff]  ;;  %v1876_v22 = vld [vmem:[#allocation2 + $0x34] sm:$0xff] }
  0xab   : > { %7922 = vmatprep.mubr.msk.bf16.mxu0 %vm11279_vm1, %v930_v26  ;;  %v1582_v26 = vpack.c.bf16 %v1547_v24, %v1546_v23  ;;  %v1877_v23 = vld [vmem:[#allocation2 + $0x3c] sm:$0xff] }
  0xb2   : > { %7923 = vmatmul.mubr.msk.bf16.vlgmr.msra.gmra.mrb[0].mxu0 %vm11279_vm1, %v9413_v31 }
  0xb3   : > { %7959 = vmatpush3.bf16.msra.mxu0 %v1331_v35  ;;  %7926 = vmatprep.mubr.msk.bf16.mxu0 %vm11279_vm1, %v9415_v32  ;;  %v1552_v35 = vld [vmem:[#allocation2 + $0x43] sm:$0xff] }
  0xb4   : > { %9108 = vmatprep.subr.msk.bf16.mxu0 %vm11280_vm0, %v9426_v36  ;;  %v1553_v36 = vld [vmem:[#allocation2 + $0x4b] sm:$0xff] }
  0xb5   : > { %v1585_v40 = vpack.c.bf16 %v1553_v36, %v1552_v35  ;;  %v1883_v35 = vld [vmem:[#allocation2 + $0x6c] sm:$0xff]  ;;  %v1884_v36 = vld [vmem:[#allocation2 + $0x74] sm:$0xff] }
  0xba   : > { %7927 = vmatmul.mubr.msk.bf16.gmra.mrb[4].mxu0 %vm11279_vm1, %v933_v42 }
  0xbb   : > { %7930 = vmatprep.mubr.msk.bf16.mxu0 %vm11279_vm1, %v934_v43 }
  0xc2   : > { %7931 = vmatmul.mubr.msk.bf16.gmra.mrb[8].mxu0 %vm11279_vm1, %v935_v48 }
  0xc3   : > { %7934 = vmatprep.mubr.msk.bf16.mxu0 %vm11279_vm1, %v936_v38 }
  0xca   : > { %7935 = vmatmul.mubr.msk.bf16.gmra.mrb[12].mxu0 %vm11279_vm1, %v937_v53 }
  0xcb   : > { %7938 = vmatprep.mubr.msk.bf16.mxu0 %vm11279_vm1, %v938_v54 }
  0xd2   : > { %7939 = vmatmul.mubr.msk.bf16.gmra.mrb[16].mxu0 %vm11279_vm1, %v939_v59 }
  0xd3   : > { %7942 = vmatprep.mubr.msk.bf16.mxu0 %vm11279_vm1, %v940_v60 }
  0xda   : > { %7943 = vmatmul.mubr.msk.bf16.gmra.mrb[20].mxu0 %vm11279_vm1, %v941_v1 }
  0xdb   : > { %7946 = vmatprep.mubr.msk.bf16.mxu0 %vm11279_vm1, %v942_v3 }
  0xe2   : > { %7947 = vmatmul.mubr.msk.bf16.gmra.mrb[24].mxu0 %vm11279_vm1, %v943_v8 }
  0xe3   : > { %7950 = vmatprep.mubr.msk.bf16.mxu0 %vm11279_vm1, %v944_v9 }
  0xea   : > { %7951 = vmatmul.mubr.msk.bf16.gmra.mrb[28].mxu0 %vm11279_vm1, %v945_v14 }
  0xeb   : > { %7954 = vmatprep.mubr.msk.bf16.mxu0 %vm11279_vm1, %v946_v15 }
  0xf2   : > { %7955 = vmatmul.mubr.msk.bf16.gmra.mrb[32].mxu0 %vm11279_vm1, %v947_v18 }
  0xf3   : > { %7960 = vmatprep.mubr.msk.bf16.mxu0 %vm11279_vm1, %v9413_v31  ;;  %v1583_v31 = vpack.c.bf16 %v1549_v28, %v1548_v27  ;;  %v9512_v27 = vld [vmem:[%s11274_s1 + $0xe] sm:$0x3]  ;;  %v1878_v28 = vld [vmem:[#allocation2 + $0x44] sm:$0xff] }
  0xf4   : > { %v2635_v10 = vsel %vm11280_vm0, %v9512_v27, 0 }
  0xfa   : > { %7961 = vmatmul.mubr.msk.bf16.vlgmr.msra.gmra.mrb[0].mxu0 %vm11279_vm1, %v9415_v32  ;;  %v1584_v32 = vpack.c.bf16 %v1551_v30, %v1550_v29  ;;  %v1879_v29 = vld [vmem:[#allocation2 + $0x4c] sm:$0xff]  ;;  %v1880_v30 = vld [vmem:[#allocation2 + $0x54] sm:$0xff] }
  0xfb   : > { %7997 = vmatpush3.bf16.msra.mxu0 %v1657_v19  ;;  %7964 = vmatprep.mubr.msk.bf16.mxu0 %vm11279_vm1, %v933_v42  ;;  %v1556_v42 = vld [vmem:[#allocation2 + $0x63] sm:$0xff]  ;;  %v1908_v19 = vpack.c.bf16 %v1873_v17, %v1872_v16 }
  0xfc   : > { %9109 = vmatprep.subr.msk.bf16.mxu0 %vm11280_vm0, %v7252_v20  ;;  %v1874_v20 = vld [vmem:[#allocation2 + $0x24] sm:$0xff] }
  0xfd   : > { %v9502_v24 = vpack.c.bf16 %v1875_v21, %v1874_v20  ;;  %v2528_v20 = vld [vmem:[#allocation2 + $0x45] sm:$0xff]  ;;  %v2529_v21 = vld [vmem:[#allocation2 + $0x4d] sm:$0xff] }
 0x102   : > { %7965 = vmatmul.mubr.msk.bf16.gmra.mrb[4].mxu0 %vm11279_vm1, %v934_v43  ;;  %v1557_v43 = vld [vmem:[#allocation2 + $0x6b] sm:$0xff] }
 0x103   : > { %7968 = vmatprep.mubr.msk.bf16.mxu0 %vm11279_vm1, %v935_v48  ;;  %v1587_v46 = vpack.c.bf16 %v1557_v43, %v1556_v42  ;;  %v1560_v48 = vld [vmem:[#allocation2 + $0x83] sm:$0xff]  ;;  %v1887_v42 = vld [vmem:[#allocation2 + $0x8c] sm:$0xff]  ;;  %v1888_v43 = vld [vmem:[#allocation2 + $0x94] sm:$0xff] }
 0x10a   : > { %7969 = vmatmul.mubr.msk.bf16.gmra.mrb[8].mxu0 %vm11279_vm1, %v936_v38  ;;  %v1561_v38 = vld [vmem:[#allocation2 + $0x8b] sm:$0xff] }
 0x10b   : > { %7972 = vmatprep.mubr.msk.bf16.mxu0 %vm11279_vm1, %v937_v53  ;;  %v1589_v51 = vpack.c.bf16 %v1561_v38, %v1560_v48  ;;  %v1564_v53 = vld [vmem:[#allocation2 + $0xa3] sm:$0xff]  ;;  %v1891_v48 = vld [vmem:[#allocation2 + $0xac] sm:$0xff]  ;;  %v1892_v38 = vld [vmem:[#allocation2 + $0xb4] sm:$0xff] }
 0x112   : > { %7973 = vmatmul.mubr.msk.bf16.gmra.mrb[12].mxu0 %vm11279_vm1, %v938_v54  ;;  %v1565_v54 = vld [vmem:[#allocation2 + $0xab] sm:$0xff] }
 0x113   : > { %7976 = vmatprep.mubr.msk.bf16.mxu0 %vm11279_vm1, %v939_v59  ;;  %v1591_v57 = vpack.c.bf16 %v1565_v54, %v1564_v53  ;;  %v1568_v59 = vld [vmem:[#allocation2 + $0xc3] sm:$0xff]  ;;  %v1895_v53 = vld [vmem:[#allocation2 + $0xcc] sm:$0xff]  ;;  %v1896_v54 = vld [vmem:[#allocation2 + $0xd4] sm:$0xff] }
 0x11a   : > { %7977 = vmatmul.mubr.msk.bf16.gmra.mrb[16].mxu0 %vm11279_vm1, %v940_v60  ;;  %v1569_v60 = vld [vmem:[#allocation2 + $0xcb] sm:$0xff] }
 0x11b   : > { %7980 = vmatprep.mubr.msk.bf16.mxu0 %vm11279_vm1, %v941_v1  ;;  %v1593_v63 = vpack.c.bf16 %v1569_v60, %v1568_v59  ;;  %v1572_v1 = vld [vmem:[#allocation2 + $0xe3] sm:$0xff]  ;;  %v1899_v59 = vld [vmem:[#allocation2 + $0xec] sm:$0xff]  ;;  %v1900_v60 = vld [vmem:[#allocation2 + $0xf4] sm:$0xff] }
 0x122   : > { %7981 = vmatmul.mubr.msk.bf16.gmra.mrb[20].mxu0 %vm11279_vm1, %v942_v3  ;;  %v1573_v3 = vld [vmem:[#allocation2 + $0xeb] sm:$0xff] }
 0x123   : > { %7984 = vmatprep.mubr.msk.bf16.mxu0 %vm11279_vm1, %v943_v8  ;;  %v1595_v6 = vpack.c.bf16 %v1573_v3, %v1572_v1  ;;  %v1576_v8 = vld [vmem:[#allocation2 + $0x103] sm:$0xff]  ;;  %v1903_v1 = vld [vmem:[#allocation2 + $0x10c] sm:$0xff]  ;;  %v1904_v3 = vld [vmem:[#allocation2 + $0x114] sm:$0xff] }
 0x12a   : > { %7985 = vmatmul.mubr.msk.bf16.gmra.mrb[24].mxu0 %vm11279_vm1, %v944_v9  ;;  %v1577_v9 = vld [vmem:[#allocation2 + $0x10b] sm:$0xff] }
 0x12b   : > { %7988 = vmatprep.mubr.msk.bf16.mxu0 %vm11279_vm1, %v945_v14  ;;  %v1597_v12 = vpack.c.bf16 %v1577_v9, %v1576_v8  ;;  %v1580_v14 = vld [vmem:[#allocation2 + $0x123] sm:$0xff]  ;;  %v1907_v8 = vld [vmem:[#allocation2 + $0x12c] sm:$0xff] }
 0x132   : > { %7989 = vmatmul.mubr.msk.bf16.gmra.mrb[28].mxu0 %vm11279_vm1, %v946_v15  ;;  %v1581_v15 = vld [vmem:[#allocation2 + $0x12b] sm:$0xff] }
 0x133   : > { %7992 = vmatprep.mubr.msk.bf16.mxu0 %vm11279_vm1, %v947_v18  ;;  %v1599_v18 = vpack.c.bf16 %v1581_v15, %v1580_v14  ;;  %v2524_v14 = vld [vmem:[#allocation2 + $0x25] sm:$0xff]  ;;  %v2525_v15 = vld [vmem:[#allocation2 + $0x2d] sm:$0xff] }
 0x134   : > { %v2560_v17 = vpack.c.bf16 %v2525_v15, %v2524_v14 }
 0x13a   : > { %7993 = vmatmul.mubr.msk.bf16.gmra.mrb[32].mxu0 %vm11279_vm1, %v1273_v25  ;;  %v9504_v25 = vpack.c.bf16 %v1877_v23, %v1876_v22  ;;  %v2562_v23 = vpack.c.bf16 %v2529_v21, %v2528_v20 }
 0x13b   : > { %7998 = vmatprep.mubr.msk.bf16.mxu0 %vm11279_vm1, %v1582_v26  ;;  %v2309_v26 = vsel %vm11280_vm0, %v9480_v34, 0 }
 0x142   : > { %7999 = vmatmul.mubr.msk.bf16.vlgmr.msra.gmra.mrb[0].mxu0 %vm11279_vm1, %v1583_v31  ;;  %v1881_v31 = vld [vmem:[#allocation2 + $0x5c] sm:$0xff] }
 0x143   : > { %8035 = vmatpush3.bf16.msra.mxu0 %v1983_v33  ;;  %8002 = vmatprep.mubr.msk.bf16.mxu0 %vm11279_vm1, %v1584_v32  ;;  %v1911_v32 = vpack.c.bf16 %v1879_v29, %v1878_v28  ;;  %v1912_v33 = vpack.c.bf16 %v1881_v31, %v1880_v30  ;;  %v2533_v28 = vld [vmem:[#allocation2 + $0x6d] sm:$0xff]  ;;  %v2534_v31 = vld [vmem:[#allocation2 + $0x75] sm:$0xff] }
 0x144   : > { %9110 = vmatprep.subr.msk.bf16.mxu0 %vm11280_vm0, %v9480_v34  ;;  %v1882_v34 = vld [vmem:[#allocation2 + $0x64] sm:$0xff] }
 0x145   : > { %v1913_v39 = vpack.c.bf16 %v1883_v35, %v1882_v34  ;;  %v2537_v34 = vld [vmem:[#allocation2 + $0x8d] sm:$0xff] }
 0x14a   : > { %8003 = vmatmul.mubr.msk.bf16.gmra.mrb[4].mxu0 %vm11279_vm1, %v1585_v40  ;;  %v1914_v40 = vpack.c.bf16 %v1885_v37, %v1884_v36  ;;  %v2538_v37 = vld [vmem:[#allocation2 + $0x95] sm:$0xff] }
 0x14b   : > { %8006 = vmatprep.mubr.msk.bf16.mxu0 %vm11279_vm1, %v1586_v41  ;;  %v1886_v41 = vld [vmem:[#allocation2 + $0x84] sm:$0xff] }
 0x14c   : > { %v1915_v45 = vpack.c.bf16 %v1887_v42, %v1886_v41  ;;  %v2541_v41 = vld [vmem:[#allocation2 + $0xad] sm:$0xff] }
 0x152   : > { %8007 = vmatmul.mubr.msk.bf16.gmra.mrb[8].mxu0 %vm11279_vm1, %v1587_v46  ;;  %v1916_v46 = vpack.c.bf16 %v1889_v44, %v1888_v43  ;;  %v2542_v44 = vld [vmem:[#allocation2 + $0xb5] sm:$0xff] }
 0x153   : > { %8010 = vmatprep.mubr.msk.bf16.mxu0 %vm11279_vm1, %v1588_v47  ;;  %v1890_v47 = vld [vmem:[#allocation2 + $0xa4] sm:$0xff] }
 0x154   : > { %v1917_v50 = vpack.c.bf16 %v1891_v48, %v1890_v47  ;;  %v2545_v47 = vld [vmem:[#allocation2 + $0xcd] sm:$0xff] }
 0x15a   : > { %8011 = vmatmul.mubr.msk.bf16.gmra.mrb[12].mxu0 %vm11279_vm1, %v1589_v51  ;;  %v1918_v51 = vpack.c.bf16 %v1893_v49, %v1892_v38  ;;  %v2546_v49 = vld [vmem:[#allocation2 + $0xd5] sm:$0xff] }
 0x15b   : > { %8014 = vmatprep.mubr.msk.bf16.mxu0 %vm11279_vm1, %v1590_v52  ;;  %v1894_v52 = vld [vmem:[#allocation2 + $0xc4] sm:$0xff] }
 0x15c   : > { %v1919_v56 = vpack.c.bf16 %v1895_v53, %v1894_v52  ;;  %v2549_v52 = vld [vmem:[#allocation2 + $0xed] sm:$0xff] }
 0x162   : > { %8015 = vmatmul.mubr.msk.bf16.gmra.mrb[16].mxu0 %vm11279_vm1, %v1591_v57  ;;  %v1920_v57 = vpack.c.bf16 %v1897_v55, %v1896_v54  ;;  %v2550_v55 = vld [vmem:[#allocation2 + $0xf5] sm:$0xff] }
 0x163   : > { %8018 = vmatprep.mubr.msk.bf16.mxu0 %vm11279_vm1, %v1592_v58  ;;  %v1898_v58 = vld [vmem:[#allocation2 + $0xe4] sm:$0xff] }
 0x164   : > { %v1921_v62 = vpack.c.bf16 %v1899_v59, %v1898_v58  ;;  %v2553_v58 = vld [vmem:[#allocation2 + $0x10d] sm:$0xff] }
 0x16a   : > { %8019 = vmatmul.mubr.msk.bf16.gmra.mrb[20].mxu0 %vm11279_vm1, %v1593_v63  ;;  %v1922_v63 = vpack.c.bf16 %v1901_v61, %v1900_v60  ;;  %v2554_v61 = vld [vmem:[#allocation2 + $0x115] sm:$0xff] }
 0x16b   : > { %8022 = vmatprep.mubr.msk.bf16.mxu0 %vm11279_vm1, %v1594_v0  ;;  %v1902_v0 = vld [vmem:[#allocation2 + $0x104] sm:$0xff] }
 0x16c   : > { %v1923_v5 = vpack.c.bf16 %v1903_v1, %v1902_v0  ;;  %v2557_v0 = vld [vmem:[#allocation2 + $0x12d] sm:$0xff] }
 0x172   : > { %8023 = vmatmul.mubr.msk.bf16.gmra.mrb[24].mxu0 %vm11279_vm1, %v1595_v6  ;;  %v1924_v6 = vpack.c.bf16 %v1905_v4, %v1904_v3  ;;  %v2558_v4 = vld [vmem:[#allocation2 + $0x135] sm:$0xff] }
 0x173   : > { %8026 = vmatprep.mubr.msk.bf16.mxu0 %vm11279_vm1, %v1596_v7  ;;  %v1906_v7 = vld [vmem:[#allocation2 + $0x124] sm:$0xff] }
 0x174   : > { %v1925_v9 = vpack.c.bf16 %v1907_v8, %v1906_v7  ;;  %v2851_v7 = vld [vmem:[#allocation2 + $0x2e] sm:$0xff] }
 0x17a   : > { %8027 = vmatmul.mubr.msk.bf16.gmra.mrb[28].mxu0 %vm11279_vm1, %v1597_v12  ;;  %v2232_v12 = vld [vmem:[#allocation2 + $0x134] sm:$0xff] }
 0x17b   : > { %8030 = vmatprep.mubr.msk.bf16.mxu0 %vm11279_vm1, %v1598_v13  ;;  %v2233_v13 = vld [vmem:[#allocation2 + $0x13c] sm:$0xff] }
 0x17c   : > { %v2251_v16 = vpack.c.bf16 %v2233_v13, %v2232_v12  ;;  %v2854_v12 = vld [vmem:[#allocation2 + $0x46] sm:$0xff]  ;;  %v2855_v13 = vld [vmem:[#allocation2 + $0x4e] sm:$0xff] }
 0x17d   : > { %v2888_v15 = vpack.c.bf16 %v2855_v13, %v2854_v12 }
 0x182   : > { %8031 = vmatmul.mubr.msk.bf16.gmra.mrb[32].mxu0 %vm11279_vm1, %v1599_v18  ;;  %v2526_v18 = vld [vmem:[#allocation2 + $0x35] sm:$0xff] }
 0x183   : > { %8036 = vmatprep.mubr.msk.bf16.mxu0 %vm11279_vm1, %v1908_v19  ;;  %v2527_v19 = vld [vmem:[#allocation2 + $0x3d] sm:$0xff] }
 0x184   : > { %v2561_v22 = vpack.c.bf16 %v2527_v19, %v2526_v18  ;;  %v2858_v18 = vld [vmem:[#allocation2 + $0x66] sm:$0xff]  ;;  %v2859_v19 = vld [vmem:[#allocation2 + $0x6e] sm:$0xff] }
 0x185   : > { %v2890_v21 = vpack.c.bf16 %v2859_v19, %v2858_v18 }
 0x18a   : > { %8037 = vmatmul.mubr.msk.bf16.vlgmr.msra.gmra.mrb[0].mxu0 %vm11279_vm1, %v9502_v24 }
 0x18b   : > { %8073 = vmatpush3.bf16.msra.mxu0 %v2309_v26  ;;  %8040 = vmatprep.mubr.msk.bf16.mxu0 %vm11279_vm1, %v9504_v25  ;;  %v2531_v26 = vld [vmem:[#allocation2 + $0x5d] sm:$0xff] }
 0x18c   : > { %9111 = vmatprep.subr.msk.bf16.mxu0 %vm11280_vm0, %v9512_v27  ;;  %v2532_v27 = vld [vmem:[#allocation2 + $0x65] sm:$0xff] }
 0x18d   : > { %v2564_v30 = vpack.c.bf16 %v2533_v28, %v2532_v27  ;;  %v2864_v28 = vld [vmem:[#allocation2 + $0x96] sm:$0xff] }
 0x192   : > { %8041 = vmatmul.mubr.msk.bf16.gmra.mrb[4].mxu0 %vm11279_vm1, %v1911_v32 }
 0x193   : > { %8044 = vmatprep.mubr.msk.bf16.mxu0 %vm11279_vm1, %v1912_v33 }
 0x19a   : > { %8045 = vmatmul.mubr.msk.bf16.gmra.mrb[8].mxu0 %vm11279_vm1, %v1913_v39 }
 0x19b   : > { %8048 = vmatprep.mubr.msk.bf16.mxu0 %vm11279_vm1, %v1914_v40 }
 0x1a2   : > { %8049 = vmatmul.mubr.msk.bf16.gmra.mrb[12].mxu0 %vm11279_vm1, %v1915_v45 }
 0x1a3   : > { %8052 = vmatprep.mubr.msk.bf16.mxu0 %vm11279_vm1, %v1916_v46 }
 0x1aa   : > { %8053 = vmatmul.mubr.msk.bf16.gmra.mrb[16].mxu0 %vm11279_vm1, %v1917_v50 }
 0x1ab   : > { %8056 = vmatprep.mubr.msk.bf16.mxu0 %vm11279_vm1, %v1918_v51 }
 0x1b2   : > { %8057 = vmatmul.mubr.msk.bf16.gmra.mrb[20].mxu0 %vm11279_vm1, %v1919_v56 }
 0x1b3   : > { %8060 = vmatprep.mubr.msk.bf16.mxu0 %vm11279_vm1, %v1920_v57 }
 0x1ba   : > { %8061 = vmatmul.mubr.msk.bf16.gmra.mrb[24].mxu0 %vm11279_vm1, %v1921_v62 }
 0x1bb   : > { %8064 = vmatprep.mubr.msk.bf16.mxu0 %vm11279_vm1, %v1922_v63 }
 0x1c2   : > { %8065 = vmatmul.mubr.msk.bf16.gmra.mrb[28].mxu0 %vm11279_vm1, %v1923_v5 }
 0x1c3   : > { %8068 = vmatprep.mubr.msk.bf16.mxu0 %vm11279_vm1, %v1924_v6 }
 0x1ca   : > { %8069 = vmatmul.mubr.msk.bf16.gmra.mrb[32].mxu0 %vm11279_vm1, %v1925_v9 }
 0x1cb   : > { %8074 = vmatprep.mubr.msk.bf16.mxu0 %vm11279_vm1, %v9502_v24  ;;  %v2961_v24 = vsel %vm11280_vm0, %v7309_v11, 0 }
 0x1d2   : > { %8075 = vmatmul.mubr.msk.bf16.vlgmr.msra.gmra.mrb[0].mxu0 %vm11279_vm1, %v9504_v25  ;;  %v2530_v25 = vld [vmem:[#allocation2 + $0x55] sm:$0xff] }
 0x1d3   : > { %8111 = vmatpush3.bf16.msra.mxu0 %v2635_v10  ;;  %8078 = vmatprep.mubr.msk.bf16.mxu0 %vm11279_vm1, %v1911_v32  ;;  %v2563_v29 = vpack.c.bf16 %v2531_v26, %v2530_v25  ;;  %v2535_v32 = vld [vmem:[#allocation2 + $0x7d] sm:$0xff]  ;;  %v2863_v25 = vld [vmem:[#allocation2 + $0x8e] sm:$0xff] }
 0x1d4   : > { %9112 = vmatprep.subr.msk.bf16.mxu0 %vm11280_vm0, %v7309_v11  ;;  %v2565_v35 = vpack.c.bf16 %v2535_v32, %v2534_v31  ;;  %v2852_v10 = vld [vmem:[#allocation2 + $0x36] sm:$0xff]  ;;  %v2853_v11 = vld [vmem:[#allocation2 + $0x3e] sm:$0xff]  ;;  %v2867_v31 = vld [vmem:[#allocation2 + $0xae] sm:$0xff] }
 0x1d5   : > { %v2887_v14 = vpack.c.bf16 %v2853_v11, %v2852_v10 }
 0x1da   : > { %8079 = vmatmul.mubr.msk.bf16.gmra.mrb[4].mxu0 %vm11279_vm1, %v1912_v33  ;;  %v2536_v33 = vld [vmem:[#allocation2 + $0x85] sm:$0xff] }
 0x1db   : > { %8082 = vmatprep.mubr.msk.bf16.mxu0 %vm11279_vm1, %v1913_v39  ;;  %v2566_v36 = vpack.c.bf16 %v2537_v34, %v2536_v33  ;;  %v2539_v39 = vld [vmem:[#allocation2 + $0x9d] sm:$0xff] }
 0x1dc   : > { %v2567_v42 = vpack.c.bf16 %v2539_v39, %v2538_v37  ;;  %v2868_v34 = vld [vmem:[#allocation2 + $0xb6] sm:$0xff]  ;;  %v2871_v37 = vld [vmem:[#allocation2 + $0xce] sm:$0xff] }
 0x1e2   : > { %8083 = vmatmul.mubr.msk.bf16.gmra.mrb[8].mxu0 %vm11279_vm1, %v1914_v40  ;;  %v2540_v40 = vld [vmem:[#allocation2 + $0xa5] sm:$0xff] }
 0x1e3   : > { %8086 = vmatprep.mubr.msk.bf16.mxu0 %vm11279_vm1, %v1915_v45  ;;  %v2568_v43 = vpack.c.bf16 %v2541_v41, %v2540_v40  ;;  %v2543_v45 = vld [vmem:[#allocation2 + $0xbd] sm:$0xff] }
 0x1e4   : > { %v2569_v48 = vpack.c.bf16 %v2543_v45, %v2542_v44  ;;  %v2872_v41 = vld [vmem:[#allocation2 + $0xd6] sm:$0xff]  ;;  %v2875_v44 = vld [vmem:[#allocation2 + $0xee] sm:$0xff] }
 0x1ea   : > { %8087 = vmatmul.mubr.msk.bf16.gmra.mrb[12].mxu0 %vm11279_vm1, %v1916_v46  ;;  %v2544_v46 = vld [vmem:[#allocation2 + $0xc5] sm:$0xff] }
 0x1eb   : > { %8090 = vmatprep.mubr.msk.bf16.mxu0 %vm11279_vm1, %v1917_v50  ;;  %v2570_v38 = vpack.c.bf16 %v2545_v47, %v2544_v46  ;;  %v2547_v50 = vld [vmem:[#allocation2 + $0xdd] sm:$0xff] }
 0x1ec   : > { %v2571_v53 = vpack.c.bf16 %v2547_v50, %v2546_v49  ;;  %v2876_v47 = vld [vmem:[#allocation2 + $0xf6] sm:$0xff]  ;;  %v2879_v49 = vld [vmem:[#allocation2 + $0x10e] sm:$0xff] }
 0x1f2   : > { %8091 = vmatmul.mubr.msk.bf16.gmra.mrb[16].mxu0 %vm11279_vm1, %v1918_v51  ;;  %v2548_v51 = vld [vmem:[#allocation2 + $0xe5] sm:$0xff] }
 0x1f3   : > { %8094 = vmatprep.mubr.msk.bf16.mxu0 %vm11279_vm1, %v1919_v56  ;;  %v2572_v54 = vpack.c.bf16 %v2549_v52, %v2548_v51  ;;  %v2551_v56 = vld [vmem:[#allocation2 + $0xfd] sm:$0xff] }
 0x1f4   : > { %v2573_v59 = vpack.c.bf16 %v2551_v56, %v2550_v55  ;;  %v2880_v52 = vld [vmem:[#allocation2 + $0x116] sm:$0xff]  ;;  %v2883_v55 = vld [vmem:[#allocation2 + $0x12e] sm:$0xff] }
 0x1fa   : > { %8095 = vmatmul.mubr.msk.bf16.gmra.mrb[20].mxu0 %vm11279_vm1, %v1920_v57  ;;  %v2552_v57 = vld [vmem:[#allocation2 + $0x105] sm:$0xff] }
 0x1fb   : > { %8098 = vmatprep.mubr.msk.bf16.mxu0 %vm11279_vm1, %v1921_v62  ;;  %v2574_v60 = vpack.c.bf16 %v2553_v58, %v2552_v57  ;;  %v2555_v62 = vld [vmem:[#allocation2 + $0x11d] sm:$0xff] }
 0x1fc   : > { %v2575_v1 = vpack.c.bf16 %v2555_v62, %v2554_v61  ;;  %v2884_v58 = vld [vmem:[#allocation2 + $0x136] sm:$0xff]  ;;  %v7329_v61 = vld [vmem:[%s11275_s2 + $0x2] sm:$0x3] }
 0x1fd   : > { %9113 = vmatprep.subr.msk.bf16.mxu1 %vm11280_vm0, %v7329_v61  ;;  %v4214_v62 = vsel %vm11280_vm0, %v7329_v61, 0 }
 0x1fe   : > { %8187 = vmatpush3.bf16.msra.mxu1 %v4214_v62 }
 0x202   : > { %8099 = vmatmul.mubr.msk.bf16.gmra.mrb[24].mxu0 %vm11279_vm1, %v1922_v63  ;;  %v2556_v63 = vld [vmem:[#allocation2 + $0x125] sm:$0xff] }
 0x203   : > { %8102 = vmatprep.mubr.msk.bf16.mxu0 %vm11279_vm1, %v1923_v5  ;;  %v2576_v3 = vpack.c.bf16 %v2557_v0, %v2556_v63  ;;  %v2559_v5 = vld [vmem:[#allocation2 + $0x13d] sm:$0xff]  ;;  %v4103_v63 = vld [vmem:[#allocation3 + $0x1] sm:$0xff]  ;;  %v4104_v0 = vld [vmem:[#allocation3 + $0x9] sm:$0xff] }
 0x204   : > { %v2577_v8 = vpack.c.bf16 %v2559_v5, %v2558_v4  ;;  %v9613_v4 = vshrl.u32 %v3255_v2, 7 }
 0x206   : > { %v3258_v5 = vadd.s32 16, %v9613_v4  ;;  %v3257_v13 = vadd.s32 8, %v9613_v4 }
 0x20a   : > { %8103 = vmatmul.mubr.msk.bf16.gmra.mrb[28].mxu0 %vm11279_vm1, %v1924_v6  ;;  %v2850_v6 = vld [vmem:[#allocation2 + $0x26] sm:$0xff] }
 0x20b   : > { %8106 = vmatprep.mubr.msk.bf16.mxu0 %vm11279_vm1, %v1925_v9  ;;  %v2886_v9 = vpack.c.bf16 %v2851_v7, %v2850_v6  ;;  %v3259_v6 = vadd.s32 24, %v9613_v4 }
 0x20d   : > { %v9624_v11 = vmul.u32.u64.low 3817748708, %v3259_v6  ;;  %v9625_v12 = vmul.u32.u64.high 3817748708, %v3259_v6, %v9624_v11 }
 0x212   : > { %8107 = vmatmul.mubr.msk.bf16.gmra.mrb[32].mxu0 %vm11279_vm1, %v2251_v16  ;;  %v2856_v16 = vld [vmem:[#allocation2 + $0x56] sm:$0xff] }
 0x213   : > { %8112 = vmatprep.mubr.msk.bf16.mxu0 %vm11279_vm1, %v2560_v17  ;;  %v2857_v17 = vld [vmem:[#allocation2 + $0x5e] sm:$0xff] }
 0x214   : > { %v2889_v20 = vpack.c.bf16 %v2857_v17, %v2856_v16  ;;  %v9630_v16 = vmul.u32.u64.low 3817748708, %v3257_v13  ;;  %v9631_v17 = vmul.u32.u64.high 3817748708, %v3257_v13, %v9630_v16 }
 0x21a   : > { %8113 = vmatmul.mubr.msk.bf16.vlgmr.msra.gmra.mrb[0].mxu0 %vm11279_vm1, %v2561_v22  ;;  %v2860_v22 = vld [vmem:[#allocation2 + $0x76] sm:$0xff] }
 0x21b   : > { %8149 = vmatpush3.bf16.msra.mxu0 %v2961_v24  ;;  %8116 = vmatprep.mubr.msk.bf16.mxu0 %vm11279_vm1, %v2562_v23  ;;  %v2861_v23 = vld [vmem:[#allocation2 + $0x7e] sm:$0xff]  ;;  %v2862_v24 = vld [vmem:[#allocation2 + $0x86] sm:$0xff] }
 0x21c   : > { %v2891_v26 = vpack.c.bf16 %v2861_v23, %v2860_v22  ;;  %v2892_v27 = vpack.c.bf16 %v2863_v25, %v2862_v24  ;;  %v3263_v22 = vadd.s32 56, %v9613_v4  ;;  %v3331_v23 = vshrl.u32 %v9625_v12, 4 }
 0x21d   : > { %v9753_v12 = vadd.s32 96, %v9613_v4 }
 0x222   : > { %8117 = vmatmul.mubr.msk.bf16.gmra.mrb[4].mxu0 %vm11279_vm1, %v2563_v29  ;;  %v2865_v29 = vld [vmem:[#allocation2 + $0x9e] sm:$0xff] }
 0x223   : > { %8120 = vmatprep.mubr.msk.bf16.mxu0 %vm11279_vm1, %v2564_v30  ;;  %v2866_v30 = vld [vmem:[#allocation2 + $0xa6] sm:$0xff]  ;;  %v2893_v32 = vpack.c.bf16 %v2865_v29, %v2864_v28 }
 0x224   : > { %v2894_v33 = vpack.c.bf16 %v2867_v31, %v2866_v30  ;;  %v9646_v29 = vmul.u32.u64.low 3817748708, %v3263_v22  ;;  %v9647_v30 = vmul.u32.u64.high 3817748708, %v3263_v22, %v9646_v29  ;;  %v3332_v31 = vmul.u32 18, %v3331_v23 }
 0x225   : > { %v9778_v23 = vadd.s32 144, %v9613_v4 }
 0x22a   : > { %8121 = vmatmul.mubr.msk.bf16.gmra.mrb[8].mxu0 %vm11279_vm1, %v2565_v35  ;;  %v2869_v35 = vld [vmem:[#allocation2 + $0xbe] sm:$0xff] }
 0x22b   : > { %8124 = vmatprep.mubr.msk.bf16.mxu0 %vm11279_vm1, %v2566_v36  ;;  %v2870_v36 = vld [vmem:[#allocation2 + $0xc6] sm:$0xff]  ;;  %v2895_v39 = vpack.c.bf16 %v2869_v35, %v2868_v34 }
 0x22c   : > { %v2896_v40 = vpack.c.bf16 %v2871_v37, %v2870_v36 }
 0x232   : > { %8125 = vmatmul.mubr.msk.bf16.gmra.mrb[12].mxu0 %vm11279_vm1, %v2567_v42  ;;  %v2873_v42 = vld [vmem:[#allocation2 + $0xde] sm:$0xff] }
 0x233   : > { %8128 = vmatprep.mubr.msk.bf16.mxu0 %vm11279_vm1, %v2568_v43  ;;  %v2874_v43 = vld [vmem:[#allocation2 + $0xe6] sm:$0xff]  ;;  %v2897_v45 = vpack.c.bf16 %v2873_v42, %v2872_v41 }
 0x234   : > { %v2898_v46 = vpack.c.bf16 %v2875_v44, %v2874_v43 }
 0x23a   : > { %8129 = vmatmul.mubr.msk.bf16.gmra.mrb[16].mxu0 %vm11279_vm1, %v2569_v48  ;;  %v2877_v48 = vld [vmem:[#allocation2 + $0xfe] sm:$0xff] }
 0x23b   : > { %8132 = vmatprep.mubr.msk.bf16.mxu0 %vm11279_vm1, %v2570_v38  ;;  %v2878_v38 = vld [vmem:[#allocation2 + $0x106] sm:$0xff]  ;;  %v2899_v50 = vpack.c.bf16 %v2877_v48, %v2876_v47  ;;  %v3375_v48 = vshrl.u32 %v9647_v30, 4 }
 0x23c   : > { %v2900_v51 = vpack.c.bf16 %v2879_v49, %v2878_v38  ;;  %v9684_v49 = vadd.s32 88, %v9613_v4 }
 0x242   : > { %8133 = vmatmul.mubr.msk.bf16.gmra.mrb[20].mxu0 %vm11279_vm1, %v2571_v53  ;;  %v2881_v53 = vld [vmem:[#allocation2 + $0x11e] sm:$0xff] }
 0x243   : > { %8136 = vmatprep.mubr.msk.bf16.mxu0 %vm11279_vm1, %v2572_v54  ;;  %v2882_v54 = vld [vmem:[#allocation2 + $0x126] sm:$0xff]  ;;  %v2901_v56 = vpack.c.bf16 %v2881_v53, %v2880_v52 }
 0x244   : > { %v2902_v57 = vpack.c.bf16 %v2883_v55, %v2882_v54 }
 0x24a   : > { %8137 = vmatmul.mubr.msk.bf16.gmra.mrb[24].mxu0 %vm11279_vm1, %v2573_v59  ;;  %v2885_v59 = vld [vmem:[#allocation2 + $0x13e] sm:$0xff] }
 0x24b   : > { %8140 = vmatprep.mubr.msk.bf16.mxu0 %vm11279_vm1, %v2574_v60  ;;  %v2903_v60 = vpack.c.bf16 %v2885_v59, %v2884_v58 }
 0x252   : > { %8141 = vmatmul.mubr.msk.bf16.gmra.mrb[28].mxu0 %vm11279_vm1, %v2575_v1  ;;  %v4139_v1 = vpack.c.bf16 %v4104_v0, %v4103_v63  ;;  %v9720_v63 = vmul.u32.u64.low 3817748708, %v9684_v49  ;;  %v9721_v0 = vmul.u32.u64.high 3817748708, %v9684_v49, %v9720_v63 }
 0x253   : > { %8144 = vmatprep.mubr.msk.bf16.mxu0 %vm11279_vm1, %v2576_v3  ;;  %v9609_v3 = vld [vmem:[%s11275_s2] sm:$0x3] }
 0x254   : > { %8188 = vmatprep.mubr.msk.bf16.mxu1 %vm11279_vm1, %v4139_v1  ;;  %9114 = vmatprep.subr.msk.bf16.mxu1 %vm11280_vm0, %v9609_v3 }
 0x25a   : > { %8145 = vmatmul.mubr.msk.bf16.gmra.mrb[32].mxu0 %vm11279_vm1, %v2577_v8  ;;  %v9617_v7 = vmul.u32.u64.low 3817748708, %v3258_v5  ;;  %v9618_v8 = vmul.u32.u64.high 3817748708, %v3258_v5, %v9617_v7 }
 0x25b   : > { %8150 = vmatprep.mubr.msk.bf16.mxu0 %vm11279_vm1, %v2886_v9  ;;  %v9621_v9 = vmul.u32.u64.low 3817748708, %v9613_v4  ;;  %v9622_v10 = vmul.u32.u64.high 3817748708, %v9613_v4, %v9621_v9 }
 0x25c   : > { %v3320_v18 = vshrl.u32 %v9618_v8, 4 }
 0x25d   : > { %v3298_v19 = vshrl.u32 %v9622_v10, 4  ;;  %v9745_v10 = vadd.s32 112, %v9613_v4 }
 0x25f   : > { %v3299_v28 = vmul.u32 18, %v3298_v19  ;;  %v9767_v19 = vadd.s32 120, %v9613_v4 }
 0x261   : > { %v9660_v37 = vsub.s32 %v9613_v4, %v3299_v28  ;;  %v11311_v28 = vmov 0 }
 0x262   : > { %8151 = vmatmul.mubr.msk.bf16.vlgmr.msra.gmra.mrb[0].mxu0 %vm11279_vm1, %v2887_v14  ;;  %v3262_v14 = vadd.s32 48, %v9613_v4 }
 0x263   : > { %8154 = vmatprep.mubr.msk.bf16.mxu0 %vm11279_vm1, %v2888_v15  ;;  %v3260_v15 = vadd.s32 32, %v9613_v4  ;;  %vm3688_vm7 = vcmp.ne.s32.totalorder %v9660_v37, 0  ;;  %vm3724_vm8 = vcmp.lt.s32.totalorder %v9660_v37, 0 }
 0x264   : > { %vm9699_vm12 = vmand %vm3724_vm8, %vm3688_vm7 }
 0x265   : > { %v9640_v24 = vmul.u32.u64.low 3817748708, %v3260_v15  ;;  %v9641_v25 = vmul.u32.u64.high 3817748708, %v3260_v15, %v9640_v24 }
 0x267   : > { %v3342_v41 = vshrl.u32 %v9641_v25, 4  ;;  %v3419_v25 = vshrl.u32 %v9721_v0, 4 }
 0x269   : > { %v3343_v38 = vmul.u32 18, %v3342_v41 }
 0x26a   : > { %8155 = vmatmul.mubr.msk.bf16.gmra.mrb[4].mxu0 %vm11279_vm1, %v2889_v20 }
 0x26b   : > { %8158 = vmatprep.mubr.msk.bf16.mxu0 %vm11279_vm1, %v2890_v21  ;;  %v9635_v20 = vmul.u32.u64.low 3817748708, %v3262_v14  ;;  %v9636_v21 = vmul.u32.u64.high 3817748708, %v3262_v14, %v9635_v20  ;;  %v9717_v62 = vsub.s32 %v3260_v15, %v3343_v38 }
 0x26c   : > { %v9770_v20 = vadd.s32 104, %v9613_v4 }
 0x26d   : > { %vm3692_vm4 = vcmp.ne.s32.totalorder %v9717_v62, 0 }
 0x272   : > { %8159 = vmatmul.mubr.msk.bf16.gmra.mrb[8].mxu0 %vm11279_vm1, %v2891_v26  ;;  %v3321_v26 = vmul.u32 18, %v3320_v18 }
 0x273   : > { %8162 = vmatprep.mubr.msk.bf16.mxu0 %vm11279_vm1, %v2892_v27  ;;  %v9644_v27 = vadd.s32 40, %v9613_v4 }
 0x274   : > { %v9653_v34 = vsub.s32 %v3258_v5, %v3321_v26  ;;  %v9730_v5 = vadd.s32 72, %v9613_v4 }
 0x275   : > { %v9656_v35 = vmul.u32.u64.low 3817748708, %v9644_v27  ;;  %v9657_v36 = vmul.u32.u64.high 3817748708, %v9644_v27, %v9656_v35 }
 0x276   : > { %vm3690_vm5 = vcmp.ne.s32.totalorder %v9653_v34, 0  ;;  %vm3726_vm6 = vcmp.lt.s32.totalorder %v9653_v34, 0  ;;  %v9757_v15 = vmul.u32.u64.low 3817748708, %v9730_v5  ;;  %v9758_v16 = vmul.u32.u64.high 3817748708, %v9730_v5, %v9757_v15 }
 0x277   : > { %vm9686_vm11 = vmand %vm3726_vm6, %vm3690_vm5  ;;  %vm3728_vm5 = vcmp.lt.s32.totalorder %v9717_v62, 0  ;;  %v11313_v35 = vmov 0 }
 0x27a   : > { %8163 = vmatmul.mubr.msk.bf16.gmra.mrb[12].mxu0 %vm11279_vm1, %v2893_v32  ;;  %v3309_v32 = vshrl.u32 %v9631_v17, 4  ;;  %v9761_v17 = vadd.s32 18, %v9717_v62 }
 0x27b   : > { %8166 = vmatprep.mubr.msk.bf16.mxu0 %vm11279_vm1, %v2894_v33  ;;  %v9651_v33 = vadd.s32 80, %v9613_v4 }
 0x27c   : > { %v3310_v42 = vmul.u32 18, %v3309_v32  ;;  %v9809_v32 = vadd.s32 128, %v9613_v4 }
 0x27d   : > { %v9667_v43 = vmul.u32.u64.low 3817748708, %v9651_v33  ;;  %v9668_v44 = vmul.u32.u64.high 3817748708, %v9651_v33, %v9667_v43 }
 0x27e   : > { %v9693_v52 = vsub.s32 %v3257_v13, %v3310_v42  ;;  %v11315_v43 = vmov 0 }
 0x27f   : > { %v3408_v2 = vshrl.u32 %v9668_v44, 4 }
 0x280   : > { %vm3689_vm14 = vcmp.ne.s32.totalorder %v9693_v52, 0  ;;  %vm3725_vm15 = vcmp.lt.s32.totalorder %v9693_v52, 0  ;;  %v9738_v7 = vadd.s32 18, %v9693_v52 }
 0x281   : > { %v3409_v13 = vmul.u32 18, %v3408_v2  ;;  %vm9784_vm7 = vmand %vm3725_vm15, %vm3689_vm14 }
 0x282   : > { %8167 = vmatmul.mubr.msk.bf16.gmra.mrb[16].mxu0 %vm11279_vm1, %v2895_v39  ;;  %v3364_v39 = vshrl.u32 %v9636_v21, 4 }
 0x283   : > { %8170 = vmatprep.mubr.msk.bf16.mxu0 %vm11279_vm1, %v2896_v40  ;;  %v9663_v40 = vsub.s32 %v3259_v6, %v3332_v31  ;;  %v9806_v30 = vsub.s32 %v9651_v33, %v3409_v13  ;;  %v9824_v41 = vmul.u32.u64.low 3817748708, %v9770_v20  ;;  %v9825_v33 = vmul.u32.u64.high 3817748708, %v9770_v20, %v9824_v41 }
 0x284   : > { %v3365_v47 = vmul.u32 18, %v3364_v39 }
 0x285   : > { %vm3691_vm9 = vcmp.ne.s32.totalorder %v9663_v40, 0  ;;  %vm3727_vm10 = vcmp.lt.s32.totalorder %v9663_v40, 0 }
 0x286   : > { %vm9707_vm13 = vmand %vm3727_vm10, %vm3691_vm9  ;;  %v9711_v59 = vsub.s32 %v3262_v14, %v3365_v47  ;;  %v9838_v44 = vmul.u32.u64.low 3817748708, %v9778_v23  ;;  %v9839_v47 = vmul.u32.u64.high 3817748708, %v9778_v23, %v9838_v44 }
 0x287   : > { %vm9815_vm10 = vmand %vm3728_vm5, %vm3692_vm4  ;;  %vm3734_vm5 = vcmp.lt.s32.totalorder %v9806_v30, 0  ;;  %v11319_v44 = vmov 0 }
 0x288   : > { %vm3694_vm2 = vcmp.ne.s32.totalorder %v9711_v59, 0  ;;  %vm3730_vm3 = vcmp.lt.s32.totalorder %v9711_v59, 0  ;;  %v9748_v11 = vadd.s32 18, %v9711_v59  ;;  %v11314_v35 = vsel %vm9815_vm10, 4294967295, %v11313_v35 }
 0x289   : > { %vm9798_vm9 = vmand %vm3730_vm3, %vm3694_vm2  ;;  %vm3698_vm3 = vcmp.ne.s32.totalorder %v9806_v30, 0 }
 0x28a   : > { %8171 = vmatmul.mubr.msk.bf16.gmra.mrb[20].mxu0 %vm11279_vm1, %v2897_v45  ;;  %v9671_v45 = vadd.s32 64, %v9613_v4  ;;  %v11312_v28 = vsel %vm9798_vm9, 4294967295, %v11311_v28 }
 0x28b   : > { %8174 = vmatprep.mubr.msk.bf16.mxu0 %vm11279_vm1, %v2898_v46  ;;  %v9676_v46 = vadd.s32 18, %v9653_v34 }
 0x28c   : > { %v9696_v53 = vmul.u32.u64.low 3817748708, %v9671_v45  ;;  %v9697_v54 = vmul.u32.u64.high 3817748708, %v9671_v45, %v9696_v53 }
 0x28d   : > { %v3834_v61 = vsel %vm9686_vm11, %v9676_v46, %v9653_v34  ;;  %v3420_v53 = vmul.u32 18, %v3419_v25 }
 0x28e   : > { %v3386_v14 = vshrl.u32 %v9697_v54, 4 }
 0x28f   : > { %v9887_v25 = vsub.s32 %v9684_v49, %v3420_v53 }
 0x290   : > { %v3387_v31 = vmul.u32 18, %v3386_v14 }
 0x291   : > { %vm3735_vm0 = vcmp.lt.s32.totalorder %v9887_v25, 0  ;;  %v9937_v38 = vadd.s32 18, %v9887_v25 }
 0x292   : > { %8175 = vmatmul.mubr.msk.bf16.gmra.mrb[24].mxu0 %vm11279_vm1, %v2899_v50  ;;  %v9851_v54 = vsub.s32 %v9671_v45, %v3387_v31  ;;  %v11317_v45 = vmov 0  ;;  %v9893_v31 = vadd.s32 176, %v9613_v4 }
 0x293   : > { %8178 = vmatprep.mubr.msk.bf16.mxu0 %vm11279_vm1, %v2900_v51  ;;  %v9691_v51 = vadd.s32 18, %v9660_v37 }
 0x294   : > { %v9900_v41 = vadd.s32 18, %v9851_v54 }
 0x295   : > { %v11345_v34 = vsel %vm9699_vm12, %v9691_v51, %v9660_v37 }
 0x296   : > { %vm10061_vm11 = vcmp.lt.s32.totalorder %v11345_v34, 16  ;;  %v11355_v34 = vmov 0 }
 0x29a   : > { %8179 = vmatmul.mubr.msk.bf16.gmra.mrb[28].mxu0 %vm11279_vm1, %v2901_v56  ;;  %v9704_v56 = vadd.s32 18, %v9663_v40 }
 0x29b   : > { %8182 = vmatprep.mubr.msk.bf16.mxu0 %vm11279_vm1, %v2902_v57  ;;  %v3353_v57 = vshrl.u32 %v9657_v36, 4  ;;  %v9820_v36 = vmul.u32.u64.low 3817748708, %v9767_v19  ;;  %v9821_v39 = vmul.u32.u64.high 3817748708, %v9767_v19, %v9820_v36 }
 0x29c   : > { %v11321_v36 = vmov 0  ;;  %v11351_v55 = vsel %vm9707_vm13, %v9704_v56, %v9663_v40  ;;  %v11359_v56 = vsel %vm9784_vm7, %v9738_v7, %v9693_v52  ;;  %v11363_v52 = vmov 0 }
 0x29d   : > { %v3354_v8 = vmul.u32 18, %v3353_v57  ;;  %v3397_v57 = vshrl.u32 %v9758_v16, 4  ;;  %v9880_v16 = vadd.s32 136, %v9613_v4  ;;  %v3463_v49 = vshrl.u32 %v9821_v39, 4 }
 0x29e   : > { %vm10090_vm12 = vcmp.lt.s32.totalorder %v11351_v55, 16  ;;  %vm10115_vm13 = vcmp.lt.s32.totalorder %v11359_v56, 16 }
 0x29f   : > { %v9764_v18 = vsub.s32 %v9644_v27, %v3354_v8  ;;  %v9791_v26 = vmul.u32.u64.low 3817748708, %v9753_v12  ;;  %v9792_v27 = vmul.u32.u64.high 3817748708, %v9753_v12, %v9791_v26 }
 0x2a1   : > { %vm3693_vm15 = vcmp.ne.s32.totalorder %v9764_v18, 0  ;;  %vm3729_vm2 = vcmp.lt.s32.totalorder %v9764_v18, 0  ;;  %v9867_v8 = vadd.s32 18, %v9764_v18  ;;  %v3430_v26 = vshrl.u32 %v9792_v27, 4 }
 0x2a2   : > { %8183 = vmatmul.mubr.msk.bf16.gmra.mrb[32].mxu0 %vm11279_vm1, %v2903_v60  ;;  %v3376_v60 = vmul.u32 18, %v3375_v48  ;;  %v9842_v48 = vadd.s32 152, %v9613_v4  ;;  %vm9870_vm4 = vmand %vm3729_vm2, %vm3693_vm15  ;;  %v3441_v27 = vshrl.u32 %v9825_v33, 4  ;;  %vm3699_vm1 = vcmp.ne.s32.totalorder %v9887_v25, 0 }
 0x2a3   : > { %v11318_v45 = vsel %vm9870_vm4, 4294967295, %v11317_v45  ;;  %vm9906_vm15 = vmand %vm3734_vm5, %vm3698_vm3  ;;  %v3431_v39 = vmul.u32 18, %v3430_v26  ;;  %v9922_v33 = vadd.s32 160, %v9613_v4  ;;  %v3464_v26 = vmul.u32 18, %v3463_v49 }
 0x2a4   : > { %v9742_v9 = vsub.s32 %v3263_v22, %v3376_v60  ;;  %v9774_v21 = vmul.u32.u64.low 3817748708, %v9745_v10  ;;  %v9775_v22 = vmul.u32.u64.high 3817748708, %v9745_v10, %v9774_v21  ;;  %v11320_v44 = vsel %vm9906_vm15, 4294967295, %v11319_v44  ;;  %vm9943_vm3 = vmand %vm3735_vm0, %vm3699_vm1 }
 0x2a5   : > { %v9855_v60 = vmul.u32.u64.low 3817748708, %v9809_v32  ;;  %v9856_v63 = vmul.u32.u64.high 3817748708, %v9809_v32, %v9855_v60  ;;  %v9876_v14 = vmul.u32.u64.low 3817748708, %v9842_v48  ;;  %v9877_v15 = vmul.u32.u64.high 3817748708, %v9842_v48, %v9876_v14 }
 0x2a6   : > { %vm3695_vm6 = vcmp.ne.s32.totalorder %v9742_v9, 0  ;;  %vm3731_vm8 = vcmp.lt.s32.totalorder %v9742_v9, 0  ;;  %v9803_v29 = vadd.s32 18, %v9742_v9  ;;  %v3452_v13 = vshrl.u32 %v9775_v22, 4 }
 0x2a7   : > { %vm9833_vm14 = vmand %vm3731_vm8, %vm3695_vm6  ;;  %v9884_v21 = vadd.s32 18, %v9806_v30  ;;  %vm3696_vm6 = vcmp.ne.s32.totalorder %v9851_v54, 0  ;;  %vm3732_vm8 = vcmp.lt.s32.totalorder %v9851_v54, 0  ;;  %v3398_v22 = vmul.u32 18, %v3397_v57 }
 0x2a8   : > { %v11316_v43 = vsel %vm9833_vm14, 4294967295, %v11315_v43  ;;  %v3453_v53 = vmul.u32 18, %v3452_v13  ;;  %v3496_v57 = vshrl.u32 %v9839_v47, 4  ;;  %vm9915_vm2 = vmand %vm3732_vm8, %vm3696_vm6  ;;  %v3474_v47 = vshrl.u32 %v9856_v63, 4 }
 0x2a9   : > { %v9912_v60 = vmul.u32.u64.low 3817748708, %v9880_v16  ;;  %v9913_v14 = vmul.u32.u64.high 3817748708, %v9880_v16, %v9912_v60  ;;  %v11322_v36 = vsel %vm9915_vm2, 4294967295, %v11321_v36  ;;  %v9925_v13 = vsub.s32 %v9730_v5, %v3398_v22 }
 0x2aa   : > { %v9929_v2 = vmul.u32.u64.low 3817748708, %v9893_v31  ;;  %v9930_v60 = vmul.u32.u64.high 3817748708, %v9893_v31, %v9929_v2  ;;  %v3442_v42 = vmul.u32 18, %v3441_v27  ;;  %v11323_v63 = vmov 0 }
 0x2ab   : > { %v11324_v63 = vsel %vm9943_vm3, 4294967295, %v11323_v63  ;;  %v9948_v2 = vsub.s32 %v9745_v10, %v3453_v53  ;;  %v3497_v22 = vmul.u32 18, %v3496_v57  ;;  %v3507_v0 = vshrl.u32 %v9877_v15, 4 }
 0x2ac   : > { %vm11326_vm5 = vcmask 1041408   ;;  %v9956_v49 = vsub.s32 %v9753_v12, %v3431_v39  ;;  %v9959_v27 = vmul.u32.u64.low 3817748708, %v9922_v33  ;;  %v9960_v5 = vmul.u32.u64.high 3817748708, %v9922_v33, %v9959_v27 }
 0x2ad   : > { %11325 = vst [vmem:[#allocation4_spill] sm:$0xff] %v9948_v2  ;;  %v9953_v6 = vsel %vm11326_vm5, %v9609_v3, 0  ;;  %vm3697_vm0 = vcmp.ne.s32.totalorder %v9925_v13, 0  ;;  %v3475_v10 = vmul.u32 18, %v3474_v47  ;;  %v9965_v53 = vadd.s32 184, %v9613_v4 }
 0x2ae   : > { %11327 = vst [vmem:[#allocation5_spill] sm:$0xff] %v9953_v6  ;;  %v9972_v12 = vadd.s32 18, %v9925_v13  ;;  %v9975_v15 = vsub.s32 %v9767_v19, %v3464_v26  ;;  %v9978_v57 = vsub.s32 %v9770_v20, %v3442_v42  ;;  %v9982_v39 = vsub.s32 %v9778_v23, %v3497_v22 }
 0x2af   : > { %v3508_v47 = vmul.u32 18, %v3507_v0  ;;  %v3485_v27 = vshrl.u32 %v9913_v14, 4  ;;  %vm3738_vm8 = vcmp.lt.s32.totalorder %v9948_v2, 0  ;;  %v9989_v19 = vadd.s32 168, %v9613_v4 }
 0x2b0   : > { %11328 = vst [vmem:[#allocation6_spill] sm:$0xff] %v9982_v39  ;;  %v9992_v20 = vsub.s32 %v9809_v32, %v3475_v10  ;;  %v3540_v42 = vshrl.u32 %v9930_v60, 4  ;;  %v9996_v23 = vmul.u32.u64.low 3817748708, %v9965_v53  ;;  %v9997_v26 = vmul.u32.u64.high 3817748708, %v9965_v53, %v9996_v23 }
 0x2b1   : > { %vm11330_vm6 = vcmp.lt.s32.totalorder %v9925_v13, 0  ;;  %v10008_v14 = vadd.s32 18, %v9948_v2  ;;  %vm3703_vm1 = vcmp.ne.s32.totalorder %v9975_v15, 0  ;;  %vm3739_vm5 = vcmp.lt.s32.totalorder %v9975_v15, 0 }
 0x2b2   : > { %11329 = vst [vmem:[#allocation7_spill] sm:$0xff] %v9992_v20  ;;  %vm10003_vm3 = vmand %vm11330_vm6, %vm3697_vm0  ;;  %vm3701_vm2 = vcmp.ne.s32.totalorder %v9978_v57, 0  ;;  %vm11334_vm15 = vcmp.ne.s32.totalorder %v9948_v2, 0  ;;  %vm3737_vm0 = vcmp.lt.s32.totalorder %v9978_v57, 0  ;;  %vm3706_vm6 = vcmp.ne.s32.totalorder %v9982_v39, 0 }
 0x2b3   : > { %11333 = vst [vmem:[#allocation8_spill] sm:$0xff] %v10008_v14  ;;  %vm10015_vm4 = vmand %vm3738_vm8, %vm11334_vm15  ;;  %v10022_v60 = vsub.s32 %v9842_v48, %v3508_v47  ;;  %v3486_v22 = vmul.u32 18, %v3485_v27  ;;  %vm11337_vm14 = vcmp.ne.s32.totalorder %v9956_v49, 0  ;;  %vm11338_vm10 = vcmp.lt.s32.totalorder %v9956_v49, 0 }
 0x2b4   : > { %vm10028_vm9 = vmand %vm11338_vm10, %vm11337_vm14  ;;  %v11339_v10 = vmov 0  ;;  %v3518_v23 = vshrl.u32 %v9960_v5, 4  ;;  %v10035_v3 = vmul.u32.u64.low 3817748708, %v9989_v19  ;;  %v10036_v1 = vmul.u32.u64.high 3817748708, %v9989_v19, %v10035_v3 }
 0x2b5   : > { %v11340_v10 = vsel %vm10028_vm9, 4294967295, %v11339_v10  ;;  %vm10043_vm8 = vcmp.lt.s32.totalorder %v3834_v61, 16  ;;  %vm10047_vm10 = vmand %vm3739_vm5, %vm3703_vm1  ;;  %v11343_v47 = vmov 0  ;;  %vm3704_vm14 = vcmp.ne.s32.totalorder %v9992_v20, 0 }
 0x2b6   : > { %v11344_v47 = vsel %vm10047_vm10, 4294967295, %v11343_v47  ;;  %v3541_v5 = vmul.u32 18, %v3540_v42  ;;  %v10054_v3 = vadd.s32 208, %v9613_v4  ;;  %v10066_v50 = vadd.s32 18, %v9956_v49  ;;  %vm10075_vm1 = vmand %vm3737_vm0, %vm3701_vm2 }
 0x2b7   : > { %v10069_v61 = vadd.s32 18, %v9975_v15  ;;  %v11348_v27 = vmov 0  ;;  %v10080_v37 = vadd.s32 18, %v9978_v57  ;;  %v10083_v51 = vadd.s32 18, %v9982_v39 }
 0x2b8   : > { %v11349_v27 = vsel %vm10075_vm1, 4294967295, %v11348_v27  ;;  %vm11354_vm2 = vcmp.lt.s32.totalorder %v9982_v39, 0  ;;  %v10103_v6 = vadd.s32 18, %v9992_v20  ;;  %vm3707_vm0 = vcmp.ne.s32.totalorder %v10022_v60, 0 }
 0x2b9   : > { %11350 = vst [vmem:[#allocation9_spill] sm:$0xff] %v10083_v51  ;;  %vm10098_vm5 = vmand %vm11354_vm2, %vm3706_vm6  ;;  %vm3743_vm15 = vcmp.lt.s32.totalorder %v10022_v60, 0  ;;  %v10108_v40 = vsub.s32 %v9880_v16, %v3486_v22  ;;  %vm11362_vm6 = vcmp.lt.s32.totalorder %v9992_v20, 0  ;;  %v10136_v7 = vadd.s32 18, %v10022_v60  ;;  %v10141_v22 = vld [vmem:[%s11276_s3] ss:$0 sm:$0xff] }
 0x2ba   : > { %v11356_v34 = vsel %vm10098_vm5, 4294967295, %v11355_v34  ;;  %11358 = vst [vmem:[#allocation11_spill] sm:$0xff] %v10103_v6  ;;  %vm10131_vm2 = vmand %vm11362_vm6, %vm3704_vm14  ;;  %v3519_v24 = vmul.u32 18, %v3518_v23  ;;  %v10144_v56 = vsub.s32 %v9893_v31, %v3541_v5  ;;  %v3551_v16 = vshrl.u32 %v9997_v26, 4 }
 0x2bb   : > { %11357 = vst [vmem:[#allocation10_spill] sm:$0xff] %v11356_v34  ;;  %v11364_v52 = vsel %vm10131_vm2, 4294967295, %v11363_v52  ;;  %v10148_v55 = vmul.u32.u64.low 3817748708, %v10054_v3  ;;  %v10149_v2 = vmul.u32.u64.high 3817748708, %v10054_v3, %v10148_v55  ;;  %vm10171_vm7 = vmand %vm3743_vm15, %vm3707_vm0  ;;  %v10182_v26 = vadd.s32 192, %v9613_v4 }
 0x2bc   : > { %11365 = vst [vmem:[#allocation12_spill] sm:$0xff] %v11364_v52  ;;  %v10186_v39 = vadd.s32 18, %v10108_v40  ;;  %v10189_v51 = vsub.s32 %v9922_v33, %v3519_v24  ;;  %v3529_v34 = vshrl.u32 %v10036_v1, 4  ;;  %vm11368_vm15 = vnez %v11312_v28 }
 0x2bd   : > { %v11369_v6 = vsel %vm11368_vm15, %v9748_v11, %v9711_v59  ;;  %v3851_v33 = vsel %vm10171_vm7, %v10136_v7, %v10022_v60  ;;  %v3552_v1 = vmul.u32 18, %v3551_v16  ;;  %vm11372_vm14 = vnez %v11314_v35 }
 0x2be   : > { %vm10198_vm0 = vcmp.lt.s32.totalorder %v11369_v6, 16  ;;  %v11373_v59 = vsel %vm11372_vm14, %v9761_v17, %v9717_v62  ;;  %v10219_v11 = vadd.s32 216, %v9613_v4  ;;  %vm11376_vm6 = vnez %v11316_v43 }
 0x2bf   : > { %vm10213_vm15 = vcmp.lt.s32.totalorder %v11373_v59, 16  ;;  %v11377_v35 = vsel %vm11376_vm6, %v9803_v29, %v9742_v9  ;;  %v10232_v62 = vmul.u32.u64.low 3817748708, %v10182_v26  ;;  %v10233_v17 = vmul.u32.u64.high 3817748708, %v10182_v26, %v10232_v62 }
 0x2c0   : > { %vm10227_vm7 = vcmp.lt.s32.totalorder %v11377_v35, 16  ;;  %vm11380_vm14 = vnez %v11318_v45  ;;  %vm11384_vm6 = vcmp.ne.s32.totalorder %v10108_v40, 0  ;;  %vm11385_vm5 = vcmp.lt.s32.totalorder %v10108_v40, 0 }
 0x2c1   : > { %v11381_v43 = vsel %vm11380_vm14, %v9867_v8, %v9764_v18  ;;  %vm10250_vm1 = vmand %vm11385_vm5, %vm11384_vm6  ;;  %v10255_v29 = vadd.s32 18, %v10144_v56  ;;  %v3530_v48 = vmul.u32 18, %v3529_v34  ;;  %vm11389_vm14 = vcmp.ne.s32.totalorder %v10144_v56, 0 }
 0x2c2   : > { %vm10242_vm2 = vcmp.lt.s32.totalorder %v11381_v43, 16  ;;  %vm11390_vm10 = vcmp.lt.s32.totalorder %v10144_v56, 0  ;;  %v10298_v35 = vadd.s32 18, %v10189_v51  ;;  %v10371_v0 = vadd.s32 224, %v9613_v4 }
 0x2c3   : > { %vm10264_vm9 = vmand %vm11390_vm10, %vm11389_vm14  ;;  %v10301_v62 = vsub.s32 %v9989_v19, %v3530_v48 }
 0x2c4   : > { %v3854_v58 = vsel %vm10264_vm9, %v10255_v29, %v10144_v56 }
 0x335   : > { %v8152_v55 = vpop.f32.mrb[0].mxu0 }
 0x336   : > { %v3185_v31 = vadd.f32 %v8152_v55, %v10141_v22  ;;  %v2997_v14 = vpop.f32.mrb[1].mxu0 }
 0x337   : > { %v3183_v23 = vadd.f32 %v10141_v22, %v2997_v14  ;;  %v8153_v20 = vpop.f32.mrb[2].mxu0 }
 0x338   : > { %v3221_v24 = vmax.f32 %v3185_v31, 0.0  ;;  %v3186_v14 = vadd.f32 %v8153_v20, %v10141_v22  ;;  %v3000_v55 = vpop.f32.mrb[3].mxu0 }
 0x339   : > { %v3219_v28 = vmax.f32 %v3183_v23, 0.0  ;;  %v3184_v16 = vadd.f32 %v10141_v22, %v3000_v55  ;;  %v10276_v34 = vmul.u32.u64.low 3817748708, %v10219_v11  ;;  %v10277_v55 = vmul.u32.u64.high 3817748708, %v10219_v11, %v10276_v34 }
 0x33a   : > { %v3978_v31 = vsel %vm10043_vm8, %v3221_v24, 0.0  ;;  %v3222_v59 = vmax.f32 %v3186_v14, 0.0  ;;  %vm11388_vm8 = vcmask 31744   ;;  %v10269_v24 = vsub.s32 %v9965_v53, %v3552_v1 }
 0x33b   : > { %4014 = vst.msk [vmem:[#allocation3 + $0x23] sm:$0xff] %vm11388_vm8, %v3978_v31  ;;  %v3976_v18 = vsel %vm10061_vm11, %v3219_v28, 0.0  ;;  %v3220_v8 = vmax.f32 %v3184_v16, 0.0  ;;  %v3584_v14 = vshrl.u32 %v10149_v2, 4  ;;  %vm11393_vm5 = vmmov %vm11388_vm8  ;;  %v10280_v28 = vadd.s32 200, %v9613_v4 }
 0x33c   : > { %4012 = vst.msk [vmem:[#allocation3 + $0x13] sm:$0xff] %vm11393_vm5, %v3976_v18  ;;  %v3979_v46 = vsel %vm10090_vm12, %v3222_v59, 0.0  ;;  %vm11394_vm10 = vmmov %vm11393_vm5  ;;  %v3849_v2 = vsel %vm10250_vm1, %v10186_v39, %v10108_v40  ;;  %vm3708_vm11 = vcmp.ne.s32.totalorder %v10189_v51, 0  ;;  %vm3744_vm12 = vcmp.lt.s32.totalorder %v10189_v51, 0 }
 0x33d   : > { %4015 = vst.msk [vmem:[#allocation3 + $0x2b] sm:$0xff] %vm11394_vm10, %v3979_v46  ;;  %v3977_v53 = vsel %vm10115_vm13, %v3220_v8, 0.0  ;;  %v8156_v1 = vpop.f32.mrb[4].mxu0  ;;  %vm11395_vm6 = vmmov %vm11393_vm5  ;;  %vm11396_vm13 = vnez %v11320_v44  ;;  %v3585_v8 = vmul.u32 18, %v3584_v14  ;;  %v10315_v46 = vadd.s32 240, %v9613_v4 }
 0x33e   : > { %4013 = vst.msk [vmem:[#allocation3 + $0x1b] sm:$0xff] %vm11395_vm6, %v3977_v53  ;;  %v3189_v42 = vadd.f32 %v8156_v1, %v10141_v22  ;;  %v3013_v16 = vpop.f32.mrb[5].mxu0  ;;  %v11397_v43 = vsel %vm11396_vm13, %v9884_v21, %v9806_v30  ;;  %vm11400_vm5 = vnez %v11322_v36  ;;  %vm11404_vm6 = vnez %v11324_v63 }
 0x33f   : > { %v3187_v31 = vadd.f32 %v10141_v22, %v3013_v16  ;;  %v8157_v59 = vpop.f32.mrb[6].mxu0  ;;  %vm10309_vm8 = vcmp.lt.s32.totalorder %v11397_v43, 16  ;;  %v11401_v44 = vsel %vm11400_vm5, %v9900_v41, %v9851_v54  ;;  %v3562_v54 = vshrl.u32 %v10233_v17, 4 }
 0x340   : > { %v3225_v19 = vmax.f32 %v3189_v42, 0.0  ;;  %v3190_v48 = vadd.f32 %v8157_v59, %v10141_v22  ;;  %v3016_v34 = vpop.f32.mrb[7].mxu0  ;;  %vm10323_vm10 = vcmp.lt.s32.totalorder %v11401_v44, 16  ;;  %v11405_v42 = vsel %vm11404_vm6, %v9937_v38, %v9887_v25  ;;  %vm10358_vm6 = vmand %vm3744_vm12, %vm3708_vm11 }
 0x341   : > { %v10328_v21 = vmul.u32.u64.low 3817748708, %v10280_v28  ;;  %v10329_v53 = vmul.u32.u64.high 3817748708, %v10280_v28, %v10328_v21  ;;  %v3223_v14 = vmax.f32 %v3187_v31, 0.0  ;;  %v3188_v1 = vadd.f32 %v10141_v22, %v3016_v34 }
 0x342   : > { %vm10337_vm13 = vcmp.lt.s32.totalorder %v11405_v42, 16  ;;  %v3982_v41 = vsel %vm10198_vm0, %v3225_v19, 0.0  ;;  %v3226_v16 = vmax.f32 %v3190_v48, 0.0  ;;  %v11408_v63 = vsel %vm10003_vm3, %v9972_v12, %v9925_v13 }
 0x343   : > { %vm10350_vm14 = vcmp.lt.s32.totalorder %v11408_v63, 16  ;;  %v10363_v25 = vadd.s32 18, %v10269_v24  ;;  %vm11413_vm5 = vcmask 31744   ;;  %v3980_v13 = vsel %vm10213_vm15, %v3223_v14, 0.0  ;;  %v4105_v34 = vld [vmem:[#allocation3 + $0x11] sm:$0xff] }
 0x344   : > { %4018 = vst.msk [vmem:[#allocation3 + $0x43] sm:$0xff] %vm11413_vm5, %v3982_v41  ;;  %v3224_v12 = vmax.f32 %v3188_v1, 0.0  ;;  %vm11414_vm11 = vmmov %vm11413_vm5  ;;  %v3983_v52 = vsel %vm10227_vm7, %v3226_v16, 0.0  ;;  %v4108_v17 = vld [vmem:[#allocation3 + $0x29] sm:$0xff]  ;;  %v3595_v59 = vshrl.u32 %v10277_v55, 4  ;;  %v3852_v20 = vsel %vm10358_vm6, %v10298_v35, %v10189_v51 }
 0x345   : > { %4016 = vst.msk [vmem:[#allocation3 + $0x33] sm:$0xff] %vm11414_vm11, %v3980_v13  ;;  %v10378_v43 = vmul.u32.u64.low 3817748708, %v10315_v46  ;;  %v10379_v19 = vmul.u32.u64.high 3817748708, %v10315_v46, %v10378_v43  ;;  %vm11415_vm12 = vmmov %vm11413_vm5  ;;  %v8160_v48 = vpop.f32.mrb[8].mxu0  ;;  %v4106_v44 = vld [vmem:[#allocation3 + $0x19] sm:$0xff]  ;;  %v4107_v21 = vld [vmem:[#allocation3 + $0x21] sm:$0xff]  ;;  %v10389_v55 = vsub.s32 %v10054_v3, %v3585_v8  ;;  %vm11423_vm15 = vnez %v11340_v10 }
 0x346   : > { %4019 = vst.msk [vmem:[#allocation3 + $0x4b] sm:$0xff] %vm11415_vm12, %v3983_v52  ;;  %v3981_v6 = vsel %vm10242_vm2, %v3224_v12, 0.0  ;;  %v3563_v14 = vmul.u32 18, %v3562_v54  ;;  %vm11416_vm7 = vmmov %vm11413_vm5  ;;  %v3193_v1 = vadd.f32 %v8160_v48, %v10141_v22  ;;  %v3029_v42 = vpop.f32.mrb[9].mxu0  ;;  %v4140_v23 = vpack.c.bf16 %v4106_v44, %v4105_v34  ;;  %v11417_v12 = vld [vmem:[#allocation8_spill] sm:$0xff] }
 0x347   : > { %4017 = vst.msk [vmem:[#allocation3 + $0x3b] sm:$0xff] %vm11416_vm7, %v3981_v6  ;;  %v4141_v41 = vpack.c.bf16 %v4108_v17, %v4107_v21  ;;  %v10394_v16 = vadd.s32 248, %v9613_v4  ;;  %v3191_v63 = vadd.f32 %v10141_v22, %v3029_v42  ;;  %v8161_v13 = vpop.f32.mrb[10].mxu0  ;;  %v11418_v52 = vld [vmem:[#allocation4_spill] sm:$0xff]  ;;  %v10407_v54 = vadd.s32 18, %v10301_v62 }
 0x348   : > { %v11419_v3 = vsel %vm10015_vm4, %v11417_v12, %v11418_v52  ;;  %v10410_v17 = vmul.u32.u64.low 3817748708, %v10371_v0  ;;  %v10411_v43 = vmul.u32.u64.high 3817748708, %v10371_v0, %v10410_v17  ;;  %v10416_v6 = vld [vmem:[%s11275_s2 + $0x4] sm:$0x3]  ;;  %v3229_v32 = vmax.f32 %v3193_v1, 0.0  ;;  %v3032_v34 = vpop.f32.mrb[11].mxu0  ;;  %vm11422_vm4 = vmmov %vm11413_vm5 }
 0x349   : > { %vm10402_vm2 = vcmp.lt.s32.totalorder %v11419_v3, 16  ;;  %v3194_v48 = vadd.f32 %v8161_v13, %v10141_v22  ;;  %8189 = vmatmul.mubr.msk.bf16.vlgmr.msra.gmra.mrb[0].mxu1 %vm11422_vm4, %v4140_v23  ;;  %v11424_v44 = vsel %vm11423_vm15, %v10066_v50, %v9956_v49  ;;  %v3596_v42 = vmul.u32 18, %v3595_v59  ;;  %v11427_v3 = vld [vmem:[#allocation5_spill] sm:$0xff]  ;;  %vm11428_vm11 = vmmov %vm11422_vm4 }
 0x34a   : > { %vm10425_vm5 = vcmp.lt.s32.totalorder %v11424_v44, 16  ;;  %v3573_v12 = vshrl.u32 %v10329_v53, 4  ;;  %v3227_v52 = vmax.f32 %v3191_v63, 0.0  ;;  %v3192_v1 = vadd.f32 %v10141_v22, %v3032_v34  ;;  %8225 = vmatpush3.bf16.msra.mxu1 %v11427_v3  ;;  %8192 = vmatprep.mubr.msk.bf16.mxu1 %vm11428_vm11, %v4141_v41 }
 0x34b   : > { %vm11429_vm12 = vnez %v11344_v47  ;;  %vm11433_vm4 = vcmp.ne.s32.totalorder %v10269_v24, 0  ;;  %vm11434_vm15 = vcmp.lt.s32.totalorder %v10269_v24, 0  ;;  %v10452_v53 = vsub.s32 %v10182_v26, %v3563_v14 }
 0x34c   : > { %v11430_v10 = vsel %vm11429_vm12, %v10069_v61, %v9975_v15  ;;  %vm10446_vm3 = vmand %vm11434_vm15, %vm11433_vm4  ;;  %v3986_v15 = vsel %vm10309_vm8, %v3229_v32, 0.0  ;;  %v3230_v47 = vmax.f32 %v3194_v48, 0.0  ;;  %vm11437_vm11 = vnez %v11349_v27  ;;  %v4109_v48 = vld [vmem:[#allocation3 + $0x31] sm:$0xff] }
 0x34d   : > { %vm10438_vm7 = vcmp.lt.s32.totalorder %v11430_v10, 16  ;;  %v11438_v61 = vsel %vm11437_vm11, %v10080_v37, %v9978_v57  ;;  %vm11441_vm4 = vcmp.ne.s32.totalorder %v10301_v62, 0  ;;  %vm11442_vm15 = vcmp.lt.s32.totalorder %v10301_v62, 0  ;;  %v4112_v41 = vld [vmem:[#allocation3 + $0x49] sm:$0xff]  ;;  %v8164_v32 = vpop.f32.mrb[12].mxu0 }
 0x34e   : > { %vm10461_vm12 = vcmp.lt.s32.totalorder %v11438_v61, 16  ;;  %vm10469_vm0 = vmand %vm11442_vm15, %vm11441_vm4  ;;  %v10474_v18 = vmul.u32.u64.low 3817748708, %v10394_v16  ;;  %v10475_v14 = vmul.u32.u64.high 3817748708, %v10394_v16, %v10474_v18  ;;  %vm11445_vm8 = vcmask 1041408   ;;  %v4110_v34 = vld [vmem:[#allocation3 + $0x39] sm:$0xff]  ;;  %v4111_v44 = vld [vmem:[#allocation3 + $0x41] sm:$0xff] }
 0x34f   : > { %9115 = vmatprep.subr.msk.bf16.mxu1 %vm11445_vm8, %v10416_v6  ;;  %vm11446_vm11 = vcmask 31744   ;;  %v3984_v57 = vsel %vm10323_vm10, %v3227_v52, 0.0  ;;  %v3228_v27 = vmax.f32 %v3192_v1, 0.0  ;;  %vm3750_vm6 = vcmp.lt.s32.totalorder %v10389_v55, 0  ;;  %v11453_v61 = vld [vmem:[#allocation6_spill] sm:$0xff] }
 0x350   : > { %4022 = vst.msk [vmem:[#allocation3 + $0x63] sm:$0xff] %vm11446_vm11, %v3986_v15  ;;  %v10484_v37 = vadd.s32 232, %v9613_v4  ;;  %vm11447_vm4 = vmmov %vm11446_vm11  ;;  %v3987_v23 = vsel %vm10337_vm13, %v3230_v47, 0.0  ;;  %v10490_v63 = vadd.s32 18, %v10389_v55  ;;  %v10493_v13 = vsub.s32 %v10219_v11, %v3596_v42  ;;  %v11450_v47 = vld [vmem:[#allocation10_spill] sm:$0xff] }
 0x351   : > { %4020 = vst.msk [vmem:[#allocation3 + $0x53] sm:$0xff] %vm11447_vm4, %v3984_v57  ;;  %v3574_v30 = vmul.u32 18, %v3573_v12  ;;  %vm11448_vm10 = vmmov %vm11447_vm4  ;;  %v3985_v17 = vsel %vm10350_vm14, %v3228_v27, 0.0  ;;  %v3855_v36 = vsel %vm10446_vm3, %v10363_v25, %v10269_v24  ;;  %v3853_v11 = vsel %vm10469_vm0, %v10407_v54, %v10301_v62  ;;  %v3045_v12 = vpop.f32.mrb[13].mxu0 }
 0x352   : > { %4023 = vst.msk [vmem:[#allocation3 + $0x6b] sm:$0xff] %vm11448_vm10, %v3987_v23  ;;  %v3628_v42 = vshrl.u32 %v10379_v19, 4  ;;  %vm11449_vm13 = vmmov %vm11447_vm4  ;;  %v3197_v31 = vadd.f32 %v8164_v32, %v10141_v22  ;;  %v4142_v52 = vpack.c.bf16 %v4110_v34, %v4109_v48  ;;  %v4143_v1 = vpack.c.bf16 %v4112_v41, %v4111_v44  ;;  %v8165_v15 = vpop.f32.mrb[14].mxu0  ;;  %v11452_v19 = vld [vmem:[#allocation9_spill] sm:$0xff]  ;;  %v11457_v34 = vld [vmem:[#allocation12_spill] sm:$0xff] }
 0x353   : > { %4021 = vst.msk [vmem:[#allocation3 + $0x5b] sm:$0xff] %vm11449_vm13, %v3985_v17  ;;  %v10512_v3 = vadd.s32 18, %v10452_v53  ;;  %v3195_v10 = vadd.f32 %v10141_v22, %v3045_v12  ;;  %vm11451_vm8 = vnez %v11450_v47  ;;  %v3606_v27 = vshrl.u32 %v10411_v43, 4  ;;  %v3048_v48 = vpop.f32.mrb[15].mxu0  ;;  %v11459_v44 = vld [vmem:[#allocation11_spill] sm:$0xff]  ;;  %vm11464_vm15 = vmmov %vm11447_vm4 }
 0x354   : > { %v11454_v18 = vsel %vm11451_vm8, %v11452_v19, %v11453_v61  ;;  %v10526_v23 = vmul.u32.u64.low 3817748708, %v10484_v37  ;;  %v10527_v41 = vmul.u32.u64.high 3817748708, %v10484_v37, %v10526_v23  ;;  %v3233_v17 = vmax.f32 %v3197_v31, 0.0  ;;  %8193 = vmatmul.mubr.msk.bf16.gmra.mrb[4].mxu1 %vm11447_vm4, %v4142_v52  ;;  %v11460_v12 = vld [vmem:[#allocation7_spill] sm:$0xff] }
 0x355   : > { %vm10520_vm11 = vcmp.lt.s32.totalorder %v11454_v18, 16  ;;  %v3198_v32 = vadd.f32 %v8165_v15, %v10141_v22  ;;  %vm11458_vm10 = vnez %v11457_v34  ;;  %v10542_v43 = vadd.s32 272, %v9613_v4  ;;  %8196 = vmatprep.mubr.msk.bf16.mxu1 %vm11464_vm15, %v4143_v1  ;;  %v8168_v1 = vpop.f32.mrb[16].mxu0 }
 0x356   : > { %v11461_v47 = vsel %vm11458_vm10, %v11459_v44, %v11460_v12  ;;  %v3231_v31 = vmax.f32 %v3195_v10, 0.0  ;;  %v3196_v15 = vadd.f32 %v10141_v22, %v3048_v48  ;;  %vm10551_vm10 = vcmp.lt.s32.totalorder %v3851_v33, 16  ;;  %v3061_v59 = vpop.f32.mrb[17].mxu0 }
 0x357   : > { %vm10536_vm13 = vcmp.lt.s32.totalorder %v11461_v47, 16  ;;  %v10556_v61 = vsub.s32 %v10280_v28, %v3574_v30  ;;  %v3629_v18 = vmul.u32 18, %v3628_v42  ;;  %v3990_v10 = vsel %vm10402_vm2, %v3233_v17, 0.0  ;;  %v8169_v47 = vpop.f32.mrb[18].mxu0 }
 0x358   : > { %v3234_v23 = vmax.f32 %v3198_v32, 0.0  ;;  %vm10565_vm15 = vcmp.lt.s32.totalorder %v3849_v2, 16  ;;  %vm11470_vm4 = vcmp.ne.s32.totalorder %v10389_v55, 0  ;;  %vm3751_vm2 = vcmp.lt.s32.totalorder %v10493_v13, 0  ;;  %v3064_v45 = vpop.f32.mrb[19].mxu0 }
 0x359   : > { %vm10573_vm8 = vmand %vm3750_vm6, %vm11470_vm4  ;;  %v10579_v7 = vadd.s32 18, %v10493_v13  ;;  %vm11473_vm14 = vcmask 31744   ;;  %v3988_v39 = vsel %vm10425_vm5, %v3231_v31, 0.0  ;;  %v3232_v40 = vmax.f32 %v3196_v15, 0.0  ;;  %v4116_v2 = vld [vmem:[#allocation3 + $0x69] sm:$0xff] }
 0x35a   : > { %4026 = vst.msk [vmem:[#allocation3 + $0x83] sm:$0xff] %vm11473_vm14, %v3990_v10  ;;  %v3607_v33 = vmul.u32 18, %v3606_v27  ;;  %v3639_v9 = vshrl.u32 %v10475_v14, 4  ;;  %vm11474_vm1 = vmmov %vm11473_vm14  ;;  %v3991_v28 = vsel %vm10438_vm7, %v3234_v23, 0.0  ;;  %v10593_v42 = vadd.s32 256, %v9613_v4  ;;  %v4113_v14 = vld [vmem:[#allocation3 + $0x51] sm:$0xff] }
 0x35b   : > { %4024 = vst.msk [vmem:[#allocation3 + $0x73] sm:$0xff] %vm11474_vm1, %v3988_v39  ;;  %v10589_v8 = vmul.u32.u64.low 3817748708, %v10542_v43  ;;  %v10590_v30 = vmul.u32.u64.high 3817748708, %v10542_v43, %v10589_v8  ;;  %vm11475_vm6 = vmmov %vm11474_vm1  ;;  %v3989_v21 = vsel %vm10461_vm12, %v3232_v40, 0.0  ;;  %v4114_v27 = vld [vmem:[#allocation3 + $0x59] sm:$0xff]  ;;  %v4115_v17 = vld [vmem:[#allocation3 + $0x61] sm:$0xff]  ;;  %v3858_v49 = vsel %vm10573_vm8, %v10490_v63, %v10389_v55 }
 0x35c   : > { %4027 = vst.msk [vmem:[#allocation3 + $0x8b] sm:$0xff] %vm11475_vm6, %v3991_v28  ;;  %vm3713_vm5 = vcmp.ne.s32.totalorder %v10556_v61, 0  ;;  %v10604_v32 = vsub.s32 %v10315_v46, %v3629_v18  ;;  %vm11476_vm7 = vmmov %vm11474_vm1  ;;  %v3201_v48 = vadd.f32 %v8168_v1, %v10141_v22  ;;  %v4144_v34 = vpack.c.bf16 %v4114_v27, %v4113_v14 }
 0x35d   : > { %4025 = vst.msk [vmem:[#allocation3 + $0x7b] sm:$0xff] %vm11476_vm7, %v3989_v21  ;;  %v4145_v44 = vpack.c.bf16 %v4116_v2, %v4115_v17  ;;  %v3199_v12 = vadd.f32 %v10141_v22, %v3061_v59  ;;  %vm10615_vm14 = vcmp.lt.s32.totalorder %v3854_v58, 16  ;;  %v10620_v55 = vadd.s32 18, %v10556_v61  ;;  %vm11479_vm8 = vmmov %vm11474_vm1  ;;  %v8172_v40 = vpop.f32.mrb[20].mxu0 }
 0x35e   : > { %v10623_v63 = vsub.s32 %v10371_v0, %v3607_v33  ;;  %v10626_v31 = vadd.s32 280, %v9613_v4  ;;  %v3237_v15 = vmax.f32 %v3201_v48, 0.0  ;;  %v3202_v18 = vadd.f32 %v8169_v47, %v10141_v22  ;;  %8197 = vmatmul.mubr.msk.bf16.gmra.mrb[8].mxu1 %vm11479_vm8, %v4144_v34  ;;  %v3077_v2 = vpop.f32.mrb[21].mxu0 }
 0x35f   : > { %vm10635_vm4 = vcmp.lt.s32.totalorder %v3852_v20, 16  ;;  %v3640_v29 = vmul.u32 18, %v3639_v9  ;;  %v10640_v58 = vadd.s32 264, %v9613_v4  ;;  %v3235_v0 = vmax.f32 %v3199_v12, 0.0  ;;  %8200 = vmatprep.mubr.msk.bf16.mxu1 %vm11474_vm1, %v4145_v44  ;;  %v8173_v14 = vpop.f32.mrb[22].mxu0 }
 0x360   : > { %v3200_v10 = vadd.f32 %v10141_v22, %v3064_v45  ;;  %vm10649_vm6 = vcmp.lt.s32.totalorder %v3855_v36, 16  ;;  %vm11485_vm7 = vcmp.ne.s32.totalorder %v10452_v53, 0  ;;  %vm11486_vm8 = vcmp.lt.s32.totalorder %v10452_v53, 0  ;;  %v3080_v17 = vpop.f32.mrb[23].mxu0 }
 0x361   : > { %vm10657_vm9 = vmand %vm11486_vm8, %vm11485_vm7  ;;  %vm3718_vm12 = vcmp.ne.s32.totalorder %v10604_v32, 0  ;;  %v3617_v35 = vshrl.u32 %v10527_v41, 4  ;;  %v3994_v38 = vsel %vm10520_vm11, %v3237_v15, 0.0  ;;  %v3238_v24 = vmax.f32 %v3202_v18, 0.0 }
 0x362   : > { %vm10670_vm3 = vcmp.lt.s32.totalorder %v3853_v11, 16  ;;  %vm11491_vm1 = vcmp.ne.s32.totalorder %v10493_v13, 0  ;;  %v10683_v50 = vmul.u32.u64.low 3817748708, %v10593_v42  ;;  %v10684_v36 = vmul.u32.u64.high 3817748708, %v10593_v42, %v10683_v50  ;;  %v4117_v33 = vld [vmem:[#allocation3 + $0x71] sm:$0xff] }
 0x363   : > { %vm10678_vm7 = vmand %vm3751_vm2, %vm11491_vm1  ;;  %vm11494_vm11 = vcmask 31744   ;;  %v3992_v62 = vsel %vm10536_vm13, %v3235_v0, 0.0  ;;  %v3236_v54 = vmax.f32 %v3200_v10, 0.0  ;;  %v3995_v57 = vsel %vm10551_vm10, %v3238_v24, 0.0  ;;  %v4120_v41 = vld [vmem:[#allocation3 + $0x89] sm:$0xff] }
 0x364   : > { %4030 = vst.msk [vmem:[#allocation3 + $0xa3] sm:$0xff] %vm11494_vm11, %v3994_v38  ;;  %v10690_v26 = vmul.u32.u64.low 3817748708, %v10626_v31  ;;  %v10691_v11 = vmul.u32.u64.high 3817748708, %v10626_v31, %v10690_v26  ;;  %vm11495_vm0 = vmmov %vm11494_vm11  ;;  %v10697_v23 = vsub.s32 %v10394_v16, %v3640_v29  ;;  %v4118_v9 = vld [vmem:[#allocation3 + $0x79] sm:$0xff]  ;;  %v4119_v28 = vld [vmem:[#allocation3 + $0x81] sm:$0xff]  ;;  %v3856_v52 = vsel %vm10657_vm9, %v10512_v3, %v10452_v53 }
 0x365   : > { %4028 = vst.msk [vmem:[#allocation3 + $0x93] sm:$0xff] %vm11495_vm0, %v3992_v62  ;;  %v10700_v60 = vmul.u32.u64.low 3817748708, %v10640_v58  ;;  %v10701_v39 = vmul.u32.u64.high 3817748708, %v10640_v58, %v10700_v60  ;;  %vm11496_vm2 = vmmov %vm11495_vm0  ;;  %v3993_v19 = vsel %vm10565_vm15, %v3236_v54, 0.0  ;;  %v3859_v16 = vsel %vm10678_vm7, %v10579_v7, %v10493_v13 }
 0x366   : > { %4031 = vst.msk [vmem:[#allocation3 + $0xab] sm:$0xff] %vm11496_vm2, %v3995_v57  ;;  %vm3754_vm13 = vcmp.lt.s32.totalorder %v10604_v32, 0  ;;  %vm11497_vm10 = vmmov %vm11495_vm0  ;;  %v3205_v5 = vadd.f32 %v8172_v40, %v10141_v22  ;;  %v4146_v8 = vpack.c.bf16 %v4118_v9, %v4117_v33  ;;  %v4147_v21 = vpack.c.bf16 %v4120_v41, %v4119_v28 }
 0x367   : > { %4029 = vst.msk [vmem:[#allocation3 + $0x9b] sm:$0xff] %vm11497_vm10, %v3993_v19  ;;  %vm3716_vm15 = vcmp.ne.s32.totalorder %v10623_v63, 0  ;;  %v3203_v1 = vadd.f32 %v10141_v22, %v3077_v2  ;;  %vm10719_vm8 = vcmp.lt.s32.totalorder %v3858_v49, 16  ;;  %v3618_v13 = vmul.u32 18, %v3617_v35  ;;  %vm11500_vm1 = vmmov %vm11495_vm0 }
 0x368   : > { %v3672_v3 = vshrl.u32 %v10590_v30, 4  ;;  %v3241_v7 = vmax.f32 %v3205_v5, 0.0  ;;  %v3206_v27 = vadd.f32 %v8173_v14, %v10141_v22  ;;  %8201 = vmatmul.mubr.msk.bf16.gmra.mrb[12].mxu1 %vm11500_vm1, %v4146_v8  ;;  %vm10727_vm7 = vcmp.lt.s32.totalorder %v3856_v52, 16  ;;  %vm10747_vm9 = vmand %vm3754_vm13, %vm3718_vm12 }
 0x369   : > { %vm11503_vm11 = vcmp.lt.s32.totalorder %v10556_v61, 0  ;;  %vm3719_vm2 = vcmp.ne.s32.totalorder %v10697_v23, 0  ;;  %vm3755_vm10 = vcmp.lt.s32.totalorder %v10697_v23, 0  ;;  %v3239_v30 = vmax.f32 %v3203_v1, 0.0  ;;  %8204 = vmatprep.mubr.msk.bf16.mxu1 %vm11500_vm1, %v4147_v21  ;;  %vm11513_vm13 = vmmov %vm11500_vm1 }
 0x36a   : > { %vm10735_vm0 = vmand %vm11503_vm11, %vm3713_vm5  ;;  %v3204_v59 = vadd.f32 %v10141_v22, %v3080_v17  ;;  %v3826_v44 = vadd.s32 18, %v10604_v32  ;;  %v3824_v12 = vadd.s32 18, %v10623_v63  ;;  %v3998_v47 = vsel %vm10615_vm14, %v3241_v7, 0.0 }
 0x36b   : > { %v3242_v15 = vmax.f32 %v3206_v27, 0.0  ;;  %vm10755_vm5 = vcmp.lt.s32.totalorder %v3859_v16, 16  ;;  %vm11510_vm11 = vcmp.lt.s32.totalorder %v10623_v63, 0  ;;  %v3827_v29 = vadd.s32 18, %v10697_v23  ;;  %4034 = vst.msk [vmem:[#allocation3 + $0xc3] sm:$0xff] %vm11513_vm13, %v3998_v47  ;;  %vm10775_vm14 = vmand %vm3755_vm10, %vm3719_vm2 }
 0x36c   : > { %vm10763_vm12 = vmand %vm11510_vm11, %vm3716_vm15  ;;  %v3996_v46 = vsel %vm10635_vm4, %v3239_v30, 0.0  ;;  %v3240_v0 = vmax.f32 %v3204_v59, 0.0  ;;  %v10780_v4 = vsub.s32 %v10484_v37, %v3618_v13  ;;  %v3650_v35 = vshrl.u32 %v10684_v36, 4  ;;  %v8176_v36 = vpop.f32.mrb[24].mxu0  ;;  %v4121_v62 = vld [vmem:[#allocation3 + $0x91] sm:$0xff] }
 0x36d   : > { %vm11516_vm15 = vmmov %vm11500_vm1  ;;  %v3999_v56 = vsel %vm10649_vm6, %v3242_v15, 0.0  ;;  %v3857_v38 = vsel %vm10735_vm0, %v10620_v55, %v10556_v61  ;;  %v4124_v24 = vld [vmem:[#allocation3 + $0xa9] sm:$0xff]  ;;  %v3673_v20 = vmul.u32 18, %v3672_v3  ;;  %v3683_v50 = vshrl.u32 %v10691_v11, 4  ;;  %v3093_v25 = vpop.f32.mrb[25].mxu0 }
 0x36e   : > { %4032 = vst.msk [vmem:[#allocation3 + $0xb3] sm:$0xff] %vm11516_vm15, %v3996_v46  ;;  %vm11517_vm4 = vmmov %vm11500_vm1  ;;  %v3997_v37 = vsel %vm10670_vm3, %v3240_v0, 0.0  ;;  %v4122_v54 = vld [vmem:[#allocation3 + $0x99] sm:$0xff]  ;;  %v4123_v26 = vld [vmem:[#allocation3 + $0xa1] sm:$0xff]  ;;  %v3862_v51 = vsel %vm10747_vm9, %v3826_v44, %v10604_v32  ;;  %v3860_v61 = vsel %vm10763_vm12, %v3824_v12, %v10623_v63  ;;  %v3661_v55 = vshrl.u32 %v10701_v39, 4  ;;  %v8177_v32 = vpop.f32.mrb[26].mxu0 }
 0x36f   : > { %4035 = vst.msk [vmem:[#allocation3 + $0xcb] sm:$0xff] %vm11517_vm4, %v3999_v56  ;;  %vm11518_vm6 = vmmov %vm11500_vm1  ;;  %v3209_v11 = vadd.f32 %v8176_v36, %v10141_v22  ;;  %v4148_v57 = vpack.c.bf16 %v4122_v54, %v4121_v62  ;;  %v4149_v41 = vpack.c.bf16 %v4124_v24, %v4123_v26  ;;  %v3863_v60 = vsel %vm10775_vm14, %v3827_v29, %v10697_v23  ;;  %v3096_v33 = vpop.f32.mrb[27].mxu0  ;;  %v4059_v56 = vld [vmem:[#allocation3 + $0x58] sm:$0xff]  ;;  %v4064_v62 = vld [vmem:[#allocation3 + $0x80] sm:$0xff] }
 0x370   : > { %4033 = vst.msk [vmem:[#allocation3 + $0xbb] sm:$0xff] %vm11518_vm6, %v3997_v37  ;;  %v3207_v19 = vadd.f32 %v10141_v22, %v3093_v25  ;;  %vm3717_vm3 = vcmp.ne.s32.totalorder %v10780_v4, 0  ;;  %vm3753_vm9 = vcmp.lt.s32.totalorder %v10780_v4, 0  ;;  %v3651_v63 = vmul.u32 18, %v3650_v35  ;;  %vm11519_vm0 = vmmov %vm11500_vm1 }
 0x371   : > { %v3245_v39 = vmax.f32 %v3209_v11, 0.0  ;;  %v3210_v40 = vadd.f32 %v8177_v32, %v10141_v22  ;;  %8205 = vmatmul.mubr.msk.bf16.gmra.mrb[16].mxu1 %vm11519_vm0, %v4148_v57  ;;  %v10812_v9 = vsub.s32 %v10542_v43, %v3673_v20  ;;  %v3684_v28 = vmul.u32 18, %v3683_v50  ;;  %vm11520_vm2 = vmmov %vm11519_vm0  ;;  %v4058_v20 = vld [vmem:[#allocation3 + $0x50] sm:$0xff] }
 0x372   : > { %v3243_v52 = vmax.f32 %v3207_v19, 0.0  ;;  %v3208_v23 = vadd.f32 %v10141_v22, %v3096_v33  ;;  %8208 = vmatprep.mubr.msk.bf16.mxu1 %vm11520_vm2, %v4149_v41  ;;  %v3825_v16 = vadd.s32 18, %v10780_v4  ;;  %v3662_v5 = vmul.u32 18, %v3661_v55  ;;  %vm10827_vm11 = vmand %vm3753_vm9, %vm3717_vm3 }
 0x373   : > { %v4002_v2 = vsel %vm10719_vm8, %v3245_v39, 0.0  ;;  %v3246_v8 = vmax.f32 %v3210_v40, 0.0  ;;  %vm3893_vm10 = vcmp.lt.s32.totalorder %v3857_v38, 16  ;;  %vm10819_vm1 = vcmp.lt.s32.totalorder %v3862_v51, 16  ;;  %vm11525_vm12 = vmmov %vm11519_vm0 }
 0x374   : > { %4038 = vst.msk [vmem:[#allocation3 + $0xe3] sm:$0xff] %vm11525_vm12, %v4002_v2  ;;  %v4000_v1 = vsel %vm10727_vm7, %v3243_v52, 0.0  ;;  %v3244_v14 = vmax.f32 %v3208_v23, 0.0  ;;  %vm10834_vm8 = vcmp.lt.s32.totalorder %v3860_v61, 16  ;;  %v10839_v13 = vsub.s32 %v10593_v42, %v3651_v63  ;;  %vm11528_vm13 = vmmov %vm11519_vm0  ;;  %v8180_v42 = vpop.f32.mrb[28].mxu0 }
 0x375   : > { %4036 = vst.msk [vmem:[#allocation3 + $0xd3] sm:$0xff] %vm11528_vm13, %v4000_v1  ;;  %v4003_v3 = vsel %vm10755_vm5, %v3246_v8, 0.0  ;;  %vm10844_vm14 = vcmp.lt.s32.totalorder %v3863_v60, 16  ;;  %vm3722_vm7 = vcmp.ne.s32.totalorder %v10812_v9, 0  ;;  %v10850_v17 = vsub.s32 %v10626_v31, %v3684_v28  ;;  %vm11531_vm15 = vmmov %vm11519_vm0  ;;  %v4125_v30 = vld [vmem:[#allocation3 + $0xb1] sm:$0xff]  ;;  %v3109_v12 = vpop.f32.mrb[29].mxu0 }
 0x376   : > { %v4128_v27 = vld [vmem:[#allocation3 + $0xc9] sm:$0xff]  ;;  %4039 = vst.msk [vmem:[#allocation3 + $0xeb] sm:$0xff] %vm11531_vm15, %v4003_v3  ;;  %v4001_v48 = vsel %vm3893_vm10, %v3244_v14, 0.0  ;;  %v3861_v49 = vsel %vm10827_vm11, %v3825_v16, %v10780_v4  ;;  %vm3758_vm5 = vcmp.lt.s32.totalorder %v10812_v9, 0  ;;  %v10858_v44 = vsub.s32 %v10640_v58, %v3662_v5  ;;  %vm11532_vm4 = vmmov %vm11519_vm0  ;;  %v8181_v29 = vpop.f32.mrb[30].mxu0 }
 0x377   : > { %v4126_v59 = vld [vmem:[#allocation3 + $0xb9] sm:$0xff]  ;;  %v4127_v34 = vld [vmem:[#allocation3 + $0xc1] sm:$0xff]  ;;  %4037 = vst.msk [vmem:[#allocation3 + $0xdb] sm:$0xff] %vm11532_vm4, %v4001_v48  ;;  %v3213_v31 = vadd.f32 %v8180_v42, %v10141_v22  ;;  %v3830_v18 = vadd.s32 18, %v10812_v9  ;;  %v3211_v45 = vadd.f32 %v10141_v22, %v3109_v12  ;;  %vm3720_vm6 = vcmp.ne.s32.totalorder %v10839_v13, 0  ;;  %v3112_v10 = vpop.f32.mrb[31].mxu0  ;;  %vm11533_vm9 = vmmov %vm11519_vm0 }
 0x378   : > { %v4150_v47 = vpack.c.bf16 %v4126_v59, %v4125_v30  ;;  %v4151_v15 = vpack.c.bf16 %v4128_v27, %v4127_v34  ;;  %vm3756_vm3 = vcmp.lt.s32.totalorder %v10839_v13, 0  ;;  %v3828_v46 = vadd.s32 18, %v10839_v13  ;;  %vm11534_vm10 = vmmov %vm11532_vm4  ;;  %v8184_v25 = vpop.f32.mrb[32].mxu0  ;;  %v4048_v42 = vld [vmem:[#allocation3] sm:$0xff] }
 0x379   : > { %v3249_v58 = vmax.f32 %v3213_v31, 0.0  ;;  %v3214_v0 = vadd.f32 %v8181_v29, %v10141_v22  ;;  %vm3723_vm0 = vcmp.ne.s32.totalorder %v10850_v17, 0  ;;  %vm3759_vm2 = vcmp.lt.s32.totalorder %v10850_v17, 0  ;;  %vm10877_vm11 = vmand %vm3758_vm5, %vm3722_vm7  ;;  %v3125_v63 = vpop.f32.mrb[33].mxu0  ;;  %v4051_v31 = vld [vmem:[#allocation3 + $0x18] sm:$0xff]  ;;  %v4052_v12 = vld [vmem:[#allocation3 + $0x20] sm:$0xff] }
 0x37a   : > { %8209 = vmatmul.mubr.msk.bf16.gmra.mrb[20].mxu1 %vm11533_vm9, %v4150_v47  ;;  %v3247_v4 = vmax.f32 %v3211_v45, 0.0  ;;  %v3212_v35 = vadd.f32 %v10141_v22, %v3112_v10  ;;  %vm3721_vm12 = vcmp.ne.s32.totalorder %v10858_v44, 0  ;;  %vm3757_vm13 = vcmp.lt.s32.totalorder %v10858_v44, 0  ;;  %vm10889_vm4 = vmand %vm3756_vm3, %vm3720_vm6  ;;  %v8185_v28 = vpop.f32.mrb[34].mxu0  ;;  %v4053_v47 = vld [vmem:[#allocation3 + $0x28] sm:$0xff] }
 0x37b   : > { %8212 = vmatprep.mubr.msk.bf16.mxu1 %vm11534_vm10, %v4151_v15  ;;  %v4006_v38 = vsel %vm10819_vm1, %v3249_v58, 0.0  ;;  %v3250_v24 = vmax.f32 %v3214_v0, 0.0  ;;  %vm3897_vm15 = vcmp.lt.s32.totalorder %v3861_v49, 16  ;;  %v3831_v50 = vadd.s32 18, %v10850_v17  ;;  %vm11539_vm7 = vmmov %vm11533_vm9  ;;  %v3128_v5 = vpop.f32.mrb[35].mxu0  ;;  %v4049_v49 = vld [vmem:[#allocation3 + $0x8] sm:$0xff] }
 0x37c   : > { %4042 = vst.msk [vmem:[#allocation3 + $0x103] sm:$0xff] %vm11539_vm7, %v4006_v38  ;;  %v4004_v37 = vsel %vm10834_vm8, %v3247_v4, 0.0  ;;  %v3248_v36 = vmax.f32 %v3212_v35, 0.0  ;;  %vm10901_vm1 = vmand %vm3759_vm2, %vm3723_vm0  ;;  %v3829_v54 = vadd.s32 18, %v10858_v44  ;;  %v3866_v51 = vsel %vm10877_vm11, %v3830_v18, %v10812_v9  ;;  %v4129_v41 = vld [vmem:[#allocation3 + $0xd1] sm:$0xff]  ;;  %v4056_v0 = vld [vmem:[#allocation3 + $0x40] sm:$0xff] }
 0x37d   : > { %vm11542_vm5 = vmmov %vm11539_vm7  ;;  %v4007_v26 = vsel %vm10844_vm14, %v3250_v24, 0.0  ;;  %v4132_v55 = vld [vmem:[#allocation3 + $0xe9] sm:$0xff]  ;;  %v3864_v57 = vsel %vm10889_vm4, %v3828_v46, %v10839_v13  ;;  %v3217_v32 = vadd.f32 %v8184_v25, %v10141_v22  ;;  %v3867_v39 = vsel %vm10901_vm1, %v3831_v50, %v10850_v17  ;;  %v10948_v46 = vld [vmem:[%s11275_s2 + $0x6] sm:$0x3] }
 0x37e   : > { %4040 = vst.msk [vmem:[#allocation3 + $0xf3] sm:$0xff] %vm11542_vm5, %v4004_v37  ;;  %vm10914_vm8 = vmand %vm3757_vm13, %vm3721_vm12  ;;  %v4005_v11 = vsel %vm3897_vm15, %v3248_v36, 0.0  ;;  %v4130_v60 = vld [vmem:[#allocation3 + $0xd9] sm:$0xff]  ;;  %v4131_v19 = vld [vmem:[#allocation3 + $0xe1] sm:$0xff]  ;;  %vm3902_vm3 = vcmp.lt.s32.totalorder %v3866_v51, 16  ;;  %v3215_v9 = vadd.f32 %v10141_v22, %v3125_v63  ;;  %vm3900_vm9 = vcmp.lt.s32.totalorder %v3864_v57, 16 }
 0x37f   : > { %vm11545_vm6 = vmmov %vm11542_vm5  ;;  %v4152_v40 = vpack.c.bf16 %v4130_v60, %v4129_v41  ;;  %v4153_v33 = vpack.c.bf16 %v4132_v55, %v4131_v19  ;;  %v3865_v52 = vsel %vm10914_vm8, %v3829_v54, %v10858_v44  ;;  %v3253_v23 = vmax.f32 %v3217_v32, 0.0  ;;  %v4050_v15 = vld [vmem:[#allocation3 + $0x10] sm:$0xff]  ;;  %v4055_v58 = vld [vmem:[#allocation3 + $0x38] sm:$0xff] }
 0x380   : > { %4043 = vst.msk [vmem:[#allocation3 + $0x10b] sm:$0xff] %vm11545_vm6, %v4007_v26  ;;  %vm11546_vm14 = vmmov %vm11542_vm5  ;;  %v3218_v16 = vadd.f32 %v8185_v28, %v10141_v22  ;;  %v3251_v2 = vmax.f32 %v3215_v9, 0.0  ;;  %vm3903_vm2 = vcmp.lt.s32.totalorder %v3867_v39, 16  ;;  %v3216_v8 = vadd.f32 %v10141_v22, %v3128_v5  ;;  %v4057_v10 = vld [vmem:[#allocation3 + $0x48] sm:$0xff]  ;;  %v4054_v4 = vld [vmem:[#allocation3 + $0x30] sm:$0xff] }
 0x381   : > { %4041 = vst.msk [vmem:[#allocation3 + $0xfb] sm:$0xff] %vm11546_vm14, %v4005_v11  ;;  %vm11547_vm0 = vmmov %vm11542_vm5  ;;  %v4010_v21 = vsel %vm3902_vm3, %v3253_v23, 0.0  ;;  %vm3901_vm11 = vcmp.lt.s32.totalorder %v3865_v52, 16  ;;  %v4084_v34 = vpack.c.bf16 %v4049_v49, %v4048_v42  ;;  %v4085_v18 = vpack.c.bf16 %v4051_v31, %v4050_v15  ;;  %v4060_v38 = vld [vmem:[#allocation3 + $0x60] sm:$0xff]  ;;  %v4061_v24 = vld [vmem:[#allocation3 + $0x68] sm:$0xff] }
 0x382   : > { %8213 = vmatmul.mubr.msk.bf16.gmra.mrb[24].mxu1 %vm11547_vm0, %v4152_v40  ;;  %vm11548_vm10 = vmmov %vm11547_vm0  ;;  %v3254_v43 = vmax.f32 %v3218_v16, 0.0  ;;  %v4008_v1 = vsel %vm3900_vm9, %v3251_v2, 0.0  ;;  %v3252_v14 = vmax.f32 %v3216_v8, 0.0  ;;  %vm11557_vm6 = vcmask 1041408   ;;  %v4063_v36 = vld [vmem:[#allocation3 + $0x78] sm:$0xff]  ;;  %v4065_v54 = vld [vmem:[#allocation3 + $0x88] sm:$0xff] }
 0x383   : > { %8216 = vmatprep.mubr.msk.bf16.mxu1 %vm11548_vm10, %v4153_v33  ;;  %vm11549_vm12 = vmmov %vm11547_vm0  ;;  %v4738_v45 = vsel %vm11557_vm6, %v10416_v6, 0  ;;  %v4086_v29 = vpack.c.bf16 %v4053_v47, %v4052_v12  ;;  %v4087_v35 = vpack.c.bf16 %v4055_v58, %v4054_v4  ;;  %v4088_v6 = vpack.c.bf16 %v4057_v10, %v4056_v0  ;;  %v4062_v26 = vld [vmem:[#allocation3 + $0x70] sm:$0xff]  ;;  %v4067_v55 = vld [vmem:[#allocation3 + $0x98] sm:$0xff] }
 0x384   : > { %4046 = vst.msk [vmem:[#allocation3 + $0x123] sm:$0xff] %vm11549_vm12, %v4010_v21  ;;  %vm11550_vm13 = vmmov %vm11547_vm0  ;;  %v4011_v53 = vsel %vm3903_vm2, %v3254_v43, 0.0  ;;  %v4009_v3 = vsel %vm3901_vm11, %v3252_v14, 0.0  ;;  %v4089_v50 = vpack.c.bf16 %v4059_v56, %v4058_v20  ;;  %v4090_v37 = vpack.c.bf16 %v4061_v24, %v4060_v38  ;;  %v4068_v11 = vld [vmem:[#allocation3 + $0xa0] sm:$0xff]  ;;  %v4069_v25 = vld [vmem:[#allocation3 + $0xa8] sm:$0xff] }
 0x385   : > { %4044 = vst.msk [vmem:[#allocation3 + $0x113] sm:$0xff] %vm11550_vm13, %v4008_v1  ;;  %vm11551_vm15 = vmmov %vm11547_vm0  ;;  %v4133_v7 = vld [vmem:[#allocation3 + $0xf1] sm:$0xff]  ;;  %v4091_v51 = vpack.c.bf16 %v4063_v36, %v4062_v26  ;;  %v4092_v61 = vpack.c.bf16 %v4065_v54, %v4064_v62  ;;  %v4094_v60 = vpack.c.bf16 %v4069_v25, %v4068_v11  ;;  %v4072_v32 = vld [vmem:[#allocation3 + $0xc0] sm:$0xff] }
 0x386   : > { %4047 = vst.msk [vmem:[#allocation3 + $0x12b] sm:$0xff] %vm11551_vm15, %v4011_v53  ;;  %vm11552_vm4 = vmmov %vm11547_vm0  ;;  %v4066_v57 = vld [vmem:[#allocation3 + $0x90] sm:$0xff]  ;;  %v4071_v19 = vld [vmem:[#allocation3 + $0xb8] sm:$0xff] }
 0x387   : > { %v4136_v13 = vld [vmem:[#allocation3 + $0x109] sm:$0xff]  ;;  %4045 = vst.msk [vmem:[#allocation3 + $0x11b] sm:$0xff] %vm11552_vm4, %v4009_v3  ;;  %vm11553_vm7 = vmmov %vm11547_vm0  ;;  %v4093_v41 = vpack.c.bf16 %v4067_v55, %v4066_v57  ;;  %v4075_v9 = vld [vmem:[#allocation3 + $0xd8] sm:$0xff] }
 0x388   : > { %v4134_v27 = vld [vmem:[#allocation3 + $0xf9] sm:$0xff]  ;;  %v4135_v17 = vld [vmem:[#allocation3 + $0x101] sm:$0xff]  ;;  %vm11554_vm1 = vmmov %vm11547_vm0 }
 0x389   : > { %v4154_v22 = vpack.c.bf16 %v4134_v27, %v4133_v7  ;;  %v4155_v48 = vpack.c.bf16 %v4136_v13, %v4135_v17  ;;  %vm11555_vm5 = vmmov %vm11547_vm0  ;;  %v4073_v63 = vld [vmem:[#allocation3 + $0xc8] sm:$0xff]  ;;  %v4070_v39 = vld [vmem:[#allocation3 + $0xb0] sm:$0xff] }
 0x38a   : > { %vm11556_vm8 = vmmov %vm11547_vm0  ;;  %v4095_v40 = vpack.c.bf16 %v4071_v19, %v4070_v39  ;;  %v4096_v33 = vpack.c.bf16 %v4073_v63, %v4072_v32  ;;  %v4076_v28 = vld [vmem:[#allocation3 + $0xe0] sm:$0xff]  ;;  %v4077_v52 = vld [vmem:[#allocation3 + $0xe8] sm:$0xff] }
 0x38b   : > { %8217 = vmatmul.mubr.msk.bf16.gmra.mrb[28].mxu1 %vm11553_vm7, %v4154_v22  ;;  %vm11558_vm14 = vmmov %vm11547_vm0  ;;  %v4074_v23 = vld [vmem:[#allocation3 + $0xd0] sm:$0xff]  ;;  %v4098_v5 = vpack.c.bf16 %v4077_v52, %v4076_v28  ;;  %v4079_v2 = vld [vmem:[#allocation3 + $0xf8] sm:$0xff] }
 0x38c   : > { %8220 = vmatprep.mubr.msk.bf16.mxu1 %vm11554_vm1, %v4155_v48  ;;  %v4137_v30 = vld [vmem:[#allocation3 + $0x111] sm:$0xff]  ;;  %vm11559_vm3 = vmmov %vm11547_vm0  ;;  %v4097_v16 = vpack.c.bf16 %v4075_v9, %v4074_v23  ;;  %v4080_v8 = vld [vmem:[#allocation3 + $0x100] sm:$0xff] }
 0x38d   : > { %vm11560_vm9 = vmmov %vm11557_vm6  ;;  %v4081_v21 = vld [vmem:[#allocation3 + $0x108] sm:$0xff]  ;;  %v4078_v43 = vld [vmem:[#allocation3 + $0xf0] sm:$0xff] }
 0x38e   : > { %v4138_v59 = vld [vmem:[#allocation3 + $0x119] sm:$0xff]  ;;  %vm11561_vm2 = vmmov %vm11547_vm0  ;;  %v4099_v1 = vpack.c.bf16 %v4079_v2, %v4078_v43  ;;  %v4100_v14 = vpack.c.bf16 %v4081_v21, %v4080_v8  ;;  %v4627_v53 = vld [vmem:[#allocation3 + $0x2] sm:$0xff] }
 0x38f   : > { %v4156_v44 = vpack.c.bf16 %v4138_v59, %v4137_v30  ;;  %vm11562_vm10 = vmmov %vm11547_vm0  ;;  %v4628_v13 = vld [vmem:[#allocation3 + $0xa] sm:$0xff]  ;;  %v4083_v3 = vld [vmem:[#allocation3 + $0x118] sm:$0xff] }
 0x390   : > { %vm11563_vm11 = vmmov %vm11547_vm0  ;;  %v4082_v7 = vld [vmem:[#allocation3 + $0x110] sm:$0xff]  ;;  %v4663_v27 = vpack.c.bf16 %v4628_v13, %v4627_v53  ;;  %v4630_v22 = vld [vmem:[#allocation3 + $0x1a] sm:$0xff] }
 0x391   : > { %vm11564_vm12 = vmmov %vm11547_vm0  ;;  %v4101_v17 = vpack.c.bf16 %v4083_v3, %v4082_v7  ;;  %v4631_v48 = vld [vmem:[#allocation3 + $0x22] sm:$0xff]  ;;  %v4632_v42 = vld [vmem:[#allocation3 + $0x2a] sm:$0xff] }
 0x392   : > { %vm11565_vm13 = vmmov %vm11547_vm0  ;;  %v4629_v49 = vld [vmem:[#allocation3 + $0x12] sm:$0xff]  ;;  %v4634_v31 = vld [vmem:[#allocation3 + $0x3a] sm:$0xff] }
 0x393   : > { %8221 = vmatmul.mubr.msk.bf16.gmra.mrb[32].mxu1 %vm11555_vm5, %v4156_v44  ;;  %vm11566_vm15 = vmmov %vm11547_vm0  ;;  %v10970_v30 = vpack.c.bf16 %v4630_v22, %v4629_v49  ;;  %v10979_v44 = vld [vmem:[%s11275_s2 + $0x8] sm:$0x3]  ;;  %v4635_v12 = vld [vmem:[#allocation3 + $0x42] sm:$0xff] }
 0x394   : > { %8226 = vmatprep.mubr.msk.bf16.mxu1 %vm11556_vm8, %v4084_v34  ;;  %vm11567_vm4 = vmmov %vm11547_vm0  ;;  %v10974_v34 = vpack.c.bf16 %v4632_v42, %v4631_v48  ;;  %v4636_v47 = vld [vmem:[#allocation3 + $0x4a] sm:$0xff]  ;;  %v4633_v15 = vld [vmem:[#allocation3 + $0x32] sm:$0xff] }
 0x395   : > { %vm11568_vm7 = vmmov %vm11547_vm0  ;;  %v4640_v58 = vld [vmem:[#allocation3 + $0x6a] sm:$0xff]  ;;  %v4637_v0 = vld [vmem:[#allocation3 + $0x52] sm:$0xff] }
 0x396   : > { %vm11569_vm1 = vmmov %vm11547_vm0  ;;  %v4644_v56 = vld [vmem:[#allocation3 + $0x8a] sm:$0xff]  ;;  %v4641_v38 = vld [vmem:[#allocation3 + $0x72] sm:$0xff] }
 0x397   : > { %vm11570_vm5 = vmmov %vm11547_vm0  ;;  %v4648_v36 = vld [vmem:[#allocation3 + $0xaa] sm:$0xff]  ;;  %v4645_v62 = vld [vmem:[#allocation3 + $0x92] sm:$0xff] }
 0x398   : > { %vm11571_vm8 = vmmov %vm11547_vm0  ;;  %v4652_v55 = vld [vmem:[#allocation3 + $0xca] sm:$0xff]  ;;  %v4649_v11 = vld [vmem:[#allocation3 + $0xb2] sm:$0xff] }
 0x399   : > { %vm11572_vm6 = vmmov %vm11547_vm0  ;;  %v4656_v19 = vld [vmem:[#allocation3 + $0xea] sm:$0xff]  ;;  %v4653_v32 = vld [vmem:[#allocation3 + $0xd2] sm:$0xff] }
 0x39a   : > { %v4660_v9 = vld [vmem:[#allocation3 + $0x10a] sm:$0xff]  ;;  %v4657_v28 = vld [vmem:[#allocation3 + $0xf2] sm:$0xff]  ;;  %v7423_v21 = vld [vmem:[%s11275_s2 + $0xa] sm:$0x3] }
 0x39b   : > { %8227 = vmatmul.mubr.msk.bf16.vlgmr.msra.gmra.mrb[0].mxu1 %vm11558_vm14, %v4085_v18  ;;  %vm11573_vm14 = vmmov %vm11547_vm0  ;;  %v4666_v18 = vpack.c.bf16 %v4634_v31, %v4633_v15  ;;  %v4987_v43 = vld [vmem:[#allocation3 + $0x122] sm:$0xff]  ;;  %v5279_v13 = vld [vmem:[#allocation3 + $0x13] sm:$0xff] }
 0x39c   : > { %8263 = vmatpush3.bf16.msra.mxu1 %v4738_v45  ;;  %8230 = vmatprep.mubr.msk.bf16.mxu1 %vm11559_vm3, %v4086_v29  ;;  %vm11574_vm3 = vmmov %vm11547_vm0  ;;  %v4667_v45 = vpack.c.bf16 %v4636_v47, %v4635_v12  ;;  %v4638_v29 = vld [vmem:[#allocation3 + $0x5a] sm:$0xff]  ;;  %v5282_v7 = vld [vmem:[#allocation3 + $0x2b] sm:$0xff] }
 0x39d   : > { %9116 = vmatprep.subr.msk.bf16.mxu1 %vm11560_vm9, %v10948_v46  ;;  %vm11575_vm9 = vmmov %vm11547_vm0  ;;  %v4668_v10 = vpack.c.bf16 %v4638_v29, %v4637_v0  ;;  %v5283_v42 = vld [vmem:[#allocation3 + $0x33] sm:$0xff]  ;;  %v5290_v15 = vld [vmem:[#allocation3 + $0x6b] sm:$0xff] }
 0x39e   : > { %v5287_v12 = vld [vmem:[#allocation3 + $0x53] sm:$0xff]  ;;  %v5294_v0 = vld [vmem:[#allocation3 + $0x8b] sm:$0xff] }
 0x3a3   : > { %8231 = vmatmul.mubr.msk.bf16.gmra.mrb[4].mxu1 %vm11547_vm0, %v4087_v35  ;;  %vm11576_vm0 = vcmask 1041408   ;;  %v4642_v35 = vld [vmem:[#allocation3 + $0x7a] sm:$0xff] }
 0x3a4   : > { %8234 = vmatprep.mubr.msk.bf16.mxu1 %vm11561_vm2, %v4088_v6  ;;  %v5064_v59 = vsel %vm11576_vm0, %v10948_v46, 0  ;;  %vm11577_vm2 = vmmov %vm11569_vm1  ;;  %v4639_v46 = vld [vmem:[#allocation3 + $0x62] sm:$0xff]  ;;  %v4670_v24 = vpack.c.bf16 %v4642_v35, %v4641_v38  ;;  %v5298_v38 = vld [vmem:[#allocation3 + $0xab] sm:$0xff] }
 0x3a5   : > { %v4669_v4 = vpack.c.bf16 %v4640_v58, %v4639_v46  ;;  %v4643_v6 = vld [vmem:[#allocation3 + $0x82] sm:$0xff]  ;;  %v5291_v46 = vld [vmem:[#allocation3 + $0x73] sm:$0xff] }
 0x3a6   : > { %v4671_v20 = vpack.c.bf16 %v4644_v56, %v4643_v6  ;;  %v5295_v6 = vld [vmem:[#allocation3 + $0x93] sm:$0xff] }
 0x3ab   : > { %8235 = vmatmul.mubr.msk.bf16.gmra.mrb[8].mxu1 %vm11562_vm10, %v4089_v50  ;;  %vm11578_vm10 = vmmov %vm11569_vm1  ;;  %v4646_v50 = vld [vmem:[#allocation3 + $0x9a] sm:$0xff] }
 0x3ac   : > { %8238 = vmatprep.mubr.msk.bf16.mxu1 %vm11563_vm11, %v4090_v37  ;;  %vm11579_vm11 = vmmov %vm11576_vm0  ;;  %v4647_v37 = vld [vmem:[#allocation3 + $0xa2] sm:$0xff]  ;;  %v4672_v54 = vpack.c.bf16 %v4646_v50, %v4645_v62  ;;  %v5302_v62 = vld [vmem:[#allocation3 + $0xcb] sm:$0xff] }
 0x3ad   : > { %v4673_v26 = vpack.c.bf16 %v4648_v36, %v4647_v37  ;;  %vm11591_vm0 = vmmov %vm11569_vm1  ;;  %v5299_v37 = vld [vmem:[#allocation3 + $0xb3] sm:$0xff] }
 0x3b3   : > { %8239 = vmatmul.mubr.msk.bf16.gmra.mrb[12].mxu1 %vm11564_vm12, %v4091_v51  ;;  %vm11580_vm12 = vmmov %vm11569_vm1  ;;  %v4650_v51 = vld [vmem:[#allocation3 + $0xba] sm:$0xff] }
 0x3b4   : > { %8242 = vmatprep.mubr.msk.bf16.mxu1 %vm11565_vm13, %v4092_v61  ;;  %vm11581_vm13 = vmmov %vm11569_vm1  ;;  %v4651_v61 = vld [vmem:[#allocation3 + $0xc2] sm:$0xff]  ;;  %v4674_v25 = vpack.c.bf16 %v4650_v51, %v4649_v11  ;;  %v5306_v11 = vld [vmem:[#allocation3 + $0xeb] sm:$0xff] }
 0x3b5   : > { %v4675_v57 = vpack.c.bf16 %v4652_v55, %v4651_v61  ;;  %v5303_v61 = vld [vmem:[#allocation3 + $0xd3] sm:$0xff] }
 0x3bb   : > { %8243 = vmatmul.mubr.msk.bf16.gmra.mrb[16].mxu1 %vm11566_vm15, %v4093_v41  ;;  %vm11582_vm15 = vmmov %vm11569_vm1  ;;  %v4654_v41 = vld [vmem:[#allocation3 + $0xda] sm:$0xff] }
 0x3bc   : > { %8246 = vmatprep.mubr.msk.bf16.mxu1 %vm11567_vm4, %v4094_v60  ;;  %vm11583_vm4 = vmmov %vm11569_vm1  ;;  %v4655_v60 = vld [vmem:[#allocation3 + $0xe2] sm:$0xff]  ;;  %v4676_v63 = vpack.c.bf16 %v4654_v41, %v4653_v32  ;;  %v5310_v32 = vld [vmem:[#allocation3 + $0x10b] sm:$0xff] }
 0x3bd   : > { %v4677_v39 = vpack.c.bf16 %v4656_v19, %v4655_v60  ;;  %v5307_v60 = vld [vmem:[#allocation3 + $0xf3] sm:$0xff] }
 0x3c3   : > { %8247 = vmatmul.mubr.msk.bf16.gmra.mrb[20].mxu1 %vm11568_vm7, %v4095_v40  ;;  %vm11584_vm7 = vmmov %vm11569_vm1  ;;  %v4658_v40 = vld [vmem:[#allocation3 + $0xfa] sm:$0xff] }
 0x3c4   : > { %8250 = vmatprep.mubr.msk.bf16.mxu1 %vm11569_vm1, %v4096_v33  ;;  %v4659_v33 = vld [vmem:[#allocation3 + $0x102] sm:$0xff]  ;;  %v4678_v52 = vpack.c.bf16 %v4658_v40, %v4657_v28  ;;  %v5314_v28 = vld [vmem:[#allocation3 + $0x12b] sm:$0xff] }
 0x3c5   : > { %v4679_v23 = vpack.c.bf16 %v4660_v9, %v4659_v33  ;;  %v5311_v33 = vld [vmem:[#allocation3 + $0x113] sm:$0xff] }
 0x3cb   : > { %8251 = vmatmul.mubr.msk.bf16.gmra.mrb[24].mxu1 %vm11570_vm5, %v4097_v16  ;;  %vm11585_vm5 = vmmov %vm11569_vm1  ;;  %v4662_v16 = vld [vmem:[#allocation3 + $0x11a] sm:$0xff] }
 0x3cc   : > { %8254 = vmatprep.mubr.msk.bf16.mxu1 %vm11571_vm8, %v4098_v5  ;;  %vm11586_vm8 = vmmov %vm11569_vm1  ;;  %v4661_v5 = vld [vmem:[#allocation3 + $0x112] sm:$0xff] }
 0x3cd   : > { %v4680_v2 = vpack.c.bf16 %v4662_v16, %v4661_v5  ;;  %v5313_v16 = vld [vmem:[#allocation3 + $0x123] sm:$0xff] }
 0x3ce   : > { %v5332_v5 = vpack.c.bf16 %v5314_v28, %v5313_v16  ;;  %v6258_v28 = vld [vmem:[#allocation3 + $0x2d] sm:$0xff]  ;;  %v6259_v16 = vld [vmem:[#allocation3 + $0x35] sm:$0xff] }
 0x3d3   : > { %8255 = vmatmul.mubr.msk.bf16.gmra.mrb[28].mxu1 %vm11572_vm6, %v4099_v1  ;;  %vm11587_vm6 = vmmov %vm11569_vm1  ;;  %v4988_v1 = vld [vmem:[#allocation3 + $0x12a] sm:$0xff] }
 0x3d4   : > { %8258 = vmatprep.mubr.msk.bf16.mxu1 %vm11573_vm14, %v4100_v14  ;;  %vm11588_vm14 = vmmov %vm11569_vm1  ;;  %v5280_v14 = vld [vmem:[#allocation3 + $0x1b] sm:$0xff]  ;;  %v5006_v53 = vpack.c.bf16 %v4988_v1, %v4987_v43  ;;  %v5607_v1 = vld [vmem:[#allocation3 + $0x24] sm:$0xff] }
 0x3d5   : > { %v5315_v3 = vpack.c.bf16 %v5280_v14, %v5279_v13  ;;  %v5610_v43 = vld [vmem:[#allocation3 + $0x3c] sm:$0xff] }
 0x3db   : > { %8259 = vmatmul.mubr.msk.bf16.gmra.mrb[32].mxu1 %vm11574_vm3, %v4101_v17  ;;  %vm11589_vm3 = vmmov %vm11569_vm1  ;;  %v5281_v17 = vld [vmem:[#allocation3 + $0x23] sm:$0xff] }
 0x3dc   : > { %8264 = vmatprep.mubr.msk.bf16.mxu1 %vm11575_vm9, %v4663_v27  ;;  %vm11590_vm9 = vmmov %vm11569_vm1  ;;  %v5284_v27 = vld [vmem:[#allocation3 + $0x3b] sm:$0xff]  ;;  %v5316_v22 = vpack.c.bf16 %v5282_v7, %v5281_v17  ;;  %v5612_v7 = vld [vmem:[#allocation3 + $0x4c] sm:$0xff] }
 0x3dd   : > { %v5317_v49 = vpack.c.bf16 %v5284_v27, %v5283_v42  ;;  %v5613_v27 = vld [vmem:[#allocation3 + $0x54] sm:$0xff]  ;;  %v5614_v17 = vld [vmem:[#allocation3 + $0x5c] sm:$0xff] }
 0x3de   : > { %v5645_v42 = vpack.c.bf16 %v5614_v17, %v5613_v27  ;;  %v6267_v17 = vld [vmem:[#allocation3 + $0x75] sm:$0xff] }
 0x3e3   : > { %8265 = vmatmul.mubr.msk.bf16.vlgmr.msra.gmra.mrb[0].mxu1 %vm11577_vm2, %v10970_v30  ;;  %vm11592_vm2 = vmmov %vm11591_vm0 }
 0x3e4   : > { %8301 = vmatpush3.bf16.msra.mxu1 %v5064_v59  ;;  %8268 = vmatprep.mubr.msk.bf16.mxu1 %vm11578_vm10, %v10974_v34  ;;  %vm11593_vm10 = vmmov %vm11591_vm0  ;;  %v5286_v59 = vld [vmem:[#allocation3 + $0x4b] sm:$0xff] }
 0x3e5   : > { %9117 = vmatprep.subr.msk.bf16.mxu1 %vm11579_vm11, %v10979_v44  ;;  %vm11594_vm11 = vmmov %vm11591_vm0 }
 0x3eb   : > { %8269 = vmatmul.mubr.msk.bf16.gmra.mrb[4].mxu1 %vm11580_vm12, %v4666_v18  ;;  %vm11595_vm12 = vcmask 1041408  }
 0x3ec   : > { %8272 = vmatprep.mubr.msk.bf16.mxu1 %vm11581_vm13, %v4667_v45  ;;  %v5390_v8 = vsel %vm11595_vm12, %v10979_v44, 0  ;;  %vm11596_vm13 = vmmov %vm11591_vm0  ;;  %v5285_v44 = vld [vmem:[#allocation3 + $0x43] sm:$0xff] }
 0x3ed   : > { %v5318_v31 = vpack.c.bf16 %v5286_v59, %v5285_v44  ;;  %v5618_v59 = vld [vmem:[#allocation3 + $0x7c] sm:$0xff] }
 0x3f3   : > { %8273 = vmatmul.mubr.msk.bf16.gmra.mrb[8].mxu1 %vm11582_vm15, %v4668_v10  ;;  %vm11597_vm15 = vmmov %vm11591_vm0 }
 0x3f4   : > { %8276 = vmatprep.mubr.msk.bf16.mxu1 %vm11583_vm4, %v4669_v4  ;;  %vm11598_vm4 = vmmov %vm11595_vm12 }
 0x3f5   : > { %vm11610_vm12 = vmmov %vm11591_vm0 }
 0x3fb   : > { %8277 = vmatmul.mubr.msk.bf16.gmra.mrb[12].mxu1 %vm11584_vm7, %v4670_v24  ;;  %vm11599_vm7 = vmmov %vm11591_vm0 }
 0x3fc   : > { %8280 = vmatprep.mubr.msk.bf16.mxu1 %vm11569_vm1, %v4671_v20  ;;  %vm11600_vm1 = vmmov %vm11591_vm0 }
 0x403   : > { %8281 = vmatmul.mubr.msk.bf16.gmra.mrb[16].mxu1 %vm11585_vm5, %v4672_v54  ;;  %vm11601_vm5 = vmmov %vm11591_vm0 }
 0x404   : > { %8284 = vmatprep.mubr.msk.bf16.mxu1 %vm11586_vm8, %v4673_v26  ;;  %vm11602_vm8 = vmmov %vm11591_vm0 }
 0x40b   : > { %8285 = vmatmul.mubr.msk.bf16.gmra.mrb[20].mxu1 %vm11587_vm6, %v4674_v25  ;;  %vm11603_vm6 = vmmov %vm11591_vm0 }
 0x40c   : > { %8288 = vmatprep.mubr.msk.bf16.mxu1 %vm11588_vm14, %v4675_v57  ;;  %vm11604_vm14 = vmmov %vm11591_vm0 }
 0x413   : > { %8289 = vmatmul.mubr.msk.bf16.gmra.mrb[24].mxu1 %vm11589_vm3, %v4676_v63  ;;  %vm11605_vm3 = vmmov %vm11591_vm0 }
 0x414   : > { %8292 = vmatprep.mubr.msk.bf16.mxu1 %vm11590_vm9, %v4677_v39  ;;  %vm11606_vm9 = vmmov %vm11591_vm0 }
 0x41b   : > { %8293 = vmatmul.mubr.msk.bf16.gmra.mrb[28].mxu1 %vm11591_vm0, %v4678_v52 }
 0x41c   : > { %8296 = vmatprep.mubr.msk.bf16.mxu1 %vm11592_vm2, %v4679_v23  ;;  %vm11607_vm2 = vmmov %vm11591_vm0 }
 0x423   : > { %8297 = vmatmul.mubr.msk.bf16.gmra.mrb[32].mxu1 %vm11593_vm10, %v4680_v2  ;;  %vm11608_vm10 = vmmov %vm11591_vm0 }
 0x424   : > { %8302 = vmatprep.mubr.msk.bf16.mxu1 %vm11594_vm11, %v10970_v30  ;;  %vm11609_vm11 = vmmov %vm11591_vm0  ;;  %v11033_v30 = vld [vmem:[%s11275_s2 + $0xc] sm:$0x3] }
 0x42b   : > { %8303 = vmatmul.mubr.msk.bf16.vlgmr.msra.gmra.mrb[0].mxu1 %vm11596_vm13, %v10974_v34  ;;  %vm11611_vm13 = vmmov %vm11591_vm0  ;;  %v5288_v34 = vld [vmem:[#allocation3 + $0x5b] sm:$0xff] }
 0x42c   : > { %8339 = vmatpush3.bf16.msra.mxu1 %v5390_v8  ;;  %8306 = vmatprep.mubr.msk.bf16.mxu1 %vm11597_vm15, %v4666_v18  ;;  %vm11612_vm15 = vmmov %vm11591_vm0  ;;  %v5319_v47 = vpack.c.bf16 %v5288_v34, %v5287_v12  ;;  %v5292_v18 = vld [vmem:[#allocation3 + $0x7b] sm:$0xff]  ;;  %v5608_v8 = vld [vmem:[#allocation3 + $0x2c] sm:$0xff] }
 0x42d   : > { %9118 = vmatprep.subr.msk.bf16.mxu1 %vm11598_vm4, %v7423_v21  ;;  %vm11613_vm4 = vmmov %vm11591_vm0  ;;  %v5321_v58 = vpack.c.bf16 %v5292_v18, %v5291_v46  ;;  %v11055_v14 = vpack.c.bf16 %v5608_v8, %v5607_v1  ;;  %v5615_v34 = vld [vmem:[#allocation3 + $0x64] sm:$0xff]  ;;  %v5620_v12 = vld [vmem:[#allocation3 + $0x8c] sm:$0xff] }
 0x42e   : > { %v5619_v18 = vld [vmem:[#allocation3 + $0x84] sm:$0xff]  ;;  %v5624_v46 = vld [vmem:[#allocation3 + $0xac] sm:$0xff] }
 0x433   : > { %8307 = vmatmul.mubr.msk.bf16.gmra.mrb[4].mxu1 %vm11599_vm7, %v4667_v45  ;;  %vm11614_vm7 = vcmask 1041408   ;;  %v5289_v45 = vld [vmem:[#allocation3 + $0x63] sm:$0xff] }
 0x434   : > { %8310 = vmatprep.mubr.msk.bf16.mxu1 %vm11600_vm1, %v4668_v10  ;;  %v5716_v48 = vsel %vm11614_vm7, %v7423_v21, 0  ;;  %vm11615_vm1 = vmmov %vm11591_vm0  ;;  %v5320_v29 = vpack.c.bf16 %v5290_v15, %v5289_v45  ;;  %v5296_v10 = vld [vmem:[#allocation3 + $0x9b] sm:$0xff]  ;;  %v5648_v45 = vpack.c.bf16 %v5620_v12, %v5619_v18  ;;  %v6273_v12 = vld [vmem:[#allocation3 + $0xa5] sm:$0xff] }
 0x435   : > { %v5323_v56 = vpack.c.bf16 %v5296_v10, %v5295_v6  ;;  %v5609_v21 = vld [vmem:[#allocation3 + $0x34] sm:$0xff]  ;;  %v5622_v15 = vld [vmem:[#allocation3 + $0x9c] sm:$0xff]  ;;  %v5623_v10 = vld [vmem:[#allocation3 + $0xa4] sm:$0xff] }
 0x436   : > { %v11059_v13 = vpack.c.bf16 %v5610_v43, %v5609_v21  ;;  %v5628_v6 = vld [vmem:[#allocation3 + $0xcc] sm:$0xff]  ;;  %v6276_v18 = vld [vmem:[#allocation3 + $0xbd] sm:$0xff] }
 0x437   : > { %v6261_v43 = vld [vmem:[#allocation3 + $0x45] sm:$0xff] }
 0x43b   : > { %8311 = vmatmul.mubr.msk.bf16.gmra.mrb[8].mxu1 %vm11601_vm5, %v4669_v4  ;;  %vm11616_vm5 = vmmov %vm11591_vm0  ;;  %v5293_v4 = vld [vmem:[#allocation3 + $0x83] sm:$0xff] }
 0x43c   : > { %8314 = vmatprep.mubr.msk.bf16.mxu1 %vm11602_vm8, %v4670_v24  ;;  %vm11617_vm8 = vmmov %vm11614_vm7  ;;  %v5322_v35 = vpack.c.bf16 %v5294_v0, %v5293_v4  ;;  %v5300_v24 = vld [vmem:[#allocation3 + $0xbb] sm:$0xff]  ;;  %v5650_v4 = vpack.c.bf16 %v5624_v46, %v5623_v10  ;;  %v6277_v46 = vld [vmem:[#allocation3 + $0xc5] sm:$0xff] }
 0x43d   : > { %v5325_v36 = vpack.c.bf16 %v5300_v24, %v5299_v37  ;;  %vm11629_vm7 = vmmov %vm11591_vm0  ;;  %v5626_v0 = vld [vmem:[#allocation3 + $0xbc] sm:$0xff]  ;;  %v5627_v24 = vld [vmem:[#allocation3 + $0xc4] sm:$0xff] }
 0x43e   : > { %v5632_v37 = vld [vmem:[#allocation3 + $0xec] sm:$0xff]  ;;  %v6280_v10 = vld [vmem:[#allocation3 + $0xdd] sm:$0xff] }
 0x443   : > { %8315 = vmatmul.mubr.msk.bf16.gmra.mrb[12].mxu1 %vm11603_vm6, %v4671_v20  ;;  %vm11618_vm6 = vmmov %vm11591_vm0  ;;  %v5297_v20 = vld [vmem:[#allocation3 + $0xa3] sm:$0xff] }
 0x444   : > { %8318 = vmatprep.mubr.msk.bf16.mxu1 %vm11604_vm14, %v4672_v54  ;;  %vm11619_vm14 = vmmov %vm11591_vm0  ;;  %v5324_v50 = vpack.c.bf16 %v5298_v38, %v5297_v20  ;;  %v5304_v54 = vld [vmem:[#allocation3 + $0xdb] sm:$0xff]  ;;  %v5652_v20 = vpack.c.bf16 %v5628_v6, %v5627_v24  ;;  %v6281_v6 = vld [vmem:[#allocation3 + $0xe5] sm:$0xff] }
 0x445   : > { %v5327_v55 = vpack.c.bf16 %v5304_v54, %v5303_v61  ;;  %v5630_v38 = vld [vmem:[#allocation3 + $0xdc] sm:$0xff]  ;;  %v5631_v54 = vld [vmem:[#allocation3 + $0xe4] sm:$0xff]  ;;  %v5636_v61 = vld [vmem:[#allocation3 + $0x10c] sm:$0xff] }
 0x446   : > { %v6284_v24 = vld [vmem:[#allocation3 + $0xfd] sm:$0xff] }
 0x44b   : > { %8319 = vmatmul.mubr.msk.bf16.gmra.mrb[16].mxu1 %vm11605_vm3, %v4673_v26  ;;  %vm11620_vm3 = vmmov %vm11591_vm0  ;;  %v5301_v26 = vld [vmem:[#allocation3 + $0xc3] sm:$0xff] }
 0x44c   : > { %8322 = vmatprep.mubr.msk.bf16.mxu1 %vm11606_vm9, %v4674_v25  ;;  %vm11621_vm9 = vmmov %vm11591_vm0  ;;  %v5326_v51 = vpack.c.bf16 %v5302_v62, %v5301_v26  ;;  %v5308_v25 = vld [vmem:[#allocation3 + $0xfb] sm:$0xff]  ;;  %v5654_v26 = vpack.c.bf16 %v5632_v37, %v5631_v54  ;;  %v6285_v37 = vld [vmem:[#allocation3 + $0x105] sm:$0xff] }
 0x44d   : > { %v5329_v19 = vpack.c.bf16 %v5308_v25, %v5307_v60  ;;  %v5634_v62 = vld [vmem:[#allocation3 + $0xfc] sm:$0xff]  ;;  %v5635_v25 = vld [vmem:[#allocation3 + $0x104] sm:$0xff] }
 0x44e   : > { %v5639_v60 = vld [vmem:[#allocation3 + $0x124] sm:$0xff] }
 0x44f   : > { %v6288_v54 = vld [vmem:[#allocation3 + $0x11d] sm:$0xff] }
 0x453   : > { %8323 = vmatmul.mubr.msk.bf16.gmra.mrb[20].mxu1 %vm11591_vm0, %v4675_v57  ;;  %v5305_v57 = vld [vmem:[#allocation3 + $0xe3] sm:$0xff] }
 0x454   : > { %8326 = vmatprep.mubr.msk.bf16.mxu1 %vm11607_vm2, %v4676_v63  ;;  %vm11622_vm2 = vmmov %vm11591_vm0  ;;  %v5328_v41 = vpack.c.bf16 %v5306_v11, %v5305_v57  ;;  %v5312_v63 = vld [vmem:[#allocation3 + $0x11b] sm:$0xff]  ;;  %v5656_v57 = vpack.c.bf16 %v5636_v61, %v5635_v25 }
 0x455   : > { %v5331_v9 = vpack.c.bf16 %v5312_v63, %v5311_v33  ;;  %v5638_v11 = vld [vmem:[#allocation3 + $0x11c] sm:$0xff] }
 0x456   : > { %v5966_v33 = vld [vmem:[#allocation3 + $0x13c] sm:$0xff] }
 0x457   : > { %v6292_v25 = vld [vmem:[#allocation3 + $0x13d] sm:$0xff] }
 0x45b   : > { %8327 = vmatmul.mubr.msk.bf16.gmra.mrb[24].mxu1 %vm11608_vm10, %v4677_v39  ;;  %vm11623_vm10 = vmmov %vm11591_vm0  ;;  %v5309_v39 = vld [vmem:[#allocation3 + $0x103] sm:$0xff] }
 0x45c   : > { %8330 = vmatprep.mubr.msk.bf16.mxu1 %vm11609_vm11, %v4678_v52  ;;  %vm11624_vm11 = vmmov %vm11591_vm0  ;;  %v5330_v40 = vpack.c.bf16 %v5310_v32, %v5309_v39  ;;  %v5605_v52 = vld [vmem:[#allocation3 + $0x14] sm:$0xff]  ;;  %v7480_v39 = vld [vmem:[%s11275_s2 + $0x10] sm:$0x3] }
 0x463   : > { %8331 = vmatmul.mubr.msk.bf16.gmra.mrb[28].mxu1 %vm11610_vm12, %v4679_v23  ;;  %vm11625_vm12 = vmmov %vm11591_vm0  ;;  %v5606_v23 = vld [vmem:[#allocation3 + $0x1c] sm:$0xff] }
 0x464   : > { %8334 = vmatprep.mubr.msk.bf16.mxu1 %vm11611_vm13, %v4680_v2  ;;  %vm11626_vm13 = vmmov %vm11591_vm0  ;;  %v5641_v2 = vpack.c.bf16 %v5606_v23, %v5605_v52  ;;  %v6257_v52 = vld [vmem:[#allocation3 + $0x25] sm:$0xff] }
 0x465   : > { %v6293_v23 = vpack.c.bf16 %v6258_v28, %v6257_v52  ;;  %v6589_v28 = vld [vmem:[#allocation3 + $0x56] sm:$0xff]  ;;  %v6590_v52 = vld [vmem:[#allocation3 + $0x5e] sm:$0xff] }
 0x46b   : > { %8335 = vmatmul.mubr.msk.bf16.gmra.mrb[32].mxu1 %vm11612_vm15, %v5006_v53  ;;  %vm11627_vm15 = vmmov %vm11591_vm0 }
 0x46c   : > { %8340 = vmatprep.mubr.msk.bf16.mxu1 %vm11613_vm4, %v5315_v3  ;;  %vm11628_vm4 = vmmov %vm11591_vm0  ;;  %v11064_v3 = vld [vmem:[%s11275_s2 + $0xe] sm:$0x3] }
 0x473   : > { %8341 = vmatmul.mubr.msk.bf16.vlgmr.msra.gmra.mrb[0].mxu1 %vm11615_vm1, %v5316_v22  ;;  %vm11630_vm1 = vmmov %vm11591_vm0  ;;  %v5611_v22 = vld [vmem:[#allocation3 + $0x44] sm:$0xff] }
 0x474   : > { %8377 = vmatpush3.bf16.msra.mxu1 %v5716_v48  ;;  %8344 = vmatprep.mubr.msk.bf16.mxu1 %vm11616_vm5, %v5317_v49  ;;  %vm11631_vm5 = vmmov %vm11591_vm0  ;;  %v5644_v48 = vpack.c.bf16 %v5612_v7, %v5611_v22  ;;  %v5616_v49 = vld [vmem:[#allocation3 + $0x6c] sm:$0xff]  ;;  %v6268_v22 = vld [vmem:[#allocation3 + $0x7d] sm:$0xff] }
 0x475   : > { %9119 = vmatprep.subr.msk.bf16.mxu1 %vm11617_vm8, %v11033_v30  ;;  %vm11632_vm8 = vmmov %vm11591_vm0  ;;  %v5646_v44 = vpack.c.bf16 %v5616_v49, %v5615_v34  ;;  %v6265_v7 = vld [vmem:[#allocation3 + $0x65] sm:$0xff]  ;;  %v6272_v34 = vld [vmem:[#allocation3 + $0x9d] sm:$0xff] }
 0x476   : > { %v6269_v49 = vld [vmem:[#allocation3 + $0x85] sm:$0xff] }
 0x47b   : > { %8345 = vmatmul.mubr.msk.bf16.gmra.mrb[4].mxu1 %vm11618_vm6, %v5318_v31  ;;  %vm11633_vm6 = vcmask 1041408  }
 0x47c   : > { %8348 = vmatprep.mubr.msk.bf16.mxu1 %vm11619_vm14, %v5319_v47  ;;  %v6042_v53 = vsel %vm11633_vm6, %v11033_v30, 0  ;;  %vm11634_vm14 = vmmov %vm11591_vm0  ;;  %v5617_v30 = vld [vmem:[#allocation3 + $0x74] sm:$0xff] }
 0x47d   : > { %v5647_v31 = vpack.c.bf16 %v5618_v59, %v5617_v30  ;;  %v5621_v47 = vld [vmem:[#allocation3 + $0x94] sm:$0xff] }
 0x47e   : > { %v6271_v59 = vld [vmem:[#allocation3 + $0x95] sm:$0xff] }
 0x483   : > { %8349 = vmatmul.mubr.msk.bf16.gmra.mrb[8].mxu1 %vm11620_vm3, %v5320_v29  ;;  %vm11635_vm3 = vmmov %vm11591_vm0  ;;  %v5649_v29 = vpack.c.bf16 %v5622_v15, %v5621_v47  ;;  %v6275_v15 = vld [vmem:[#allocation3 + $0xb5] sm:$0xff] }
 0x484   : > { %8352 = vmatprep.mubr.msk.bf16.mxu1 %vm11621_vm9, %v5321_v58  ;;  %vm11636_vm9 = vmmov %vm11633_vm6  ;;  %v5625_v58 = vld [vmem:[#allocation3 + $0xb4] sm:$0xff] }
 0x485   : > { %vm11648_vm6 = vmmov %vm11591_vm0 }
 0x48b   : > { %8353 = vmatmul.mubr.msk.bf16.gmra.mrb[12].mxu1 %vm11591_vm0, %v5322_v35  ;;  %v5651_v35 = vpack.c.bf16 %v5626_v0, %v5625_v58  ;;  %v6279_v0 = vld [vmem:[#allocation3 + $0xd5] sm:$0xff] }
 0x48c   : > { %8356 = vmatprep.mubr.msk.bf16.mxu1 %vm11622_vm2, %v5323_v56  ;;  %vm11637_vm2 = vmmov %vm11591_vm0  ;;  %v5629_v56 = vld [vmem:[#allocation3 + $0xd4] sm:$0xff] }
 0x493   : > { %8357 = vmatmul.mubr.msk.bf16.gmra.mrb[16].mxu1 %vm11623_vm10, %v5324_v50  ;;  %vm11638_vm10 = vmmov %vm11591_vm0  ;;  %v5653_v50 = vpack.c.bf16 %v5630_v38, %v5629_v56  ;;  %v6283_v38 = vld [vmem:[#allocation3 + $0xf5] sm:$0xff] }
 0x494   : > { %8360 = vmatprep.mubr.msk.bf16.mxu1 %vm11624_vm11, %v5325_v36  ;;  %vm11639_vm11 = vmmov %vm11591_vm0  ;;  %v5633_v36 = vld [vmem:[#allocation3 + $0xf4] sm:$0xff] }
 0x49b   : > { %8361 = vmatmul.mubr.msk.bf16.gmra.mrb[20].mxu1 %vm11625_vm12, %v5326_v51  ;;  %vm11640_vm12 = vmmov %vm11591_vm0  ;;  %v5655_v51 = vpack.c.bf16 %v5634_v62, %v5633_v36  ;;  %v6287_v62 = vld [vmem:[#allocation3 + $0x115] sm:$0xff] }
 0x49c   : > { %8364 = vmatprep.mubr.msk.bf16.mxu1 %vm11626_vm13, %v5327_v55  ;;  %vm11641_vm13 = vmmov %vm11591_vm0  ;;  %v5637_v55 = vld [vmem:[#allocation3 + $0x114] sm:$0xff]  ;;  %v6308_v61 = vpack.c.bf16 %v6288_v54, %v6287_v62 }
 0x49d   : > { %v6911_v54 = vld [vmem:[#allocation2 + $0x23] sm:$0xff] }
 0x4a3   : > { %8365 = vmatmul.mubr.msk.bf16.gmra.mrb[24].mxu1 %vm11627_vm15, %v5328_v41  ;;  %vm11642_vm15 = vmmov %vm11591_vm0  ;;  %v5657_v41 = vpack.c.bf16 %v5638_v11, %v5637_v55  ;;  %v6291_v11 = vld [vmem:[#allocation3 + $0x135] sm:$0xff] }
 0x4a4   : > { %8368 = vmatprep.mubr.msk.bf16.mxu1 %vm11628_vm4, %v5329_v19  ;;  %vm11643_vm4 = vmmov %vm11591_vm0  ;;  %v5640_v19 = vld [vmem:[#allocation3 + $0x12c] sm:$0xff] }
 0x4a5   : > { %v5658_v32 = vpack.c.bf16 %v5640_v19, %v5639_v60  ;;  %v6583_v60 = vld [vmem:[#allocation3 + $0x26] sm:$0xff] }
 0x4ab   : > { %8369 = vmatmul.mubr.msk.bf16.gmra.mrb[28].mxu1 %vm11629_vm7, %v5330_v40  ;;  %vm11644_vm7 = vmmov %vm11591_vm0  ;;  %v5965_v40 = vld [vmem:[#allocation3 + $0x134] sm:$0xff] }
 0x4ac   : > { %8372 = vmatprep.mubr.msk.bf16.mxu1 %vm11630_vm1, %v5331_v9  ;;  %vm11645_vm1 = vmmov %vm11591_vm0  ;;  %v5984_v9 = vpack.c.bf16 %v5966_v33, %v5965_v40  ;;  %v6587_v33 = vld [vmem:[#allocation3 + $0x46] sm:$0xff] }
 0x4b3   : > { %8373 = vmatmul.mubr.msk.bf16.gmra.mrb[32].mxu1 %vm11631_vm5, %v5332_v5  ;;  %vm11646_vm5 = vmmov %vm11591_vm0  ;;  %v6260_v5 = vld [vmem:[#allocation3 + $0x3d] sm:$0xff] }
 0x4b4   : > { %8378 = vmatprep.mubr.msk.bf16.mxu1 %vm11632_vm8, %v5641_v2  ;;  %vm11647_vm8 = vmmov %vm11591_vm0  ;;  %v6262_v2 = vld [vmem:[#allocation3 + $0x4d] sm:$0xff]  ;;  %v6294_v8 = vpack.c.bf16 %v6260_v5, %v6259_v16  ;;  %v6622_v16 = vpack.c.bf16 %v6590_v52, %v6589_v28 }
 0x4b5   : > { %v6295_v1 = vpack.c.bf16 %v6262_v2, %v6261_v43  ;;  %v6591_v5 = vld [vmem:[#allocation3 + $0x66] sm:$0xff]  ;;  %v6596_v43 = vld [vmem:[#allocation3 + $0x8e] sm:$0xff] }
 0x4bb   : > { %8379 = vmatmul.mubr.msk.bf16.vlgmr.msra.gmra.mrb[0].mxu1 %vm11634_vm14, %v11055_v14  ;;  %vm11649_vm14 = vmmov %vm11591_vm0 }
 0x4bc   : > { %8415 = vmatpush3.bf16.msra.mxu1 %v6042_v53  ;;  %8382 = vmatprep.mubr.msk.bf16.mxu1 %vm11635_vm3, %v11059_v13  ;;  %vm11650_vm3 = vmmov %vm11591_vm0  ;;  %v6264_v53 = vld [vmem:[#allocation3 + $0x5d] sm:$0xff] }
 0x4bd   : > { %9120 = vmatprep.subr.msk.bf16.mxu1 %vm11636_vm9, %v11064_v3  ;;  %vm11651_vm9 = vmmov %vm11591_vm0 }
 0x4c3   : > { %8383 = vmatmul.mubr.msk.bf16.gmra.mrb[4].mxu1 %vm11591_vm0, %v5644_v48  ;;  %vm11652_vm0 = vcmask 1041408  }
 0x4c4   : > { %8386 = vmatprep.mubr.msk.bf16.mxu1 %vm11637_vm2, %v5645_v42  ;;  %v6368_v63 = vsel %vm11652_vm0, %v11064_v3, 0  ;;  %vm11653_vm2 = vmmov %vm11645_vm1 }
 0x4cb   : > { %8387 = vmatmul.mubr.msk.bf16.gmra.mrb[8].mxu1 %vm11638_vm10, %v5646_v44  ;;  %vm11654_vm10 = vmmov %vm11645_vm1 }
 0x4cc   : > { %8390 = vmatprep.mubr.msk.bf16.mxu1 %vm11639_vm11, %v5647_v31  ;;  %vm11655_vm11 = vmmov %vm11652_vm0 }
 0x4cd   : > { %vm11667_vm0 = vmmov %vm11645_vm1 }
 0x4d3   : > { %8391 = vmatmul.mubr.msk.bf16.gmra.mrb[12].mxu1 %vm11640_vm12, %v5648_v45  ;;  %vm11656_vm12 = vmmov %vm11645_vm1 }
 0x4d4   : > { %8394 = vmatprep.mubr.msk.bf16.mxu1 %vm11641_vm13, %v5649_v29  ;;  %vm11657_vm13 = vmmov %vm11645_vm1 }
 0x4db   : > { %8395 = vmatmul.mubr.msk.bf16.gmra.mrb[16].mxu1 %vm11642_vm15, %v5650_v4  ;;  %vm11658_vm15 = vmmov %vm11645_vm1 }
 0x4dc   : > { %8398 = vmatprep.mubr.msk.bf16.mxu1 %vm11643_vm4, %v5651_v35  ;;  %vm11659_vm4 = vmmov %vm11645_vm1 }
 0x4e3   : > { %8399 = vmatmul.mubr.msk.bf16.gmra.mrb[20].mxu1 %vm11644_vm7, %v5652_v20  ;;  %vm11660_vm7 = vmmov %vm11645_vm1 }
 0x4e4   : > { %8402 = vmatprep.mubr.msk.bf16.mxu1 %vm11645_vm1, %v5653_v50 }
 0x4eb   : > { %8403 = vmatmul.mubr.msk.bf16.gmra.mrb[24].mxu1 %vm11646_vm5, %v5654_v26  ;;  %vm11661_vm5 = vmmov %vm11645_vm1 }
 0x4ec   : > { %8406 = vmatprep.mubr.msk.bf16.mxu1 %vm11647_vm8, %v5655_v51  ;;  %vm11662_vm8 = vmmov %vm11645_vm1 }
 0x4f3   : > { %8407 = vmatmul.mubr.msk.bf16.gmra.mrb[28].mxu1 %vm11648_vm6, %v5656_v57  ;;  %vm11663_vm6 = vmmov %vm11645_vm1 }
 0x4f4   : > { %8410 = vmatprep.mubr.msk.bf16.mxu1 %vm11649_vm14, %v5657_v41  ;;  %vm11664_vm14 = vmmov %vm11645_vm1 }
 0x4fb   : > { %8411 = vmatmul.mubr.msk.bf16.gmra.mrb[32].mxu1 %vm11650_vm3, %v5658_v32  ;;  %vm11665_vm3 = vmmov %vm11645_vm1 }
 0x4fc   : > { %8416 = vmatprep.mubr.msk.bf16.mxu1 %vm11651_vm9, %v11055_v14  ;;  %vm11666_vm9 = vmmov %vm11645_vm1  ;;  %v6263_v14 = vld [vmem:[#allocation3 + $0x55] sm:$0xff] }
 0x4fd   : > { %v6296_v3 = vpack.c.bf16 %v6264_v53, %v6263_v14  ;;  %v6595_v14 = vld [vmem:[#allocation3 + $0x86] sm:$0xff] }
 0x4fe   : > { %v6625_v53 = vpack.c.bf16 %v6596_v43, %v6595_v14 }
 0x503   : > { %8417 = vmatmul.mubr.msk.bf16.vlgmr.msra.gmra.mrb[0].mxu1 %vm11653_vm2, %v11059_v13  ;;  %vm11668_vm2 = vmmov %vm11667_vm0  ;;  %v6266_v13 = vld [vmem:[#allocation3 + $0x6d] sm:$0xff] }
 0x504   : > { %8453 = vmatpush3.bf16.msra.mxu1 %v6368_v63  ;;  %8420 = vmatprep.mubr.msk.bf16.mxu1 %vm11654_vm10, %v5644_v48  ;;  %vm11669_vm10 = vmmov %vm11667_vm0  ;;  %v6297_v27 = vpack.c.bf16 %v6266_v13, %v6265_v7  ;;  %v6270_v48 = vld [vmem:[#allocation3 + $0x8d] sm:$0xff]  ;;  %v6586_v63 = vld [vmem:[#allocation3 + $0x3e] sm:$0xff] }
 0x505   : > { %9121 = vmatprep.subr.msk.bf16.mxu1 %vm11655_vm11, %v7480_v39  ;;  %vm11670_vm11 = vmmov %vm11667_vm0  ;;  %v6299_v30 = vpack.c.bf16 %v6270_v48, %v6269_v49  ;;  %v6597_v13 = vld [vmem:[#allocation3 + $0x96] sm:$0xff]  ;;  %v6600_v7 = vld [vmem:[#allocation3 + $0xae] sm:$0xff] }
 0x506   : > { %v6601_v48 = vld [vmem:[#allocation3 + $0xb6] sm:$0xff]  ;;  %v6604_v49 = vld [vmem:[#allocation3 + $0xce] sm:$0xff] }
 0x50b   : > { %8421 = vmatmul.mubr.msk.bf16.gmra.mrb[4].mxu1 %vm11656_vm12, %v5645_v42  ;;  %vm11671_vm12 = vcmask 1041408   ;;  %v6298_v42 = vpack.c.bf16 %v6268_v22, %v6267_v17  ;;  %v6599_v17 = vld [vmem:[#allocation3 + $0xa6] sm:$0xff] }
 0x50c   : > { %8424 = vmatprep.mubr.msk.bf16.mxu1 %vm11657_vm13, %v5646_v44  ;;  %v6694_v21 = vsel %vm11671_vm12, %v7480_v39, 0  ;;  %vm11672_vm13 = vmmov %vm11667_vm0  ;;  %v6274_v44 = vld [vmem:[#allocation3 + $0xad] sm:$0xff]  ;;  %v6627_v22 = vpack.c.bf16 %v6600_v7, %v6599_v17 }
 0x50d   : > { %v6301_v47 = vpack.c.bf16 %v6274_v44, %v6273_v12  ;;  %vm11686_vm12 = vmmov %vm11667_vm0  ;;  %v6588_v39 = vld [vmem:[#allocation3 + $0x4e] sm:$0xff]  ;;  %v6605_v44 = vld [vmem:[#allocation3 + $0xd6] sm:$0xff] }
 0x50e   : > { %v6608_v12 = vld [vmem:[#allocation3 + $0xee] sm:$0xff] }
 0x513   : > { %8425 = vmatmul.mubr.msk.bf16.gmra.mrb[8].mxu1 %vm11658_vm15, %v5647_v31  ;;  %vm11673_vm15 = vmmov %vm11667_vm0  ;;  %v6300_v31 = vpack.c.bf16 %v6272_v34, %v6271_v59  ;;  %v6603_v59 = vld [vmem:[#allocation3 + $0xc6] sm:$0xff] }
 0x514   : > { %8428 = vmatprep.mubr.msk.bf16.mxu1 %vm11659_vm4, %v5648_v45  ;;  %vm11674_vm4 = vmmov %vm11667_vm0  ;;  %v6278_v45 = vld [vmem:[#allocation3 + $0xcd] sm:$0xff]  ;;  %v6629_v34 = vpack.c.bf16 %v6604_v49, %v6603_v59 }
 0x515   : > { %v6303_v58 = vpack.c.bf16 %v6278_v45, %v6277_v46  ;;  %v6609_v45 = vld [vmem:[#allocation3 + $0xf6] sm:$0xff]  ;;  %v6612_v46 = vld [vmem:[#allocation3 + $0x10e] sm:$0xff] }
 0x51b   : > { %8429 = vmatmul.mubr.msk.bf16.gmra.mrb[12].mxu1 %vm11660_vm7, %v5649_v29  ;;  %vm11675_vm7 = vmmov %vm11667_vm0  ;;  %v6302_v29 = vpack.c.bf16 %v6276_v18, %v6275_v15  ;;  %v6607_v15 = vld [vmem:[#allocation3 + $0xe6] sm:$0xff] }
 0x51c   : > { %8432 = vmatprep.mubr.msk.bf16.mxu1 %vm11645_vm1, %v5650_v4  ;;  %vm11676_vm1 = vmmov %vm11667_vm0  ;;  %v6282_v4 = vld [vmem:[#allocation3 + $0xed] sm:$0xff]  ;;  %v6631_v18 = vpack.c.bf16 %v6608_v12, %v6607_v15 }
 0x51d   : > { %v6305_v56 = vpack.c.bf16 %v6282_v4, %v6281_v6  ;;  %v6613_v4 = vld [vmem:[#allocation3 + $0x116] sm:$0xff]  ;;  %v6615_v6 = vld [vmem:[#allocation3 + $0x126] sm:$0xff] }
 0x51e   : > { %v6917_v12 = vld [vmem:[#allocation2 + $0x53] sm:$0xff] }
 0x523   : > { %8433 = vmatmul.mubr.msk.bf16.gmra.mrb[16].mxu1 %vm11661_vm5, %v5651_v35  ;;  %vm11677_vm5 = vmmov %vm11667_vm0  ;;  %v6304_v35 = vpack.c.bf16 %v6280_v10, %v6279_v0  ;;  %v6611_v0 = vld [vmem:[#allocation3 + $0x106] sm:$0xff] }
 0x524   : > { %8436 = vmatprep.mubr.msk.bf16.mxu1 %vm11662_vm8, %v5652_v20  ;;  %vm11678_vm8 = vmmov %vm11667_vm0  ;;  %v6286_v20 = vld [vmem:[#allocation3 + $0x10d] sm:$0xff]  ;;  %v6633_v10 = vpack.c.bf16 %v6612_v46, %v6611_v0 }
 0x525   : > { %v6307_v36 = vpack.c.bf16 %v6286_v20, %v6285_v37  ;;  %v6617_v20 = vld [vmem:[#allocation3 + $0x136] sm:$0xff] }
 0x52b   : > { %8437 = vmatmul.mubr.msk.bf16.gmra.mrb[20].mxu1 %vm11663_vm6, %v5653_v50  ;;  %vm11679_vm6 = vmmov %vm11667_vm0  ;;  %v6306_v50 = vpack.c.bf16 %v6284_v24, %v6283_v38 }
 0x52c   : > { %8440 = vmatprep.mubr.msk.bf16.mxu1 %vm11664_vm14, %v5654_v26  ;;  %vm11680_vm14 = vmmov %vm11667_vm0  ;;  %v6289_v26 = vld [vmem:[#allocation3 + $0x125] sm:$0xff] }
 0x533   : > { %8441 = vmatmul.mubr.msk.bf16.gmra.mrb[24].mxu1 %vm11665_vm3, %v5655_v51  ;;  %vm11681_vm3 = vmmov %vm11667_vm0  ;;  %v6290_v51 = vld [vmem:[#allocation3 + $0x12d] sm:$0xff] }
 0x534   : > { %8444 = vmatprep.mubr.msk.bf16.mxu1 %vm11666_vm9, %v5656_v57  ;;  %vm11682_vm9 = vmmov %vm11667_vm0  ;;  %v6309_v55 = vpack.c.bf16 %v6290_v51, %v6289_v26  ;;  %v6310_v57 = vpack.c.bf16 %v6292_v25, %v6291_v11  ;;  %v6912_v25 = vld [vmem:[#allocation2 + $0x2b] sm:$0xff] }
 0x53b   : > { %8445 = vmatmul.mubr.msk.bf16.gmra.mrb[28].mxu1 %vm11667_vm0, %v5657_v41  ;;  %v6584_v41 = vld [vmem:[#allocation3 + $0x2e] sm:$0xff] }
 0x53c   : > { %8448 = vmatprep.mubr.msk.bf16.mxu1 %vm11668_vm2, %v5658_v32  ;;  %vm11683_vm2 = vmmov %vm11667_vm0  ;;  %v6619_v19 = vpack.c.bf16 %v6584_v41, %v6583_v60  ;;  %v6585_v32 = vld [vmem:[#allocation3 + $0x36] sm:$0xff] }
 0x53d   : > { %v6620_v40 = vpack.c.bf16 %v6586_v63, %v6585_v32 }
 0x543   : > { %8449 = vmatmul.mubr.msk.bf16.gmra.mrb[32].mxu1 %vm11669_vm10, %v5984_v9  ;;  %vm11684_vm10 = vmmov %vm11667_vm0  ;;  %v6621_v9 = vpack.c.bf16 %v6588_v39, %v6587_v33 }
 0x544   : > { %8454 = vmatprep.mubr.msk.bf16.mxu1 %vm11670_vm11, %v6293_v23  ;;  %vm11685_vm11 = vmmov %vm11667_vm0  ;;  %v6592_v23 = vld [vmem:[#allocation3 + $0x6e] sm:$0xff] }
 0x545   : > { %v6623_v2 = vpack.c.bf16 %v6592_v23, %v6591_v5 }
 0x54b   : > { %8455 = vmatmul.mubr.msk.bf16.vlgmr.msra.gmra.mrb[0].mxu1 %vm11672_vm13, %v6294_v8  ;;  %vm11687_vm13 = vmmov %vm11667_vm0  ;;  %v6593_v8 = vld [vmem:[#allocation3 + $0x76] sm:$0xff] }
 0x54c   : > { %8491 = vmatpush3.bf16.msra.mxu1 %v6694_v21  ;;  %8458 = vmatprep.mubr.msk.bf16.mxu1 %vm11673_vm15, %v6295_v1  ;;  %vm11688_vm15 = vmmov %vm11667_vm0  ;;  %v6594_v21 = vld [vmem:[#allocation3 + $0x7e] sm:$0xff] }
 0x54d   : > { %v6624_v1 = vpack.c.bf16 %v6594_v21, %v6593_v8  ;;  %v6913_v8 = vld [vmem:[#allocation2 + $0x33] sm:$0xff] }
 0x553   : > { %8459 = vmatmul.mubr.msk.bf16.gmra.mrb[4].mxu1 %vm11674_vm4, %v6296_v3  ;;  %vm11689_vm4 = vmmov %vm11667_vm0  ;;  %v6598_v3 = vld [vmem:[#allocation3 + $0x9e] sm:$0xff] }
 0x554   : > { %8462 = vmatprep.mubr.msk.bf16.mxu1 %vm11675_vm7, %v6297_v27  ;;  %vm11690_vm7 = vmmov %vm11667_vm0  ;;  %v6626_v27 = vpack.c.bf16 %v6598_v3, %v6597_v13  ;;  %v6914_v3 = vld [vmem:[#allocation2 + $0x3b] sm:$0xff] }
 0x55b   : > { %8463 = vmatmul.mubr.msk.bf16.gmra.mrb[8].mxu1 %vm11676_vm1, %v6298_v42  ;;  %vm11691_vm1 = vmmov %vm11667_vm0  ;;  %v6602_v42 = vld [vmem:[#allocation3 + $0xbe] sm:$0xff] }
 0x55c   : > { %8466 = vmatprep.mubr.msk.bf16.mxu1 %vm11677_vm5, %v6299_v30  ;;  %vm11692_vm5 = vmmov %vm11667_vm0  ;;  %v6628_v30 = vpack.c.bf16 %v6602_v42, %v6601_v48 }
 0x563   : > { %8467 = vmatmul.mubr.msk.bf16.gmra.mrb[12].mxu1 %vm11678_vm8, %v6300_v31  ;;  %vm11693_vm8 = vmmov %vm11667_vm0  ;;  %v6606_v31 = vld [vmem:[#allocation3 + $0xde] sm:$0xff] }
 0x564   : > { %8470 = vmatprep.mubr.msk.bf16.mxu1 %vm11679_vm6, %v6301_v47  ;;  %vm11694_vm6 = vmmov %vm11667_vm0  ;;  %v6630_v47 = vpack.c.bf16 %v6606_v31, %v6605_v44 }
 0x56b   : > { %8471 = vmatmul.mubr.msk.bf16.gmra.mrb[16].mxu1 %vm11680_vm14, %v6302_v29  ;;  %vm11695_vm14 = vmmov %vm11667_vm0  ;;  %v6610_v29 = vld [vmem:[#allocation3 + $0xfe] sm:$0xff] }
 0x56c   : > { %8474 = vmatprep.mubr.msk.bf16.mxu1 %vm11681_vm3, %v6303_v58  ;;  %vm11696_vm3 = vmmov %vm11667_vm0  ;;  %v6632_v58 = vpack.c.bf16 %v6610_v29, %v6609_v45 }
 0x573   : > { %8475 = vmatmul.mubr.msk.bf16.gmra.mrb[20].mxu1 %vm11682_vm9, %v6304_v35  ;;  %vm11697_vm9 = vmmov %vm11667_vm0  ;;  %v6614_v35 = vld [vmem:[#allocation3 + $0x11e] sm:$0xff] }
 0x574   : > { %8478 = vmatprep.mubr.msk.bf16.mxu1 %vm11667_vm0, %v6305_v56  ;;  %v6616_v56 = vld [vmem:[#allocation3 + $0x12e] sm:$0xff]  ;;  %v6634_v38 = vpack.c.bf16 %v6614_v35, %v6613_v4 }
 0x575   : > { %v6635_v24 = vpack.c.bf16 %v6616_v56, %v6615_v6 }
 0x57b   : > { %8479 = vmatmul.mubr.msk.bf16.gmra.mrb[24].mxu1 %vm11683_vm2, %v6306_v50  ;;  %vm11698_vm2 = vmmov %vm11667_vm0  ;;  %v6618_v50 = vld [vmem:[#allocation3 + $0x13e] sm:$0xff] }
 0x57c   : > { %8482 = vmatprep.mubr.msk.bf16.mxu1 %vm11684_vm10, %v6307_v36  ;;  %vm11699_vm10 = vmmov %vm11667_vm0  ;;  %v6636_v37 = vpack.c.bf16 %v6618_v50, %v6617_v20  ;;  %v11153_v36 = vld [vmem:[%s11277_s4] ss:$0 sm:$0xff]  ;;  %v6923_v50 = vld [vmem:[#allocation2 + $0x83] sm:$0xff] }
 0x583   : > { %8483 = vmatmul.mubr.msk.bf16.gmra.mrb[28].mxu1 %vm11685_vm11, %v6308_v61  ;;  %vm11700_vm11 = vmmov %vm11667_vm0  ;;  %v6909_v61 = vld [vmem:[#allocation2 + $0x13] sm:$0xff] }
 0x584   : > { %8486 = vmatprep.mubr.msk.bf16.mxu1 %vm11686_vm12, %v6309_v55  ;;  %vm11701_vm12 = vmmov %vm11667_vm0 }
 0x58b   : > { %8487 = vmatmul.mubr.msk.bf16.gmra.mrb[32].mxu1 %vm11687_vm13, %v6310_v57  ;;  %vm11702_vm13 = vmmov %vm11667_vm0 }
 0x58c   : > { %8492 = vmatprep.mubr.msk.bf16.mxu1 %vm11688_vm15, %v6619_v19  ;;  %vm11703_vm15 = vmmov %vm11667_vm0  ;;  %v6910_v19 = vld [vmem:[#allocation2 + $0x1b] sm:$0xff] }
 0x593   : > { %8493 = vmatmul.mubr.msk.bf16.vlgmr.msra.gmra.mrb[0].mxu1 %vm11689_vm4, %v6620_v40  ;;  %vm11704_vm4 = vmmov %vm11667_vm0 }
 0x594   : > { %8496 = vmatprep.mubr.msk.bf16.mxu1 %vm11690_vm7, %v6621_v9  ;;  %vm11705_vm7 = vmmov %vm11667_vm0 }
 0x59b   : > { %8497 = vmatmul.mubr.msk.bf16.gmra.mrb[4].mxu1 %vm11691_vm1, %v6622_v16  ;;  %vm11706_vm1 = vmmov %vm11667_vm0  ;;  %v6915_v16 = vld [vmem:[#allocation2 + $0x43] sm:$0xff] }
 0x59c   : > { %8500 = vmatprep.mubr.msk.bf16.mxu1 %vm11692_vm5, %v6623_v2  ;;  %vm11707_vm5 = vmmov %vm11667_vm0 }
 0x5a3   : > { %8501 = vmatmul.mubr.msk.bf16.gmra.mrb[8].mxu1 %vm11693_vm8, %v6624_v1  ;;  %vm11708_vm8 = vmmov %vm11667_vm0  ;;  %v6916_v1 = vld [vmem:[#allocation2 + $0x4b] sm:$0xff] }
 0x5a4   : > { %8504 = vmatprep.mubr.msk.bf16.mxu1 %vm11694_vm6, %v6625_v53  ;;  %vm11709_vm6 = vmmov %vm11667_vm0 }
 0x5ab   : > { %8505 = vmatmul.mubr.msk.bf16.gmra.mrb[12].mxu1 %vm11695_vm14, %v6626_v27  ;;  %vm11710_vm14 = vmmov %vm11667_vm0 }
 0x5ac   : > { %8508 = vmatprep.mubr.msk.bf16.mxu1 %vm11696_vm3, %v6627_v22  ;;  %vm11711_vm3 = vmmov %vm11667_vm0 }
 0x5b3   : > { %8509 = vmatmul.mubr.msk.bf16.gmra.mrb[16].mxu1 %vm11697_vm9, %v6628_v30  ;;  %vm11712_vm9 = vmmov %vm11667_vm0 }
 0x5b4   : > { %8512 = vmatprep.mubr.msk.bf16.mxu1 %vm11667_vm0, %v6629_v34  ;;  %v6919_v34 = vld [vmem:[#allocation2 + $0x63] sm:$0xff] }
 0x5bb   : > { %8513 = vmatmul.mubr.msk.bf16.gmra.mrb[20].mxu1 %vm11698_vm2, %v6630_v47  ;;  %vm11713_vm2 = vmmov %vm11667_vm0 }
 0x5bc   : > { %8516 = vmatprep.mubr.msk.bf16.mxu1 %vm11699_vm10, %v6631_v18  ;;  %v6920_v18 = vld [vmem:[#allocation2 + $0x6b] sm:$0xff]  ;;  %vm11714_vm10 = vmmov %vm11667_vm0 }
 0x5c3   : > { %8517 = vmatmul.mubr.msk.bf16.gmra.mrb[24].mxu1 %vm11700_vm11, %v6632_v58  ;;  %v6918_v58 = vld [vmem:[#allocation2 + $0x5b] sm:$0xff]  ;;  %vm11715_vm11 = vmmov %vm11667_vm0 }
 0x5c4   : > { %8520 = vmatprep.mubr.msk.bf16.mxu1 %vm11701_vm12, %v6633_v10  ;;  %vm11716_vm12 = vmmov %vm11667_vm0 }
 0x5cb   : > { %8521 = vmatmul.mubr.msk.bf16.gmra.mrb[28].mxu1 %vm11702_vm13, %v6634_v38  ;;  %vm11717_vm13 = vmmov %vm11667_vm0 }
 0x5cc   : > { %8524 = vmatprep.mubr.msk.bf16.mxu1 %vm11703_vm15, %v6635_v24  ;;  %vm11718_vm15 = vmmov %vm11667_vm0 }
 0x5d3   : > { %8525 = vmatmul.mubr.msk.bf16.gmra.mrb[32].mxu1 %vm11704_vm4, %v6636_v37  ;;  %vm11719_vm4 = vmmov %vm11667_vm0 }
 0x666   : > { %v8494_v62 = vpop.f32.mrb[0].mxu1 }
 0x667   : > { %v6954_v26 = vadd.f32 %v8494_v62, %v11153_v36  ;;  %v6730_v51 = vpop.f32.mrb[1].mxu1 }
 0x668   : > { %v6952_v55 = vadd.f32 %v11153_v36, %v6730_v51  ;;  %v8495_v11 = vpop.f32.mrb[2].mxu1 }
 0x669   : > { %v6990_v57 = vadd.f32 %v6954_v26, %v6911_v54  ;;  %v6955_v41 = vadd.f32 %v8495_v11, %v11153_v36  ;;  %v6733_v60 = vpop.f32.mrb[3].mxu1  ;;  %v6921_v54 = vld [vmem:[#allocation2 + $0x73] sm:$0xff] }
 0x66a   : > { %v6988_v32 = vadd.f32 %v6952_v55, %v6909_v61  ;;  %v6953_v63 = vadd.f32 %v11153_v36, %v6733_v60  ;;  %v6924_v61 = vld [vmem:[#allocation2 + $0x8b] sm:$0xff] }
 0x66b   : > { %v7026_v39 = vmax.f32 %v6990_v57, 0.0  ;;  %v6991_v40 = vadd.f32 %v6955_v41, %v6912_v25  ;;  %v6922_v57 = vld [vmem:[#allocation2 + $0x7b] sm:$0xff] }
 0x66c   : > { %v7024_v33 = vmax.f32 %v6988_v32, 0.0  ;;  %v6989_v9 = vadd.f32 %v6953_v63, %v6910_v19 }
 0x66d   : > { %7062 = vst.msk [vmem:[%s11163_s21 + $0x10] sm:$0xff] %vm11705_vm7, %v7026_v39  ;;  %v7027_v28 = vmax.f32 %v6991_v40, 0.0  ;;  %vm11720_vm7 = vmmov %vm11667_vm0 }
 0x66e   : > { %7060 = vst.msk [vmem:[%s11163_s21] sm:$0xff] %vm11706_vm1, %v7024_v33  ;;  %v7025_v52 = vmax.f32 %v6989_v9, 0.0  ;;  %v8498_v23 = vpop.f32.mrb[4].mxu1  ;;  %vm11721_vm1 = vmmov %vm11667_vm0 }
 0x66f   : > { %7063 = vst.msk [vmem:[%s11163_s21 + $0x18] sm:$0xff] %vm11707_vm5, %v7027_v28  ;;  %v6958_v5 = vadd.f32 %v8498_v23, %v11153_v36  ;;  %v6746_v2 = vpop.f32.mrb[5].mxu1  ;;  %v6927_v28 = vld [vmem:[#allocation2 + $0xa3] sm:$0xff]  ;;  %vm11722_vm5 = vmmov %vm11667_vm0 }
 0x670   : > { %7061 = vst.msk [vmem:[%s11163_s21 + $0x8] sm:$0xff] %vm11708_vm8, %v7025_v52  ;;  %v6956_v21 = vadd.f32 %v11153_v36, %v6746_v2  ;;  %v8499_v43 = vpop.f32.mrb[6].mxu1  ;;  %vm11723_vm8 = vmmov %vm11667_vm0 }
 0x671   : > { %v6994_v14 = vadd.f32 %v6958_v5, %v6915_v16  ;;  %v6959_v53 = vadd.f32 %v8499_v43, %v11153_v36  ;;  %v6749_v13 = vpop.f32.mrb[7].mxu1  ;;  %v6925_v16 = vld [vmem:[#allocation2 + $0x93] sm:$0xff] }
 0x672   : > { %v6992_v7 = vadd.f32 %v6956_v21, %v6913_v8  ;;  %v6957_v27 = vadd.f32 %v11153_v36, %v6749_v13  ;;  %v6928_v8 = vld [vmem:[#allocation2 + $0xab] sm:$0xff] }
 0x673   : > { %v7030_v17 = vmax.f32 %v6994_v14, 0.0  ;;  %v6995_v22 = vadd.f32 %v6959_v53, %v6916_v1  ;;  %v6926_v14 = vld [vmem:[#allocation2 + $0x9b] sm:$0xff] }
 0x674   : > { %v7028_v48 = vmax.f32 %v6992_v7, 0.0  ;;  %v6993_v42 = vadd.f32 %v6957_v27, %v6914_v3 }
 0x675   : > { %7066 = vst.msk [vmem:[%s11163_s21 + $0x30] sm:$0xff] %vm11709_vm6, %v7030_v17  ;;  %v7031_v49 = vmax.f32 %v6995_v22, 0.0  ;;  %vm11724_vm6 = vmmov %vm11667_vm0 }
 0x676   : > { %7064 = vst.msk [vmem:[%s11163_s21 + $0x20] sm:$0xff] %vm11710_vm14, %v7028_v48  ;;  %v7029_v30 = vmax.f32 %v6993_v42, 0.0  ;;  %v8502_v59 = vpop.f32.mrb[8].mxu1  ;;  %vm11725_vm14 = vmmov %vm11667_vm0 }
 0x677   : > { %7067 = vst.msk [vmem:[%s11163_s21 + $0x38] sm:$0xff] %vm11711_vm3, %v7031_v49  ;;  %v6962_v44 = vadd.f32 %v8502_v59, %v11153_v36  ;;  %v6762_v31 = vpop.f32.mrb[9].mxu1  ;;  %v6931_v49 = vld [vmem:[#allocation2 + $0xc3] sm:$0xff]  ;;  %vm11726_vm3 = vmmov %vm11667_vm0 }
 0x678   : > { %7065 = vst.msk [vmem:[%s11163_s21 + $0x28] sm:$0xff] %vm11712_vm9, %v7029_v30  ;;  %v6960_v47 = vadd.f32 %v11153_v36, %v6762_v31  ;;  %v8503_v15 = vpop.f32.mrb[10].mxu1  ;;  %vm11727_vm9 = vmmov %vm11667_vm0 }
 0x679   : > { %v6998_v45 = vadd.f32 %v6962_v44, %v6919_v34  ;;  %v6963_v29 = vadd.f32 %v8503_v15, %v11153_v36  ;;  %v6765_v46 = vpop.f32.mrb[11].mxu1  ;;  %v6929_v34 = vld [vmem:[#allocation2 + $0xb3] sm:$0xff] }
 0x67a   : > { %v6996_v0 = vadd.f32 %v6960_v47, %v6917_v12  ;;  %v6961_v10 = vadd.f32 %v11153_v36, %v6765_v46  ;;  %v6932_v12 = vld [vmem:[#allocation2 + $0xcb] sm:$0xff] }
 0x67b   : > { %v7034_v4 = vmax.f32 %v6998_v45, 0.0  ;;  %v6999_v35 = vadd.f32 %v6963_v29, %v6920_v18  ;;  %v6930_v45 = vld [vmem:[#allocation2 + $0xbb] sm:$0xff] }
 0x67c   : > { %v7032_v6 = vmax.f32 %v6996_v0, 0.0  ;;  %v6997_v56 = vadd.f32 %v6961_v10, %v6918_v58 }
 0x67d   : > { %7070 = vst.msk [vmem:[%s11163_s21 + $0x50] sm:$0xff] %vm11667_vm0, %v7034_v4  ;;  %v7035_v38 = vmax.f32 %v6999_v35, 0.0 }
 0x67e   : > { %7068 = vst.msk [vmem:[%s11163_s21 + $0x40] sm:$0xff] %vm11713_vm2, %v7032_v6  ;;  %v7033_v24 = vmax.f32 %v6997_v56, 0.0  ;;  %v8506_v20 = vpop.f32.mrb[12].mxu1  ;;  %vm11728_vm2 = vmmov %vm11667_vm0 }
 0x67f   : > { %7071 = vst.msk [vmem:[%s11163_s21 + $0x58] sm:$0xff] %vm11714_vm10, %v7035_v38  ;;  %v6966_v37 = vadd.f32 %v8506_v20, %v11153_v36  ;;  %v6778_v62 = vpop.f32.mrb[13].mxu1  ;;  %v6935_v38 = vld [vmem:[#allocation2 + $0xe3] sm:$0xff]  ;;  %vm11729_vm10 = vmmov %vm11667_vm0 }
 0x680   : > { %7069 = vst.msk [vmem:[%s11163_s21 + $0x48] sm:$0xff] %vm11715_vm11, %v7033_v24  ;;  %v6964_v26 = vadd.f32 %v11153_v36, %v6778_v62  ;;  %v8507_v51 = vpop.f32.mrb[14].mxu1  ;;  %vm11730_vm11 = vmmov %vm11667_vm0 }
 0x681   : > { %v7002_v55 = vadd.f32 %v6966_v37, %v6923_v50  ;;  %v6967_v11 = vadd.f32 %v8507_v51, %v11153_v36  ;;  %v6781_v25 = vpop.f32.mrb[15].mxu1  ;;  %v6933_v50 = vld [vmem:[#allocation2 + $0xd3] sm:$0xff] }
 0x682   : > { %v7000_v41 = vadd.f32 %v6964_v26, %v6921_v54  ;;  %v6965_v60 = vadd.f32 %v11153_v36, %v6781_v25  ;;  %v6936_v54 = vld [vmem:[#allocation2 + $0xeb] sm:$0xff] }
 0x683   : > { %v7038_v19 = vmax.f32 %v7002_v55, 0.0  ;;  %v7003_v32 = vadd.f32 %v6967_v11, %v6924_v61  ;;  %v6934_v55 = vld [vmem:[#allocation2 + $0xdb] sm:$0xff] }
 0x684   : > { %v7036_v63 = vmax.f32 %v7000_v41, 0.0  ;;  %v7001_v39 = vadd.f32 %v6965_v60, %v6922_v57 }
 0x685   : > { %7074 = vst.msk [vmem:[%s11163_s21 + $0x70] sm:$0xff] %vm11716_vm12, %v7038_v19  ;;  %v7039_v40 = vmax.f32 %v7003_v32, 0.0  ;;  %vm11731_vm12 = vmmov %vm11667_vm0 }
 0x686   : > { %7072 = vst.msk [vmem:[%s11163_s21 + $0x60] sm:$0xff] %vm11717_vm13, %v7036_v63  ;;  %v7037_v33 = vmax.f32 %v7001_v39, 0.0  ;;  %v8510_v9 = vpop.f32.mrb[16].mxu1  ;;  %vm11732_vm13 = vmmov %vm11667_vm0 }
 0x687   : > { %7075 = vst.msk [vmem:[%s11163_s21 + $0x78] sm:$0xff] %vm11718_vm15, %v7039_v40  ;;  %v6970_v52 = vadd.f32 %v8510_v9, %v11153_v36  ;;  %v6794_v23 = vpop.f32.mrb[17].mxu1  ;;  %v6939_v40 = vld [vmem:[#allocation2 + $0x103] sm:$0xff]  ;;  %vm11733_vm15 = vmmov %vm11667_vm0 }
 0x688   : > { %7073 = vst.msk [vmem:[%s11163_s21 + $0x68] sm:$0xff] %vm11719_vm4, %v7037_v33  ;;  %v6968_v5 = vadd.f32 %v11153_v36, %v6794_v23  ;;  %v8511_v2 = vpop.f32.mrb[18].mxu1  ;;  %vm11734_vm4 = vmmov %vm11667_vm0 }
 0x689   : > { %v7006_v21 = vadd.f32 %v6970_v52, %v6927_v28  ;;  %v6971_v43 = vadd.f32 %v8511_v2, %v11153_v36  ;;  %v6797_v1 = vpop.f32.mrb[19].mxu1  ;;  %v6937_v28 = vld [vmem:[#allocation2 + $0xf3] sm:$0xff] }
 0x68a   : > { %v7004_v53 = vadd.f32 %v6968_v5, %v6925_v16  ;;  %v6969_v13 = vadd.f32 %v11153_v36, %v6797_v1  ;;  %v6940_v16 = vld [vmem:[#allocation2 + $0x10b] sm:$0xff] }
 0x68b   : > { %v7042_v3 = vmax.f32 %v7006_v21, 0.0  ;;  %v7007_v7 = vadd.f32 %v6971_v43, %v6928_v8  ;;  %v6938_v21 = vld [vmem:[#allocation2 + $0xfb] sm:$0xff] }
 0x68c   : > { %v7040_v27 = vmax.f32 %v7004_v53, 0.0  ;;  %v7005_v17 = vadd.f32 %v6969_v13, %v6926_v14 }
 0x68d   : > { %7078 = vst.msk [vmem:[%s11163_s21 + $0x90] sm:$0xff] %vm11720_vm7, %v7042_v3  ;;  %v7043_v22 = vmax.f32 %v7007_v7, 0.0  ;;  %vm11735_vm7 = vmmov %vm11667_vm0 }
 0x68e   : > { %7076 = vst.msk [vmem:[%s11163_s21 + $0x80] sm:$0xff] %vm11721_vm1, %v7040_v27  ;;  %v7041_v48 = vmax.f32 %v7005_v17, 0.0  ;;  %v8514_v42 = vpop.f32.mrb[20].mxu1  ;;  %vm11736_vm1 = vmmov %vm11667_vm0 }
 0x68f   : > { %7079 = vst.msk [vmem:[%s11163_s21 + $0x98] sm:$0xff] %vm11722_vm5, %v7043_v22  ;;  %v6974_v30 = vadd.f32 %v8514_v42, %v11153_v36  ;;  %v6810_v59 = vpop.f32.mrb[21].mxu1  ;;  %v6943_v22 = vld [vmem:[#allocation2 + $0x123] sm:$0xff]  ;;  %vm11737_vm5 = vmmov %vm11667_vm0 }
 0x690   : > { %7077 = vst.msk [vmem:[%s11163_s21 + $0x88] sm:$0xff] %vm11723_vm8, %v7041_v48  ;;  %v6972_v44 = vadd.f32 %v11153_v36, %v6810_v59  ;;  %v8515_v31 = vpop.f32.mrb[22].mxu1  ;;  %vm11738_vm8 = vmmov %vm11667_vm0 }
 0x691   : > { %v7010_v47 = vadd.f32 %v6974_v30, %v6931_v49  ;;  %v6975_v15 = vadd.f32 %v8515_v31, %v11153_v36  ;;  %v6813_v18 = vpop.f32.mrb[23].mxu1  ;;  %v6941_v49 = vld [vmem:[#allocation2 + $0x113] sm:$0xff] }
 0x692   : > { %v7008_v29 = vadd.f32 %v6972_v44, %v6929_v34  ;;  %v6973_v46 = vadd.f32 %v11153_v36, %v6813_v18  ;;  %v6944_v34 = vld [vmem:[#allocation2 + $0x12b] sm:$0xff] }
 0x693   : > { %v7046_v58 = vmax.f32 %v7010_v47, 0.0  ;;  %v7011_v0 = vadd.f32 %v6975_v15, %v6932_v12  ;;  %v6942_v47 = vld [vmem:[#allocation2 + $0x11b] sm:$0xff] }
 0x694   : > { %v7044_v10 = vmax.f32 %v7008_v29, 0.0  ;;  %v7009_v4 = vadd.f32 %v6973_v46, %v6930_v45 }
 0x695   : > { %7082 = vst.msk [vmem:[%s11163_s21 + $0xb0] sm:$0xff] %vm11724_vm6, %v7046_v58  ;;  %v7047_v35 = vmax.f32 %v7011_v0, 0.0 }
 0x696   : > { %7080 = vst.msk [vmem:[%s11163_s21 + $0xa0] sm:$0xff] %vm11725_vm14, %v7044_v10  ;;  %v7045_v6 = vmax.f32 %v7009_v4, 0.0  ;;  %v8518_v56 = vpop.f32.mrb[24].mxu1 }
 0x697   : > { %7083 = vst.msk [vmem:[%s11163_s21 + $0xb8] sm:$0xff] %vm11726_vm3, %v7047_v35  ;;  %v6978_v24 = vadd.f32 %v8518_v56, %v11153_v36  ;;  %v6826_v20 = vpop.f32.mrb[25].mxu1 }
 0x698   : > { %7081 = vst.msk [vmem:[%s11163_s21 + $0xa8] sm:$0xff] %vm11727_vm9, %v7045_v6  ;;  %v6976_v37 = vadd.f32 %v11153_v36, %v6826_v20  ;;  %v8519_v62 = vpop.f32.mrb[26].mxu1 }
 0x699   : > { %v7014_v26 = vadd.f32 %v6978_v24, %v6935_v38  ;;  %v6979_v51 = vadd.f32 %v8519_v62, %v11153_v36  ;;  %v6829_v61 = vpop.f32.mrb[27].mxu1 }
 0x69a   : > { %v7012_v11 = vadd.f32 %v6976_v37, %v6933_v50  ;;  %v6977_v25 = vadd.f32 %v11153_v36, %v6829_v61 }
 0x69b   : > { %v7050_v57 = vmax.f32 %v7014_v26, 0.0  ;;  %v7015_v41 = vadd.f32 %v6979_v51, %v6936_v54 }
 0x69c   : > { %v7048_v60 = vmax.f32 %v7012_v11, 0.0  ;;  %v7013_v19 = vadd.f32 %v6977_v25, %v6934_v55 }
 0x69d   : > { %7086 = vst.msk [vmem:[%s11163_s21 + $0xd0] sm:$0xff] %vm11667_vm0, %v7050_v57  ;;  %v7051_v32 = vmax.f32 %v7015_v41, 0.0 }
 0x69e   : > { %7084 = vst.msk [vmem:[%s11163_s21 + $0xc0] sm:$0xff] %vm11728_vm2, %v7048_v60  ;;  %v7049_v63 = vmax.f32 %v7013_v19, 0.0  ;;  %v8522_v39 = vpop.f32.mrb[28].mxu1 }
 0x69f   : > { %7087 = vst.msk [vmem:[%s11163_s21 + $0xd8] sm:$0xff] %vm11729_vm10, %v7051_v32  ;;  %v6982_v33 = vadd.f32 %v8522_v39, %v11153_v36  ;;  %v6842_v9 = vpop.f32.mrb[29].mxu1 }
 0x6a0   : > { %7085 = vst.msk [vmem:[%s11163_s21 + $0xc8] sm:$0xff] %vm11730_vm11, %v7049_v63  ;;  %v6980_v52 = vadd.f32 %v11153_v36, %v6842_v9  ;;  %v8523_v23 = vpop.f32.mrb[30].mxu1 }
 0x6a1   : > { %v7018_v5 = vadd.f32 %v6982_v33, %v6939_v40  ;;  %v6983_v2 = vadd.f32 %v8523_v23, %v11153_v36  ;;  %v6845_v8 = vpop.f32.mrb[31].mxu1 }
 0x6a2   : > { %v7016_v43 = vadd.f32 %v6980_v52, %v6937_v28  ;;  %v6981_v1 = vadd.f32 %v11153_v36, %v6845_v8 }
 0x6a3   : > { %v7054_v14 = vmax.f32 %v7018_v5, 0.0  ;;  %v7019_v53 = vadd.f32 %v6983_v2, %v6940_v16 }
 0x6a4   : > { %v7052_v13 = vmax.f32 %v7016_v43, 0.0  ;;  %v7017_v3 = vadd.f32 %v6981_v1, %v6938_v21 }
 0x6a5   : > { %7090 = vst.msk [vmem:[%s11163_s21 + $0xf0] sm:$0xff] %vm11731_vm12, %v7054_v14  ;;  %v7055_v7 = vmax.f32 %v7019_v53, 0.0 }
 0x6a6   : > { %7088 = vst.msk [vmem:[%s11163_s21 + $0xe0] sm:$0xff] %vm11732_vm13, %v7052_v13  ;;  %v7053_v27 = vmax.f32 %v7017_v3, 0.0  ;;  %v8526_v17 = vpop.f32.mrb[32].mxu1 }
 0x6a7   : > { %7091 = vst.msk [vmem:[%s11163_s21 + $0xf8] sm:$0xff] %vm11733_vm15, %v7055_v7  ;;  %v6986_v48 = vadd.f32 %v8526_v17, %v11153_v36  ;;  %v6858_v42 = vpop.f32.mrb[33].mxu1 }
 0x6a8   : > { %7089 = vst.msk [vmem:[%s11163_s21 + $0xe8] sm:$0xff] %vm11734_vm4, %v7053_v27  ;;  %v6984_v30 = vadd.f32 %v11153_v36, %v6858_v42  ;;  %v8527_v59 = vpop.f32.mrb[34].mxu1 }
 0x6a9   : > { %v7022_v44 = vadd.f32 %v6986_v48, %v6943_v22  ;;  %v6987_v31 = vadd.f32 %v8527_v59, %v11153_v36  ;;  %v6861_v12 = vpop.f32.mrb[35].mxu1 }
 0x6aa   : > { %v7020_v15 = vadd.f32 %v6984_v30, %v6941_v49  ;;  %v6985_v18 = vadd.f32 %v11153_v36, %v6861_v12 }
 0x6ab   : > { %v7058_v45 = vmax.f32 %v7022_v44, 0.0  ;;  %v7023_v29 = vadd.f32 %v6987_v31, %v6944_v34 }
 0x6ac   : > { %v7056_v46 = vmax.f32 %v7020_v15, 0.0  ;;  %v7021_v58 = vadd.f32 %v6985_v18, %v6942_v47 }
 0x6ad   : > { %7094 = vst.msk [vmem:[%s11163_s21 + $0x110] sm:$0xff] %vm11735_vm7, %v7058_v45  ;;  %v7059_v0 = vmax.f32 %v7023_v29, 0.0 }
 0x6ae   : > { %7092 = vst.msk [vmem:[%s11163_s21 + $0x100] sm:$0xff] %vm11736_vm1, %v7056_v46  ;;  %v7057_v10 = vmax.f32 %v7021_v58, 0.0 }
 0x6af   : > { %7095 = vst.msk [vmem:[%s11163_s21 + $0x118] sm:$0xff] %vm11737_vm5, %v7059_v0 }
 0x6b0   : > { %7093 = vst.msk [vmem:[%s11163_s21 + $0x108] sm:$0xff] %vm11738_vm8, %v7057_v10 }
 0x6b1 PF: > { %s15_s18 = sadd.s32 1, %s9210_s18  }
 0x6b2   : > { %p12_p4 = scmp.ge.s32.totalorder %s15_s18, 4  }
 0x6b4   :  { %14 = sbr.rel (!%p12_p4) target bundleno = 1 (0x1), region = 86 }

</bundles_post_ra>
